<compile_context>
chip_gen: v7x
topology: tpu7x:2x2x1
jax: 0.10.0
libtpu: 0.0.40
codegen_flags: <defaults>
</compile_context>

<pallas_src>
import functools
import math

import jax
import jax.numpy as jnp
from jax import lax
from jax.experimental import pallas as pl
from jax.experimental.pallas import tpu as pltpu

# ----------------------------- small config -----------------------------
BSZ, SLEN = 2, 8
UTTER_DIM = 32
NHEAD = 4
HEAD_DIM = UTTER_DIM // NHEAD
FF_DIM = 64
NUM_LAYERS = 2
MAX_LEN = 10            # RelativePositionEncoding max_len
CSK_DIM = 768           # model_size == 'base'
NUM_KNOW = 6
EMO_VOCAB = 7
EMO_EMB_DIM = 16
EMOTION_DIM = 8


def _layer_norm(x, w, b, eps=1e-5):
    mu = jnp.mean(x, axis=-1, keepdims=True)
    var = jnp.mean((x - mu) ** 2, axis=-1, keepdims=True)
    return (x - mu) * lax.rsqrt(var + eps) * w + b


# ----------------------------- fused forward kernel -----------------------------
def _fused_forward_kernel(
        utter_ref, emo_ref, emo_wu_ref, know_ref,
        rel_ref, masks_ref, hsel_ref, hexp_ref,
        wqkvv_ref, wknow_ref, wo_ref, w1_ref, w2_ref, vec_ref,
        cls_w_ref, cls_bm_ref,
        o_ref,
        *, num_layers, nhead, head_dim, bsz, slen):
    B, S, H, HD = bsz, slen, nhead, head_dim
    BS = B * S
    E = utter_ref.shape[1]
    scaling = float(HD) ** (-0.5)
    f32 = jnp.float32

    # --- emotion path: x = utter @ Wu + (precomputed emotion contribution + biases) ---
    x = (jnp.dot(utter_ref[...], emo_wu_ref[...], preferred_element_type=f32)
         + emo_ref[...])                                               # (B*S, E)

    know = know_ref[...]                 # (B*S*S, E) relu(csk_mapping(.)) gathered by know_adj
    rel_k = rel_ref[0]                   # (S, S, E) head-tiled relative position (key)
    rel_v = rel_ref[1]                   # (S, S, E) head-tiled relative position (value)
    adj = masks_ref[0].reshape(BS, S)[:, :, None]      # (B*Sq, T, 1)
    s_mask = masks_ref[1][:, :, :, None]               # (B, Sq, T, 1)
    o_mask = masks_ref[2][:, :, :, None]
    hsel = hsel_ref[...]                 # (E, H) head-segment sum (block 0/1 matrix)
    hexp = hexp_ref[...]                 # (H, E) head broadcast (hsel^T)

    for l in range(num_layers):
        # packed q/k/vs/vo projection: one lane-dense (B*S, E) @ (E, 4E) matmul
        proj = jnp.dot(x, wqkvv_ref[l], preferred_element_type=f32)        # (B*S, 4E)
        q3 = proj[:, 0 * E:1 * E].reshape(B, S, E)
        k3 = proj[:, 1 * E:2 * E].reshape(B, S, E)
        vs3 = proj[:, 2 * E:3 * E].reshape(B, S, E)
        vo3 = proj[:, 3 * E:4 * E].reshape(B, S, E)
        kp4 = jnp.dot(know, wknow_ref[l],
                      preferred_element_type=f32).reshape(B, S, S, E)       # (B,Sq,T,E)

        # attention logits for all (b, h, s, t) at once:
        #   aw[b,h,s,t] = sum_d q * (k + know + rel_k); the per-head segmented sum over
        #   d is done as a single MXU matmul against the head selector.
        kk = k3[:, None, :, :] + kp4 + rel_k[None, :, :, :]                 # (B,Sq,T,E)
        p = (q3[:, :, None, :] * kk).reshape(BS * S, E)
        aw = (jnp.dot(p, hsel, preferred_element_type=f32)
              * scaling).reshape(BS, S, H)                                  # (B*Sq, T, H)

        # TODO(synk): mask_logic() is not defined in the provided source; using a
        # masked fill with a large negative value.
        aw = jnp.where(adj > 0, aw, -1e9)
        aw = aw - jnp.max(aw, axis=1, keepdims=True)
        ex = jnp.exp(aw)
        aw = ex * pl.reciprocal(jnp.sum(ex, axis=1, keepdims=True), approx=True)
        # attention dropout: eval-mode identity. TODO(synk): training-mode dropout.

        # value mixing: broadcast head weights back onto their lanes (MXU matmul) and
        # contract over T for the whole batch in one reduce.
        aw_e = jnp.dot(aw.reshape(BS * S, H), hexp,
                       preferred_element_type=f32).reshape(B, S, S, E)      # (B,Sq,T,E)
        v = (s_mask * vs3[:, None, :, :] + o_mask * vo3[:, None, :, :]
             + rel_v[None, :, :, :])                                        # (B,Sq,T,E)
        attn = jnp.sum((aw_e * v).reshape(BS, S, E), axis=1)                # (B*Sq, E)
        attn = jnp.dot(attn, wo_ref[l], preferred_element_type=f32)         # output proj

        # --- residual + LN + feed-forward (all (B*S, .) 2-D, no scratch round-trip) ---
        vec = vec_ref[l]                                                    # (6, FF)
        ss = _layer_norm(x + attn, vec[0:1, 0:E], vec[1:2, 0:E])
        h1 = jnp.maximum(jnp.dot(ss, w1_ref[l], preferred_element_type=f32)
                         + vec[2:3, :], 0.0)
        h2 = jnp.dot(h1, w2_ref[l], preferred_element_type=f32) + vec[3:4, 0:E]
        x = _layer_norm(h2 + ss, vec[4:5, 0:E], vec[5:6, 0:E])

    # --- classifier ---
    # TODO(synk): CausePredictor is not defined in the provided source; using an MLP +
    # bilinear pairwise scorer masked by c_mask as a stand-in.
    hcls = jnp.maximum(jnp.dot(x, cls_w_ref[0], preferred_element_type=f32)
                       + cls_bm_ref[...], 0.0)
    hp = jnp.dot(hcls, cls_w_ref[1], preferred_element_type=f32)
    scores = jnp.einsum('bse,bte->bst', hp.reshape(B, S, E), hcls.reshape(B, S, E),
                        preferred_element_type=f32)
    o_ref[...] = scores * masks_ref[3]                                      # single store


# ----------------------------- full forward (wrapper) -----------------------------
def csk_transformer_forward(params, utter_emb, knowledge_emb, adj, s_mask, o_mask,
                            c_mask, emotion_label, know_adj):
    B, S, E = utter_emb.shape
    H, HD = NHEAD, HEAD_DIM
    # TODO(synk): UtterEncoder2 (pretrained LM utterance / knowledge encoder + max-pool)
    # has no Pallas equivalent; its pooled outputs (utter_emb, knowledge_emb) are inputs.

    # ---- constant (x-independent) branches hoisted to the wrapper (exact in eval mode) ----
    # Emotion path folded into a single gathered per-token contribution (incl. biases).
    emo_tab = params["emo_table"] @ params["emo_lin_w_t"] + params["emo_lin_b"]
    emo_tab = emo_tab @ params["emo_map_we"] + params["emo_map_b"]       # (EMO_VOCAB, E)
    emo_contrib = jnp.take(emo_tab, emotion_label.reshape(-1), axis=0)   # (B*S, E)

    # Knowledge branch: csk_mapping + relu + gather by know_adj.
    knowledge = jax.nn.relu(knowledge_emb @ params["csk_w_t"] + params["csk_b"])
    know = jnp.take(knowledge, know_adj.reshape(-1), axis=0)             # (B*S*S, E)

    # Relative position embeddings, tiled across heads so head h reads lanes [h*HD,(h+1)*HD).
    src = jnp.arange(S)[None, :]
    tgt = jnp.arange(S)[:, None]
    pos_mask = jnp.clip(tgt - src + 1, 0, MAX_LEN)
    rel_k = jnp.take(params["pe_k"], pos_mask, axis=0)                   # (S, S, HD)
    rel_v = jnp.take(params["pe_v"], pos_mask, axis=0)
    rel = jnp.stack([jnp.tile(rel_k, (1, 1, H)), jnp.tile(rel_v, (1, 1, H))])  # (2,S,S,E)

    masks = jnp.stack([adj, s_mask, o_mask, c_mask]).astype(jnp.float32)  # (4,B,S,S)

    hsel = jnp.repeat(jnp.eye(H, dtype=jnp.float32), HD, axis=0)          # (E, H)
    hexp = hsel.T                                                         # (H, E)

    lps = params["layers"]
    wqkvv = jnp.stack([jnp.concatenate(
        [lp["wq_t"], lp["wk_t"], lp["wvs_t"], lp["wvo_t"]], axis=1) for lp in lps])  # (L,E,4E)
    wknow = jnp.stack([lp["wknow_t"] for lp in lps])
    wo = jnp.stack([lp["wo_t"] for lp in lps])
    w1 = jnp.stack([lp["w1_t"] for lp in lps])
    w2 = jnp.stack([lp["w2_t"] for lp in lps])

    def _row(v):  # pad an E-vector to FF width so all small per-layer vectors share one slab
        return jnp.pad(v.reshape(1, -1), ((0, 0), (0, FF_DIM - v.size)))
    vec = jnp.stack([jnp.concatenate(
        [_row(lp["ln1_w"]), _row(lp["ln1_b"]), lp["b1"].reshape(1, FF_DIM),
         _row(lp["b2"]), _row(lp["ln2_w"]), _row(lp["ln2_b"])], axis=0)
        for lp in lps])                                                   # (L, 6, FF)

    cls_w = jnp.stack([params["cls_wm_t"], params["cls_wp"]])             # (2, E, E)

    args = (
        utter_emb.reshape(B * S, E), emo_contrib, params["emo_map_wu"], know,
        rel, masks, hsel, hexp,
        wqkvv, wknow, wo, w1, w2, vec,
        cls_w, params["cls_bm"],
    )

    vmem = pl.BlockSpec(memory_space=pltpu.MemorySpace.VMEM)
    kernel = functools.partial(_fused_forward_kernel, num_layers=NUM_LAYERS,
                               nhead=NHEAD, head_dim=HEAD_DIM, bsz=B, slen=S)
    logits = pl.pallas_call(
        kernel,
        out_shape=jax.ShapeDtypeStruct((B, S, S), jnp.float32),
        in_specs=[vmem] * len(args),
        out_specs=vmem,
        cost_estimate=pl.CostEstimate(flops=2_000_000, transcendentals=2_048,
                                      bytes_accessed=140_000),
    )(*args)
    return logits


# ----------------------------- parameter init (deterministic) -----------------------------
def _xavier(key, out_dim, in_dim):
    a = math.sqrt(6.0 / (in_dim + out_dim))
    return jax.random.uniform(key, (out_dim, in_dim), jnp.float32, -a, a)


def init_params(key):
    ks = iter(jax.random.split(key, 64))
    p = {}
    # csk_mapping: Linear(CSK_DIM -> UTTER_DIM)
    p["csk_w_t"] = _xavier(next(ks), UTTER_DIM, CSK_DIM).T
    p["csk_b"] = jnp.zeros((UTTER_DIM,), jnp.float32)
    # emotion embeddings / mapping
    p["emo_table"] = jax.random.normal(next(ks), (EMO_VOCAB, EMO_EMB_DIM), jnp.float32)
    p["emo_lin_w_t"] = _xavier(next(ks), EMOTION_DIM, EMO_EMB_DIM).T
    p["emo_lin_b"] = jnp.zeros((EMOTION_DIM,), jnp.float32)
    emo_map_w_t = _xavier(next(ks), UTTER_DIM, UTTER_DIM + EMOTION_DIM).T
    p["emo_map_wu"] = emo_map_w_t[:UTTER_DIM, :]     # multiplies the utterance part
    p["emo_map_we"] = emo_map_w_t[UTTER_DIM:, :]     # multiplies the emotion part
    p["emo_map_b"] = jnp.zeros((UTTER_DIM,), jnp.float32)
    # relative position embeddings (padding_idx=0 row zeroed)
    pe_k = jax.random.normal(next(ks), (MAX_LEN + 1, HEAD_DIM), jnp.float32)
    pe_v = jax.random.normal(next(ks), (MAX_LEN + 1, HEAD_DIM), jnp.float32)
    p["pe_k"] = pe_k.at[0].set(0.0)
    p["pe_v"] = pe_v.at[0].set(0.0)
    # transformer layers
    layers = []
    for _ in range(NUM_LAYERS):
        lp = {
            "wq_t": _xavier(next(ks), UTTER_DIM, UTTER_DIM).T,
            "wk_t": _xavier(next(ks), UTTER_DIM, UTTER_DIM).T,
            "wvs_t": _xavier(next(ks), UTTER_DIM, UTTER_DIM).T,
            "wvo_t": _xavier(next(ks), UTTER_DIM, UTTER_DIM).T,
            "wknow_t": _xavier(next(ks), UTTER_DIM, UTTER_DIM).T,
            "wo_t": _xavier(next(ks), UTTER_DIM, UTTER_DIM).T,
            "ln1_w": jnp.ones((UTTER_DIM,), jnp.float32),
            "ln1_b": jnp.zeros((UTTER_DIM,), jnp.float32),
            "w1_t": _xavier(next(ks), FF_DIM, UTTER_DIM).T,
            "b1": jnp.zeros((FF_DIM,), jnp.float32),
            "w2_t": _xavier(next(ks), UTTER_DIM, FF_DIM).T,
            "b2": jnp.zeros((UTTER_DIM,), jnp.float32),
            "ln2_w": jnp.ones((UTTER_DIM,), jnp.float32),
            "ln2_b": jnp.zeros((UTTER_DIM,), jnp.float32),
        }
        layers.append(lp)
    p["layers"] = layers
    # classifier stand-in
    p["cls_wm_t"] = _xavier(next(ks), UTTER_DIM, UTTER_DIM).T
    p["cls_bm"] = jnp.zeros((1, UTTER_DIM), jnp.float32)
    p["cls_wp"] = _xavier(next(ks), UTTER_DIM, UTTER_DIM)
    return p


# ----------------------------- main -----------------------------
if __name__ == "__main__":
    key = jax.random.PRNGKey(0)
    k_par, k_ue, k_ke, k_adj, k_sm, k_el, k_ka = jax.random.split(key, 7)

    params = init_params(k_par)

    utter_emb = jax.random.normal(k_ue, (BSZ, SLEN, UTTER_DIM), jnp.float32)
    knowledge_emb = jax.random.normal(k_ke, (NUM_KNOW, CSK_DIM), jnp.float32)

    eye = jnp.eye(SLEN, dtype=jnp.float32)[None]
    adj = (jax.random.uniform(k_adj, (BSZ, SLEN, SLEN)) > 0.3).astype(jnp.float32)
    adj = jnp.maximum(adj, eye)                         # ensure no fully-masked row
    s_mask = (jax.random.uniform(k_sm, (BSZ, SLEN, SLEN)) > 0.5).astype(jnp.float32)
    o_mask = 1.0 - s_mask
    c_mask = jnp.tril(jnp.ones((SLEN, SLEN), jnp.float32))[None].repeat(BSZ, axis=0)
    emotion_label = jax.random.randint(k_el, (BSZ, SLEN), 0, EMO_VOCAB)
    know_adj = jax.random.randint(k_ka, (BSZ, SLEN, SLEN), 0, NUM_KNOW)

    fwd = jax.jit(csk_transformer_forward)
    logits = fwd(params, utter_emb, knowledge_emb, adj, s_mask, o_mask,
                 c_mask, emotion_label, know_adj)
    logits = jax.block_until_ready(logits)
    assert logits.shape == (BSZ, SLEN, SLEN)
    assert bool(jnp.all(jnp.isfinite(logits)))
    print("KERNEL_OK")
</pallas_src>

<mosaic_0001>
module attributes {stable_mosaic.version = 11 : i64} {
  func.func @_fused_forward_kernel(%arg0: memref<16x32xf32, #tpu.memory_space<vmem>>, %arg1: memref<16x32xf32, #tpu.memory_space<vmem>>, %arg2: memref<32x32xf32, #tpu.memory_space<vmem>>, %arg3: memref<128x32xf32, #tpu.memory_space<vmem>>, %arg4: memref<2x8x8x32xf32, #tpu.memory_space<vmem>>, %arg5: memref<4x2x8x8xf32, #tpu.memory_space<vmem>>, %arg6: memref<32x4xf32, #tpu.memory_space<vmem>>, %arg7: memref<4x32xf32, #tpu.memory_space<vmem>>, %arg8: memref<2x32x128xf32, #tpu.memory_space<vmem>>, %arg9: memref<2x32x32xf32, #tpu.memory_space<vmem>>, %arg10: memref<2x32x32xf32, #tpu.memory_space<vmem>>, %arg11: memref<2x32x64xf32, #tpu.memory_space<vmem>>, %arg12: memref<2x64x32xf32, #tpu.memory_space<vmem>>, %arg13: memref<2x6x64xf32, #tpu.memory_space<vmem>>, %arg14: memref<2x32x32xf32, #tpu.memory_space<vmem>>, %arg15: memref<1x32xf32, #tpu.memory_space<vmem>>, %arg16: memref<2x8x8xf32, #tpu.memory_space<vmem>>) attributes {dimension_semantics = [], scalar_prefetch = 0 : i64, scratch_operands = 0 : i64, tpu.core_type = #tpu.core_type<tc>} {
    %c0 = arith.constant 0 : index
    %c0_0 = arith.constant 0 : index
    %0 = vector.load %arg0[%c0, %c0_0] : memref<16x32xf32, #tpu.memory_space<vmem>>, vector<16x32xf32>
    %c0_1 = arith.constant 0 : index
    %c0_2 = arith.constant 0 : index
    %1 = vector.load %arg2[%c0_1, %c0_2] : memref<32x32xf32, #tpu.memory_space<vmem>>, vector<32x32xf32>
    %cst = arith.constant dense<0.000000e+00> : vector<16x32xf32>
    %2 = tpu.matmul %0, %1, %cst {dimension_numbers = #tpu.dot_dimension_numbers<[1], [0], [0], [1], [0, 0, 1, 1], [], []>} : vector<16x32xf32>, vector<32x32xf32>, vector<16x32xf32> -> vector<16x32xf32>
    %c0_3 = arith.constant 0 : index
    %c0_4 = arith.constant 0 : index
    %3 = vector.load %arg1[%c0_3, %c0_4] : memref<16x32xf32, #tpu.memory_space<vmem>>, vector<16x32xf32>
    %4 = arith.addf %2, %3 : vector<16x32xf32>
    %c0_5 = arith.constant 0 : index
    %c0_6 = arith.constant 0 : index
    %5 = vector.load %arg3[%c0_5, %c0_6] : memref<128x32xf32, #tpu.memory_space<vmem>>, vector<128x32xf32>
    %c0_7 = arith.constant 0 : index
    %c0_8 = arith.constant 0 : index
    %c0_9 = arith.constant 0 : index
    %c0_10 = arith.constant 0 : index
    %6 = vector.load %arg4[%c0_7, %c0_8, %c0_9, %c0_10] : memref<2x8x8x32xf32, #tpu.memory_space<vmem>>, vector<1x8x8x32xf32>
    %7 = vector.shape_cast %6 : vector<1x8x8x32xf32> to vector<8x8x32xf32>
    %c1 = arith.constant 1 : index
    %c0_11 = arith.constant 0 : index
    %c0_12 = arith.constant 0 : index
    %c0_13 = arith.constant 0 : index
    %8 = vector.load %arg4[%c1, %c0_11, %c0_12, %c0_13] : memref<2x8x8x32xf32, #tpu.memory_space<vmem>>, vector<1x8x8x32xf32>
    %9 = vector.shape_cast %8 : vector<1x8x8x32xf32> to vector<8x8x32xf32>
    %c0_14 = arith.constant 0 : index
    %c0_15 = arith.constant 0 : index
    %c0_16 = arith.constant 0 : index
    %c0_17 = arith.constant 0 : index
    %10 = vector.load %arg5[%c0_14, %c0_15, %c0_16, %c0_17] : memref<4x2x8x8xf32, #tpu.memory_space<vmem>>, vector<1x2x8x8xf32>
    %11 = vector.shape_cast %10 : vector<1x2x8x8xf32> to vector<2x8x8xf32>
    %12 = vector.shape_cast %11 : vector<2x8x8xf32> to vector<16x8xf32>
    %13 = vector.shape_cast %12 : vector<16x8xf32> to vector<16x8x1xf32>
    %c1_18 = arith.constant 1 : index
    %c0_19 = arith.constant 0 : index
    %c0_20 = arith.constant 0 : index
    %c0_21 = arith.constant 0 : index
    %14 = vector.load %arg5[%c1_18, %c0_19, %c0_20, %c0_21] : memref<4x2x8x8xf32, #tpu.memory_space<vmem>>, vector<1x2x8x8xf32>
    %15 = vector.shape_cast %14 : vector<1x2x8x8xf32> to vector<2x8x8xf32>
    %16 = vector.shape_cast %15 : vector<2x8x8xf32> to vector<2x8x8x1xf32>
    %c2 = arith.constant 2 : index
    %c0_22 = arith.constant 0 : index
    %c0_23 = arith.constant 0 : index
    %c0_24 = arith.constant 0 : index
    %17 = vector.load %arg5[%c2, %c0_22, %c0_23, %c0_24] : memref<4x2x8x8xf32, #tpu.memory_space<vmem>>, vector<1x2x8x8xf32>
    %18 = vector.shape_cast %17 : vector<1x2x8x8xf32> to vector<2x8x8xf32>
    %19 = vector.shape_cast %18 : vector<2x8x8xf32> to vector<2x8x8x1xf32>
    %c0_25 = arith.constant 0 : index
    %c0_26 = arith.constant 0 : index
    %20 = vector.load %arg6[%c0_25, %c0_26] : memref<32x4xf32, #tpu.memory_space<vmem>>, vector<32x4xf32>
    %c0_27 = arith.constant 0 : index
    %c0_28 = arith.constant 0 : index
    %21 = vector.load %arg7[%c0_27, %c0_28] : memref<4x32xf32, #tpu.memory_space<vmem>>, vector<4x32xf32>
    %c0_29 = arith.constant 0 : index
    %c0_30 = arith.constant 0 : index
    %c0_31 = arith.constant 0 : index
    %22 = vector.load %arg8[%c0_29, %c0_30, %c0_31] : memref<2x32x128xf32, #tpu.memory_space<vmem>>, vector<1x32x128xf32>
    %23 = vector.shape_cast %22 : vector<1x32x128xf32> to vector<32x128xf32>
    %cst_32 = arith.constant dense<0.000000e+00> : vector<16x128xf32>
    %24 = tpu.matmul %4, %23, %cst_32 {dimension_numbers = #tpu.dot_dimension_numbers<[1], [0], [0], [1], [0, 0, 1, 1], [], []>} : vector<16x32xf32>, vector<32x128xf32>, vector<16x128xf32> -> vector<16x128xf32>
    %25 = vector.extract_strided_slice %24 {offsets = [0, 0], sizes = [16, 32], strides = [1, 1]} : vector<16x128xf32> to vector<16x32xf32>
    %26 = vector.shape_cast %25 : vector<16x32xf32> to vector<2x8x32xf32>
    %27 = vector.extract_strided_slice %24 {offsets = [0, 32], sizes = [16, 32], strides = [1, 1]} : vector<16x128xf32> to vector<16x32xf32>
    %28 = vector.shape_cast %27 : vector<16x32xf32> to vector<2x8x32xf32>
    %29 = vector.extract_strided_slice %24 {offsets = [0, 64], sizes = [16, 32], strides = [1, 1]} : vector<16x128xf32> to vector<16x32xf32>
    %30 = vector.shape_cast %29 : vector<16x32xf32> to vector<2x8x32xf32>
    %31 = vector.extract_strided_slice %24 {offsets = [0, 96], sizes = [16, 32], strides = [1, 1]} : vector<16x128xf32> to vector<16x32xf32>
    %32 = vector.shape_cast %31 : vector<16x32xf32> to vector<2x8x32xf32>
    %c0_33 = arith.constant 0 : index
    %c0_34 = arith.constant 0 : index
    %c0_35 = arith.constant 0 : index
    %33 = vector.load %arg9[%c0_33, %c0_34, %c0_35] : memref<2x32x32xf32, #tpu.memory_space<vmem>>, vector<1x32x32xf32>
    %34 = vector.shape_cast %33 : vector<1x32x32xf32> to vector<32x32xf32>
    %cst_36 = arith.constant dense<0.000000e+00> : vector<128x32xf32>
    %35 = tpu.matmul %5, %34, %cst_36 {dimension_numbers = #tpu.dot_dimension_numbers<[1], [0], [0], [1], [0, 0, 1, 1], [], []>} : vector<128x32xf32>, vector<32x32xf32>, vector<128x32xf32> -> vector<128x32xf32>
    %36 = vector.shape_cast %35 : vector<128x32xf32> to vector<2x8x8x32xf32>
    %37 = vector.shape_cast %28 : vector<2x8x32xf32> to vector<2x1x8x32xf32>
    %38 = vector.broadcast %37 : vector<2x1x8x32xf32> to vector<2x8x8x32xf32>
    %39 = arith.addf %38, %36 : vector<2x8x8x32xf32>
    %40 = vector.shape_cast %7 : vector<8x8x32xf32> to vector<1x8x8x32xf32>
    %41 = vector.broadcast %40 : vector<1x8x8x32xf32> to vector<2x8x8x32xf32>
    %42 = arith.addf %39, %41 : vector<2x8x8x32xf32>
    %43 = vector.shape_cast %26 : vector<2x8x32xf32> to vector<2x8x1x32xf32>
    %44 = vector.broadcast %43 : vector<2x8x1x32xf32> to vector<2x8x8x32xf32>
    %45 = arith.mulf %44, %42 : vector<2x8x8x32xf32>
    %46 = vector.shape_cast %45 : vector<2x8x8x32xf32> to vector<128x32xf32>
    %cst_37 = arith.constant dense<0.000000e+00> : vector<128x4xf32>
    %47 = tpu.matmul %46, %20, %cst_37 {dimension_numbers = #tpu.dot_dimension_numbers<[1], [0], [0], [1], [0, 0, 1, 1], [], []>} : vector<128x32xf32>, vector<32x4xf32>, vector<128x4xf32> -> vector<128x4xf32>
    %cst_38 = arith.constant 0.353553385 : f32
    %48 = vector.broadcast %cst_38 : f32 to vector<128x4xf32>
    %49 = arith.mulf %47, %48 : vector<128x4xf32>
    %50 = vector.shape_cast %49 : vector<128x4xf32> to vector<16x8x4xf32>
    %cst_39 = arith.constant 0.000000e+00 : f32
    %51 = vector.broadcast %cst_39 : f32 to vector<16x8x1xf32>
    %52 = arith.cmpf ogt, %13, %51 : vector<16x8x1xf32>
    %cst_40 = arith.constant -1.000000e+09 : f32
    %53 = vector.shape_cast %52 : vector<16x8x1xi1> to vector<16x8x1xi1>
    %54 = vector.broadcast %53 : vector<16x8x1xi1> to vector<16x8x4xi1>
    %55 = vector.broadcast %cst_40 : f32 to vector<16x8x4xf32>
    %56 = arith.select %54, %50, %55 : vector<16x8x4xi1>, vector<16x8x4xf32>
    %cst_41 = arith.constant dense<0xFF800000> : vector<16x4xf32>
    %57 = vector.multi_reduction <maximumf>, %56, %cst_41 [1] : vector<16x8x4xf32> to vector<16x4xf32>
    %58 = vector.shape_cast %57 : vector<16x4xf32> to vector<16x1x4xf32>
    %59 = vector.broadcast %58 : vector<16x1x4xf32> to vector<16x8x4xf32>
    %60 = arith.subf %56, %59 : vector<16x8x4xf32>
    %61 = math.exp %60 : vector<16x8x4xf32>
    %cst_42 = arith.constant dense<0.000000e+00> : vector<16x4xf32>
    %62 = vector.multi_reduction <add>, %61, %cst_42 [1] : vector<16x8x4xf32> to vector<16x4xf32>
    %63 = vector.shape_cast %62 : vector<16x4xf32> to vector<16x1x4xf32>
    %64 = tpu.reciprocal %63 {approx = true} : vector<16x1x4xf32> -> vector<16x1x4xf32>
    %65 = vector.broadcast %64 : vector<16x1x4xf32> to vector<16x8x4xf32>
    %66 = arith.mulf %61, %65 : vector<16x8x4xf32>
    %67 = vector.shape_cast %66 : vector<16x8x4xf32> to vector<128x4xf32>
    %cst_43 = arith.constant dense<0.000000e+00> : vector<128x32xf32>
    %68 = tpu.matmul %67, %21, %cst_43 {dimension_numbers = #tpu.dot_dimension_numbers<[1], [0], [0], [1], [0, 0, 1, 1], [], []>} : vector<128x4xf32>, vector<4x32xf32>, vector<128x32xf32> -> vector<128x32xf32>
    %69 = vector.shape_cast %68 : vector<128x32xf32> to vector<2x8x8x32xf32>
    %70 = vector.shape_cast %30 : vector<2x8x32xf32> to vector<2x1x8x32xf32>
    %71 = vector.broadcast %16 : vector<2x8x8x1xf32> to vector<2x8x8x32xf32>
    %72 = vector.broadcast %70 : vector<2x1x8x32xf32> to vector<2x8x8x32xf32>
    %73 = arith.mulf %71, %72 : vector<2x8x8x32xf32>
    %74 = vector.shape_cast %32 : vector<2x8x32xf32> to vector<2x1x8x32xf32>
    %75 = vector.broadcast %19 : vector<2x8x8x1xf32> to vector<2x8x8x32xf32>
    %76 = vector.broadcast %74 : vector<2x1x8x32xf32> to vector<2x8x8x32xf32>
    %77 = arith.mulf %75, %76 : vector<2x8x8x32xf32>
    %78 = arith.addf %73, %77 : vector<2x8x8x32xf32>
    %79 = vector.shape_cast %9 : vector<8x8x32xf32> to vector<1x8x8x32xf32>
    %80 = vector.broadcast %79 : vector<1x8x8x32xf32> to vector<2x8x8x32xf32>
    %81 = arith.addf %78, %80 : vector<2x8x8x32xf32>
    %82 = arith.mulf %69, %81 : vector<2x8x8x32xf32>
    %83 = vector.shape_cast %82 : vector<2x8x8x32xf32> to vector<16x8x32xf32>
    %cst_44 = arith.constant dense<0.000000e+00> : vector<16x32xf32>
    %84 = vector.multi_reduction <add>, %83, %cst_44 [1] : vector<16x8x32xf32> to vector<16x32xf32>
    %c0_45 = arith.constant 0 : index
    %c0_46 = arith.constant 0 : index
    %c0_47 = arith.constant 0 : index
    %85 = vector.load %arg10[%c0_45, %c0_46, %c0_47] : memref<2x32x32xf32, #tpu.memory_space<vmem>>, vector<1x32x32xf32>
    %86 = vector.shape_cast %85 : vector<1x32x32xf32> to vector<32x32xf32>
    %cst_48 = arith.constant dense<0.000000e+00> : vector<16x32xf32>
    %87 = tpu.matmul %84, %86, %cst_48 {dimension_numbers = #tpu.dot_dimension_numbers<[1], [0], [0], [1], [0, 0, 1, 1], [], []>} : vector<16x32xf32>, vector<32x32xf32>, vector<16x32xf32> -> vector<16x32xf32>
    %c0_49 = arith.constant 0 : index
    %c0_50 = arith.constant 0 : index
    %c0_51 = arith.constant 0 : index
    %88 = vector.load %arg13[%c0_49, %c0_50, %c0_51] : memref<2x6x64xf32, #tpu.memory_space<vmem>>, vector<1x6x64xf32>
    %89 = vector.shape_cast %88 : vector<1x6x64xf32> to vector<6x64xf32>
    %90 = arith.addf %4, %87 : vector<16x32xf32>
    %91 = vector.extract_strided_slice %89 {offsets = [0, 0], sizes = [1, 32], strides = [1, 1]} : vector<6x64xf32> to vector<1x32xf32>
    %92 = vector.extract_strided_slice %89 {offsets = [1, 0], sizes = [1, 32], strides = [1, 1]} : vector<6x64xf32> to vector<1x32xf32>
    %cst_52 = arith.constant dense<0.000000e+00> : vector<16xf32>
    %93 = vector.multi_reduction <add>, %90, %cst_52 [1] : vector<16x32xf32> to vector<16xf32>
    %94 = vector.shape_cast %93 : vector<16xf32> to vector<16x1xf32>
    %cst_53 = arith.constant 3.200000e+01 : f32
    %95 = vector.broadcast %cst_53 : f32 to vector<16x1xf32>
    %96 = arith.divf %94, %95 : vector<16x1xf32>
    %97 = vector.broadcast %96 : vector<16x1xf32> to vector<16x32xf32>
    %98 = arith.subf %90, %97 : vector<16x32xf32>
    %99 = arith.mulf %98, %98 : vector<16x32xf32>
    %cst_54 = arith.constant dense<0.000000e+00> : vector<16xf32>
    %100 = vector.multi_reduction <add>, %99, %cst_54 [1] : vector<16x32xf32> to vector<16xf32>
    %101 = vector.shape_cast %100 : vector<16xf32> to vector<16x1xf32>
    %cst_55 = arith.constant 3.200000e+01 : f32
    %102 = vector.broadcast %cst_55 : f32 to vector<16x1xf32>
    %103 = arith.divf %101, %102 : vector<16x1xf32>
    %104 = vector.broadcast %96 : vector<16x1xf32> to vector<16x32xf32>
    %105 = arith.subf %90, %104 : vector<16x32xf32>
    %cst_56 = arith.constant 9.99999974E-6 : f32
    %106 = vector.broadcast %cst_56 : f32 to vector<16x1xf32>
    %107 = arith.addf %103, %106 : vector<16x1xf32>
    %108 = math.rsqrt %107 : vector<16x1xf32>
    %109 = vector.broadcast %108 : vector<16x1xf32> to vector<16x32xf32>
    %110 = arith.mulf %105, %109 : vector<16x32xf32>
    %111 = vector.broadcast %91 : vector<1x32xf32> to vector<16x32xf32>
    %112 = arith.mulf %110, %111 : vector<16x32xf32>
    %113 = vector.broadcast %92 : vector<1x32xf32> to vector<16x32xf32>
    %114 = arith.addf %112, %113 : vector<16x32xf32>
    %c0_57 = arith.constant 0 : index
    %c0_58 = arith.constant 0 : index
    %c0_59 = arith.constant 0 : index
    %115 = vector.load %arg11[%c0_57, %c0_58, %c0_59] : memref<2x32x64xf32, #tpu.memory_space<vmem>>, vector<1x32x64xf32>
    %116 = vector.shape_cast %115 : vector<1x32x64xf32> to vector<32x64xf32>
    %cst_60 = arith.constant dense<0.000000e+00> : vector<16x64xf32>
    %117 = tpu.matmul %114, %116, %cst_60 {dimension_numbers = #tpu.dot_dimension_numbers<[1], [0], [0], [1], [0, 0, 1, 1], [], []>} : vector<16x32xf32>, vector<32x64xf32>, vector<16x64xf32> -> vector<16x64xf32>
    %118 = vector.extract_strided_slice %89 {offsets = [2, 0], sizes = [1, 64], strides = [1, 1]} : vector<6x64xf32> to vector<1x64xf32>
    %119 = vector.broadcast %118 : vector<1x64xf32> to vector<16x64xf32>
    %120 = arith.addf %117, %119 : vector<16x64xf32>
    %cst_61 = arith.constant 0.000000e+00 : f32
    %121 = vector.broadcast %cst_61 : f32 to vector<16x64xf32>
    %122 = arith.maximumf %120, %121 : vector<16x64xf32>
    %c0_62 = arith.constant 0 : index
    %c0_63 = arith.constant 0 : index
    %c0_64 = arith.constant 0 : index
    %123 = vector.load %arg12[%c0_62, %c0_63, %c0_64] : memref<2x64x32xf32, #tpu.memory_space<vmem>>, vector<1x64x32xf32>
    %124 = vector.shape_cast %123 : vector<1x64x32xf32> to vector<64x32xf32>
    %cst_65 = arith.constant dense<0.000000e+00> : vector<16x32xf32>
    %125 = tpu.matmul %122, %124, %cst_65 {dimension_numbers = #tpu.dot_dimension_numbers<[1], [0], [0], [1], [0, 0, 1, 1], [], []>} : vector<16x64xf32>, vector<64x32xf32>, vector<16x32xf32> -> vector<16x32xf32>
    %126 = vector.extract_strided_slice %89 {offsets = [3, 0], sizes = [1, 32], strides = [1, 1]} : vector<6x64xf32> to vector<1x32xf32>
    %127 = vector.broadcast %126 : vector<1x32xf32> to vector<16x32xf32>
    %128 = arith.addf %125, %127 : vector<16x32xf32>
    %129 = arith.addf %128, %114 : vector<16x32xf32>
    %130 = vector.extract_strided_slice %89 {offsets = [4, 0], sizes = [1, 32], strides = [1, 1]} : vector<6x64xf32> to vector<1x32xf32>
    %131 = vector.extract_strided_slice %89 {offsets = [5, 0], sizes = [1, 32], strides = [1, 1]} : vector<6x64xf32> to vector<1x32xf32>
    %cst_66 = arith.constant dense<0.000000e+00> : vector<16xf32>
    %132 = vector.multi_reduction <add>, %129, %cst_66 [1] : vector<16x32xf32> to vector<16xf32>
    %133 = vector.shape_cast %132 : vector<16xf32> to vector<16x1xf32>
    %cst_67 = arith.constant 3.200000e+01 : f32
    %134 = vector.broadcast %cst_67 : f32 to vector<16x1xf32>
    %135 = arith.divf %133, %134 : vector<16x1xf32>
    %136 = vector.broadcast %135 : vector<16x1xf32> to vector<16x32xf32>
    %137 = arith.subf %129, %136 : vector<16x32xf32>
    %138 = arith.mulf %137, %137 : vector<16x32xf32>
    %cst_68 = arith.constant dense<0.000000e+00> : vector<16xf32>
    %139 = vector.multi_reduction <add>, %138, %cst_68 [1] : vector<16x32xf32> to vector<16xf32>
    %140 = vector.shape_cast %139 : vector<16xf32> to vector<16x1xf32>
    %cst_69 = arith.constant 3.200000e+01 : f32
    %141 = vector.broadcast %cst_69 : f32 to vector<16x1xf32>
    %142 = arith.divf %140, %141 : vector<16x1xf32>
    %143 = vector.broadcast %135 : vector<16x1xf32> to vector<16x32xf32>
    %144 = arith.subf %129, %143 : vector<16x32xf32>
    %cst_70 = arith.constant 9.99999974E-6 : f32
    %145 = vector.broadcast %cst_70 : f32 to vector<16x1xf32>
    %146 = arith.addf %142, %145 : vector<16x1xf32>
    %147 = math.rsqrt %146 : vector<16x1xf32>
    %148 = vector.broadcast %147 : vector<16x1xf32> to vector<16x32xf32>
    %149 = arith.mulf %144, %148 : vector<16x32xf32>
    %150 = vector.broadcast %130 : vector<1x32xf32> to vector<16x32xf32>
    %151 = arith.mulf %149, %150 : vector<16x32xf32>
    %152 = vector.broadcast %131 : vector<1x32xf32> to vector<16x32xf32>
    %153 = arith.addf %151, %152 : vector<16x32xf32>
    %c1_71 = arith.constant 1 : index
    %c0_72 = arith.constant 0 : index
    %c0_73 = arith.constant 0 : index
    %154 = vector.load %arg8[%c1_71, %c0_72, %c0_73] : memref<2x32x128xf32, #tpu.memory_space<vmem>>, vector<1x32x128xf32>
    %155 = vector.shape_cast %154 : vector<1x32x128xf32> to vector<32x128xf32>
    %cst_74 = arith.constant dense<0.000000e+00> : vector<16x128xf32>
    %156 = tpu.matmul %153, %155, %cst_74 {dimension_numbers = #tpu.dot_dimension_numbers<[1], [0], [0], [1], [0, 0, 1, 1], [], []>} : vector<16x32xf32>, vector<32x128xf32>, vector<16x128xf32> -> vector<16x128xf32>
    %157 = vector.extract_strided_slice %156 {offsets = [0, 0], sizes = [16, 32], strides = [1, 1]} : vector<16x128xf32> to vector<16x32xf32>
    %158 = vector.shape_cast %157 : vector<16x32xf32> to vector<2x8x32xf32>
    %159 = vector.extract_strided_slice %156 {offsets = [0, 32], sizes = [16, 32], strides = [1, 1]} : vector<16x128xf32> to vector<16x32xf32>
    %160 = vector.shape_cast %159 : vector<16x32xf32> to vector<2x8x32xf32>
    %161 = vector.extract_strided_slice %156 {offsets = [0, 64], sizes = [16, 32], strides = [1, 1]} : vector<16x128xf32> to vector<16x32xf32>
    %162 = vector.shape_cast %161 : vector<16x32xf32> to vector<2x8x32xf32>
    %163 = vector.extract_strided_slice %156 {offsets = [0, 96], sizes = [16, 32], strides = [1, 1]} : vector<16x128xf32> to vector<16x32xf32>
    %164 = vector.shape_cast %163 : vector<16x32xf32> to vector<2x8x32xf32>
    %c1_75 = arith.constant 1 : index
    %c0_76 = arith.constant 0 : index
    %c0_77 = arith.constant 0 : index
    %165 = vector.load %arg9[%c1_75, %c0_76, %c0_77] : memref<2x32x32xf32, #tpu.memory_space<vmem>>, vector<1x32x32xf32>
    %166 = vector.shape_cast %165 : vector<1x32x32xf32> to vector<32x32xf32>
    %cst_78 = arith.constant dense<0.000000e+00> : vector<128x32xf32>
    %167 = tpu.matmul %5, %166, %cst_78 {dimension_numbers = #tpu.dot_dimension_numbers<[1], [0], [0], [1], [0, 0, 1, 1], [], []>} : vector<128x32xf32>, vector<32x32xf32>, vector<128x32xf32> -> vector<128x32xf32>
    %168 = vector.shape_cast %167 : vector<128x32xf32> to vector<2x8x8x32xf32>
    %169 = vector.shape_cast %160 : vector<2x8x32xf32> to vector<2x1x8x32xf32>
    %170 = vector.broadcast %169 : vector<2x1x8x32xf32> to vector<2x8x8x32xf32>
    %171 = arith.addf %170, %168 : vector<2x8x8x32xf32>
    %172 = vector.shape_cast %7 : vector<8x8x32xf32> to vector<1x8x8x32xf32>
    %173 = vector.broadcast %172 : vector<1x8x8x32xf32> to vector<2x8x8x32xf32>
    %174 = arith.addf %171, %173 : vector<2x8x8x32xf32>
    %175 = vector.shape_cast %158 : vector<2x8x32xf32> to vector<2x8x1x32xf32>
    %176 = vector.broadcast %175 : vector<2x8x1x32xf32> to vector<2x8x8x32xf32>
    %177 = arith.mulf %176, %174 : vector<2x8x8x32xf32>
    %178 = vector.shape_cast %177 : vector<2x8x8x32xf32> to vector<128x32xf32>
    %cst_79 = arith.constant dense<0.000000e+00> : vector<128x4xf32>
    %179 = tpu.matmul %178, %20, %cst_79 {dimension_numbers = #tpu.dot_dimension_numbers<[1], [0], [0], [1], [0, 0, 1, 1], [], []>} : vector<128x32xf32>, vector<32x4xf32>, vector<128x4xf32> -> vector<128x4xf32>
    %cst_80 = arith.constant 0.353553385 : f32
    %180 = vector.broadcast %cst_80 : f32 to vector<128x4xf32>
    %181 = arith.mulf %179, %180 : vector<128x4xf32>
    %182 = vector.shape_cast %181 : vector<128x4xf32> to vector<16x8x4xf32>
    %cst_81 = arith.constant 0.000000e+00 : f32
    %183 = vector.broadcast %cst_81 : f32 to vector<16x8x1xf32>
    %184 = arith.cmpf ogt, %13, %183 : vector<16x8x1xf32>
    %cst_82 = arith.constant -1.000000e+09 : f32
    %185 = vector.shape_cast %184 : vector<16x8x1xi1> to vector<16x8x1xi1>
    %186 = vector.broadcast %185 : vector<16x8x1xi1> to vector<16x8x4xi1>
    %187 = vector.broadcast %cst_82 : f32 to vector<16x8x4xf32>
    %188 = arith.select %186, %182, %187 : vector<16x8x4xi1>, vector<16x8x4xf32>
    %cst_83 = arith.constant dense<0xFF800000> : vector<16x4xf32>
    %189 = vector.multi_reduction <maximumf>, %188, %cst_83 [1] : vector<16x8x4xf32> to vector<16x4xf32>
    %190 = vector.shape_cast %189 : vector<16x4xf32> to vector<16x1x4xf32>
    %191 = vector.broadcast %190 : vector<16x1x4xf32> to vector<16x8x4xf32>
    %192 = arith.subf %188, %191 : vector<16x8x4xf32>
    %193 = math.exp %192 : vector<16x8x4xf32>
    %cst_84 = arith.constant dense<0.000000e+00> : vector<16x4xf32>
    %194 = vector.multi_reduction <add>, %193, %cst_84 [1] : vector<16x8x4xf32> to vector<16x4xf32>
    %195 = vector.shape_cast %194 : vector<16x4xf32> to vector<16x1x4xf32>
    %196 = tpu.reciprocal %195 {approx = true} : vector<16x1x4xf32> -> vector<16x1x4xf32>
    %197 = vector.broadcast %196 : vector<16x1x4xf32> to vector<16x8x4xf32>
    %198 = arith.mulf %193, %197 : vector<16x8x4xf32>
    %199 = vector.shape_cast %198 : vector<16x8x4xf32> to vector<128x4xf32>
    %cst_85 = arith.constant dense<0.000000e+00> : vector<128x32xf32>
    %200 = tpu.matmul %199, %21, %cst_85 {dimension_numbers = #tpu.dot_dimension_numbers<[1], [0], [0], [1], [0, 0, 1, 1], [], []>} : vector<128x4xf32>, vector<4x32xf32>, vector<128x32xf32> -> vector<128x32xf32>
    %201 = vector.shape_cast %200 : vector<128x32xf32> to vector<2x8x8x32xf32>
    %202 = vector.shape_cast %162 : vector<2x8x32xf32> to vector<2x1x8x32xf32>
    %203 = vector.broadcast %16 : vector<2x8x8x1xf32> to vector<2x8x8x32xf32>
    %204 = vector.broadcast %202 : vector<2x1x8x32xf32> to vector<2x8x8x32xf32>
    %205 = arith.mulf %203, %204 : vector<2x8x8x32xf32>
    %206 = vector.shape_cast %164 : vector<2x8x32xf32> to vector<2x1x8x32xf32>
    %207 = vector.broadcast %19 : vector<2x8x8x1xf32> to vector<2x8x8x32xf32>
    %208 = vector.broadcast %206 : vector<2x1x8x32xf32> to vector<2x8x8x32xf32>
    %209 = arith.mulf %207, %208 : vector<2x8x8x32xf32>
    %210 = arith.addf %205, %209 : vector<2x8x8x32xf32>
    %211 = vector.shape_cast %9 : vector<8x8x32xf32> to vector<1x8x8x32xf32>
    %212 = vector.broadcast %211 : vector<1x8x8x32xf32> to vector<2x8x8x32xf32>
    %213 = arith.addf %210, %212 : vector<2x8x8x32xf32>
    %214 = arith.mulf %201, %213 : vector<2x8x8x32xf32>
    %215 = vector.shape_cast %214 : vector<2x8x8x32xf32> to vector<16x8x32xf32>
    %cst_86 = arith.constant dense<0.000000e+00> : vector<16x32xf32>
    %216 = vector.multi_reduction <add>, %215, %cst_86 [1] : vector<16x8x32xf32> to vector<16x32xf32>
    %c1_87 = arith.constant 1 : index
    %c0_88 = arith.constant 0 : index
    %c0_89 = arith.constant 0 : index
    %217 = vector.load %arg10[%c1_87, %c0_88, %c0_89] : memref<2x32x32xf32, #tpu.memory_space<vmem>>, vector<1x32x32xf32>
    %218 = vector.shape_cast %217 : vector<1x32x32xf32> to vector<32x32xf32>
    %cst_90 = arith.constant dense<0.000000e+00> : vector<16x32xf32>
    %219 = tpu.matmul %216, %218, %cst_90 {dimension_numbers = #tpu.dot_dimension_numbers<[1], [0], [0], [1], [0, 0, 1, 1], [], []>} : vector<16x32xf32>, vector<32x32xf32>, vector<16x32xf32> -> vector<16x32xf32>
    %c1_91 = arith.constant 1 : index
    %c0_92 = arith.constant 0 : index
    %c0_93 = arith.constant 0 : index
    %220 = vector.load %arg13[%c1_91, %c0_92, %c0_93] : memref<2x6x64xf32, #tpu.memory_space<vmem>>, vector<1x6x64xf32>
    %221 = vector.shape_cast %220 : vector<1x6x64xf32> to vector<6x64xf32>
    %222 = arith.addf %153, %219 : vector<16x32xf32>
    %223 = vector.extract_strided_slice %221 {offsets = [0, 0], sizes = [1, 32], strides = [1, 1]} : vector<6x64xf32> to vector<1x32xf32>
    %224 = vector.extract_strided_slice %221 {offsets = [1, 0], sizes = [1, 32], strides = [1, 1]} : vector<6x64xf32> to vector<1x32xf32>
    %cst_94 = arith.constant dense<0.000000e+00> : vector<16xf32>
    %225 = vector.multi_reduction <add>, %222, %cst_94 [1] : vector<16x32xf32> to vector<16xf32>
    %226 = vector.shape_cast %225 : vector<16xf32> to vector<16x1xf32>
    %cst_95 = arith.constant 3.200000e+01 : f32
    %227 = vector.broadcast %cst_95 : f32 to vector<16x1xf32>
    %228 = arith.divf %226, %227 : vector<16x1xf32>
    %229 = vector.broadcast %228 : vector<16x1xf32> to vector<16x32xf32>
    %230 = arith.subf %222, %229 : vector<16x32xf32>
    %231 = arith.mulf %230, %230 : vector<16x32xf32>
    %cst_96 = arith.constant dense<0.000000e+00> : vector<16xf32>
    %232 = vector.multi_reduction <add>, %231, %cst_96 [1] : vector<16x32xf32> to vector<16xf32>
    %233 = vector.shape_cast %232 : vector<16xf32> to vector<16x1xf32>
    %cst_97 = arith.constant 3.200000e+01 : f32
    %234 = vector.broadcast %cst_97 : f32 to vector<16x1xf32>
    %235 = arith.divf %233, %234 : vector<16x1xf32>
    %236 = vector.broadcast %228 : vector<16x1xf32> to vector<16x32xf32>
    %237 = arith.subf %222, %236 : vector<16x32xf32>
    %cst_98 = arith.constant 9.99999974E-6 : f32
    %238 = vector.broadcast %cst_98 : f32 to vector<16x1xf32>
    %239 = arith.addf %235, %238 : vector<16x1xf32>
    %240 = math.rsqrt %239 : vector<16x1xf32>
    %241 = vector.broadcast %240 : vector<16x1xf32> to vector<16x32xf32>
    %242 = arith.mulf %237, %241 : vector<16x32xf32>
    %243 = vector.broadcast %223 : vector<1x32xf32> to vector<16x32xf32>
    %244 = arith.mulf %242, %243 : vector<16x32xf32>
    %245 = vector.broadcast %224 : vector<1x32xf32> to vector<16x32xf32>
    %246 = arith.addf %244, %245 : vector<16x32xf32>
    %c1_99 = arith.constant 1 : index
    %c0_100 = arith.constant 0 : index
    %c0_101 = arith.constant 0 : index
    %247 = vector.load %arg11[%c1_99, %c0_100, %c0_101] : memref<2x32x64xf32, #tpu.memory_space<vmem>>, vector<1x32x64xf32>
    %248 = vector.shape_cast %247 : vector<1x32x64xf32> to vector<32x64xf32>
    %cst_102 = arith.constant dense<0.000000e+00> : vector<16x64xf32>
    %249 = tpu.matmul %246, %248, %cst_102 {dimension_numbers = #tpu.dot_dimension_numbers<[1], [0], [0], [1], [0, 0, 1, 1], [], []>} : vector<16x32xf32>, vector<32x64xf32>, vector<16x64xf32> -> vector<16x64xf32>
    %250 = vector.extract_strided_slice %221 {offsets = [2, 0], sizes = [1, 64], strides = [1, 1]} : vector<6x64xf32> to vector<1x64xf32>
    %251 = vector.broadcast %250 : vector<1x64xf32> to vector<16x64xf32>
    %252 = arith.addf %249, %251 : vector<16x64xf32>
    %cst_103 = arith.constant 0.000000e+00 : f32
    %253 = vector.broadcast %cst_103 : f32 to vector<16x64xf32>
    %254 = arith.maximumf %252, %253 : vector<16x64xf32>
    %c1_104 = arith.constant 1 : index
    %c0_105 = arith.constant 0 : index
    %c0_106 = arith.constant 0 : index
    %255 = vector.load %arg12[%c1_104, %c0_105, %c0_106] : memref<2x64x32xf32, #tpu.memory_space<vmem>>, vector<1x64x32xf32>
    %256 = vector.shape_cast %255 : vector<1x64x32xf32> to vector<64x32xf32>
    %cst_107 = arith.constant dense<0.000000e+00> : vector<16x32xf32>
    %257 = tpu.matmul %254, %256, %cst_107 {dimension_numbers = #tpu.dot_dimension_numbers<[1], [0], [0], [1], [0, 0, 1, 1], [], []>} : vector<16x64xf32>, vector<64x32xf32>, vector<16x32xf32> -> vector<16x32xf32>
    %258 = vector.extract_strided_slice %221 {offsets = [3, 0], sizes = [1, 32], strides = [1, 1]} : vector<6x64xf32> to vector<1x32xf32>
    %259 = vector.broadcast %258 : vector<1x32xf32> to vector<16x32xf32>
    %260 = arith.addf %257, %259 : vector<16x32xf32>
    %261 = arith.addf %260, %246 : vector<16x32xf32>
    %262 = vector.extract_strided_slice %221 {offsets = [4, 0], sizes = [1, 32], strides = [1, 1]} : vector<6x64xf32> to vector<1x32xf32>
    %263 = vector.extract_strided_slice %221 {offsets = [5, 0], sizes = [1, 32], strides = [1, 1]} : vector<6x64xf32> to vector<1x32xf32>
    %cst_108 = arith.constant dense<0.000000e+00> : vector<16xf32>
    %264 = vector.multi_reduction <add>, %261, %cst_108 [1] : vector<16x32xf32> to vector<16xf32>
    %265 = vector.shape_cast %264 : vector<16xf32> to vector<16x1xf32>
    %cst_109 = arith.constant 3.200000e+01 : f32
    %266 = vector.broadcast %cst_109 : f32 to vector<16x1xf32>
    %267 = arith.divf %265, %266 : vector<16x1xf32>
    %268 = vector.broadcast %267 : vector<16x1xf32> to vector<16x32xf32>
    %269 = arith.subf %261, %268 : vector<16x32xf32>
    %270 = arith.mulf %269, %269 : vector<16x32xf32>
    %cst_110 = arith.constant dense<0.000000e+00> : vector<16xf32>
    %271 = vector.multi_reduction <add>, %270, %cst_110 [1] : vector<16x32xf32> to vector<16xf32>
    %272 = vector.shape_cast %271 : vector<16xf32> to vector<16x1xf32>
    %cst_111 = arith.constant 3.200000e+01 : f32
    %273 = vector.broadcast %cst_111 : f32 to vector<16x1xf32>
    %274 = arith.divf %272, %273 : vector<16x1xf32>
    %275 = vector.broadcast %267 : vector<16x1xf32> to vector<16x32xf32>
    %276 = arith.subf %261, %275 : vector<16x32xf32>
    %cst_112 = arith.constant 9.99999974E-6 : f32
    %277 = vector.broadcast %cst_112 : f32 to vector<16x1xf32>
    %278 = arith.addf %274, %277 : vector<16x1xf32>
    %279 = math.rsqrt %278 : vector<16x1xf32>
    %280 = vector.broadcast %279 : vector<16x1xf32> to vector<16x32xf32>
    %281 = arith.mulf %276, %280 : vector<16x32xf32>
    %282 = vector.broadcast %262 : vector<1x32xf32> to vector<16x32xf32>
    %283 = arith.mulf %281, %282 : vector<16x32xf32>
    %284 = vector.broadcast %263 : vector<1x32xf32> to vector<16x32xf32>
    %285 = arith.addf %283, %284 : vector<16x32xf32>
    %c0_113 = arith.constant 0 : index
    %c0_114 = arith.constant 0 : index
    %c0_115 = arith.constant 0 : index
    %286 = vector.load %arg14[%c0_113, %c0_114, %c0_115] : memref<2x32x32xf32, #tpu.memory_space<vmem>>, vector<1x32x32xf32>
    %287 = vector.shape_cast %286 : vector<1x32x32xf32> to vector<32x32xf32>
    %cst_116 = arith.constant dense<0.000000e+00> : vector<16x32xf32>
    %288 = tpu.matmul %285, %287, %cst_116 {dimension_numbers = #tpu.dot_dimension_numbers<[1], [0], [0], [1], [0, 0, 1, 1], [], []>} : vector<16x32xf32>, vector<32x32xf32>, vector<16x32xf32> -> vector<16x32xf32>
    %c0_117 = arith.constant 0 : index
    %c0_118 = arith.constant 0 : index
    %289 = vector.load %arg15[%c0_117, %c0_118] : memref<1x32xf32, #tpu.memory_space<vmem>>, vector<1x32xf32>
    %290 = vector.broadcast %289 : vector<1x32xf32> to vector<16x32xf32>
    %291 = arith.addf %288, %290 : vector<16x32xf32>
    %cst_119 = arith.constant 0.000000e+00 : f32
    %292 = vector.broadcast %cst_119 : f32 to vector<16x32xf32>
    %293 = arith.maximumf %291, %292 : vector<16x32xf32>
    %c1_120 = arith.constant 1 : index
    %c0_121 = arith.constant 0 : index
    %c0_122 = arith.constant 0 : index
    %294 = vector.load %arg14[%c1_120, %c0_121, %c0_122] : memref<2x32x32xf32, #tpu.memory_space<vmem>>, vector<1x32x32xf32>
    %295 = vector.shape_cast %294 : vector<1x32x32xf32> to vector<32x32xf32>
    %cst_123 = arith.constant dense<0.000000e+00> : vector<16x32xf32>
    %296 = tpu.matmul %293, %295, %cst_123 {dimension_numbers = #tpu.dot_dimension_numbers<[1], [0], [0], [1], [0, 0, 1, 1], [], []>} : vector<16x32xf32>, vector<32x32xf32>, vector<16x32xf32> -> vector<16x32xf32>
    %297 = vector.shape_cast %296 : vector<16x32xf32> to vector<2x8x32xf32>
    %298 = vector.shape_cast %293 : vector<16x32xf32> to vector<2x8x32xf32>
    "tpu.trace_start"() <{level = 10 : i32, message = "bse,bte->bst"}> : () -> ()
    %cst_124 = arith.constant dense<0.000000e+00> : vector<2x8x8xf32>
    %299 = tpu.matmul %297, %298, %cst_124 {dimension_numbers = #tpu.dot_dimension_numbers<[2], [2], [1], [1], [0, 0, 0, 1, 1, 1], [0], [0]>} : vector<2x8x32xf32>, vector<2x8x32xf32>, vector<2x8x8xf32> -> vector<2x8x8xf32>
    "tpu.trace_stop"() : () -> ()
    %c3 = arith.constant 3 : index
    %c0_125 = arith.constant 0 : index
    %c0_126 = arith.constant 0 : index
    %c0_127 = arith.constant 0 : index
    %300 = vector.load %arg5[%c3, %c0_125, %c0_126, %c0_127] : memref<4x2x8x8xf32, #tpu.memory_space<vmem>>, vector<1x2x8x8xf32>
    %301 = vector.shape_cast %300 : vector<1x2x8x8xf32> to vector<2x8x8xf32>
    %302 = arith.mulf %299, %301 : vector<2x8x8xf32>
    %c0_128 = arith.constant 0 : index
    %c0_129 = arith.constant 0 : index
    %c0_130 = arith.constant 0 : index
    %303 = vector.load %arg16[%c0_128, %c0_129, %c0_130] : memref<2x8x8xf32, #tpu.memory_space<vmem>>, vector<2x8x8xf32>
    tpu.vector_store %arg16[%c0_128, %c0_129, %c0_130], %302 {strides = array<i32>} : memref<2x8x8xf32, #tpu.memory_space<vmem>>, vector<2x8x8xf32>,
    return
  }
}

</mosaic_0001>

<bundles_post_ra>
// kernel: csk_transformer_forward.1
= control target key start
LH: loop header
LB: loop body
LE: loop exit
PB: predicated region body
PF: predicated region fallthrough
CT: control target
= control target key end

     0   :  { %s8070_s0 = inlined_call_operand.vmem [shape: f32[16,32], index: 0, kind: input, shape index: {}]   ;;  %s8071_s1 = inlined_call_operand.vmem [shape: f32[16,32], index: 1, kind: input, shape index: {}]   ;;  %s8072_s2 = inlined_call_operand.vmem [shape: f32[32,32], index: 2, kind: input, shape index: {}]   ;;  %s8073_s3 = inlined_call_operand.vmem [shape: f32[128,32], index: 3, kind: input, shape index: {}]   ;;  %s8074_s4 = inlined_call_operand.vmem [shape: f32[2,8,8,32], index: 4, kind: input, shape index: {}]   ;;  %s8075_s5 = inlined_call_operand.vmem [shape: f32[4,2,8,8], index: 5, kind: input, shape index: {}]   ;;  %s8076_s6 = inlined_call_operand.vmem [shape: f32[32,4], index: 6, kind: input, shape index: {}]   ;;  %s8077_s7 = inlined_call_operand.vmem [shape: f32[4,32], index: 7, kind: input, shape index: {}]   ;;  %s8078_s8 = inlined_call_operand.vmem [shape: f32[2,32,128], index: 8, kind: input, shape index: {}]   ;;  %s8079_s9 = inlined_call_operand.vmem [shape: f32[2,32,32], index: 9, kind: input, shape index: {}]   ;;  %s8080_s10 = inlined_call_operand.vmem [shape: f32[2,32,32], index: 10, kind: input, shape index: {}]   ;;  %s8081_s11 = inlined_call_operand.vmem [shape: f32[2,32,64], index: 11, kind: input, shape index: {}]   ;;  %s8082_s12 = inlined_call_operand.vmem [shape: f32[2,64,32], index: 12, kind: input, shape index: {}]   ;;  %s8083_s13 = inlined_call_operand.vmem [shape: f32[2,6,64], index: 13, kind: input, shape index: {}]   ;;  %s8084_s14 = inlined_call_operand.vmem [shape: f32[2,32,32], index: 14, kind: input, shape index: {}]   ;;  %s8085_s15 = inlined_call_operand.vmem [shape: f32[1,32], index: 15, kind: input, shape index: {}]   ;;  %s8086_s16 = inlined_call_operand.hbm [shape: f32[2,8,8], index: 16, kind: output, shape index: {}]  }
   0x1   :  { %8179 = sst [smem:[#allocation68_spill]] %s8070_s0 }
   0x2   :  { %v56_v0 = vld [vmem:[%s8072_s2] sm:$0xff]  ;;  %v57_v1 = vld [vmem:[%s8072_s2 + $0x8] sm:$0xff]  ;;  %v58_v2 = vld [vmem:[%s8072_s2 + $0x10] sm:$0xff]  ;;  %vm62_vm0 = vcmask 261120   ;;  %s8180_s0 = sld [smem:[#allocation68_spill]] }
   0x3   :  { %v5763_v3 = vpack.c.bf16 %v57_v1, %v56_v0  ;;  %v59_v4 = vld [vmem:[%s8072_s2 + $0x18] sm:$0xff]  ;;  %v611_v7 = vld [vmem:[%s8079_s9] sm:$0xff]  ;;  %v612_v8 = vld [vmem:[%s8079_s9 + $0x8] sm:$0xff] }
   0x4   :  { %v5767_v6 = vpack.c.bf16 %v59_v4, %v58_v2  ;;  %v5779_v9 = vpack.c.bf16 %v612_v8, %v611_v7  ;;  %v613_v10 = vld [vmem:[%s8079_s9 + $0x10] sm:$0xff]  ;;  %v614_v11 = vld [vmem:[%s8079_s9 + $0x18] sm:$0xff]  ;;  %v526_v13 = vld [vmem:[%s8078_s8] sm:$0xff] }
   0x5   :  { %5764 = vmatprep.subr.bf16.mxu0 %v5763_v3  ;;  %v5783_v14 = vpack.c.bf16 %v614_v11, %v613_v10  ;;  %v144_v15 = vld [vmem:[%s8073_s3] sm:$0xff]  ;;  %v527_v16 = vld [vmem:[%s8078_s8 + $0x8] sm:$0xff] }
   0x6   :  { %5766 = vmatpush3.bf16.msra.mxu0 %v5763_v3 }
   0x7   :  { %5768 = vmatprep.subr.bf16.mxu0 %v5767_v6 }
   0x8   :  { %v54_v5 = vld [vmem:[%s8180_s0] sm:$0xff]  ;;  %v55_v12 = vld [vmem:[%s8180_s0 + $0x8] sm:$0xff] }
   0x9   :  { %5444 = vmatprep.mubr.msk.f32.mxu0 %vm62_vm0, %v54_v5 }
   0xa   :  { %5770 = vmatpush3.bf16.msra.mxu0 %v5767_v6 }
   0xb   :  { %5780 = vmatprep.subr.bf16.mxu0 %v5779_v9 }
   0xc   :  { %21 = vsyncpa [#allocation3], 0  ;;  %v5771_v17 = vpack.c.bf16 %v527_v16, %v526_v13  ;;  %v145_v18 = vld [vmem:[%s8073_s3 + $0x8] sm:$0xff]  ;;  %v146_v19 = vld [vmem:[%s8073_s3 + $0x10] sm:$0xff]  ;;  %s6093_s22 = smov 32   ;;  %s6096_s29 = smov 64  }
   0xd   :  { %5445 = vmatmul.mubr.msk.f32.vlgmr.msra.gmra.mrb[0].mxu0 %vm62_vm0, %v55_v12  ;;  %v147_v20 = vld [vmem:[%s8073_s3 + $0x18] sm:$0xff]  ;;  %v148_v21 = vld [vmem:[%s8073_s3 + $0x20] sm:$0xff]  ;;  %v149_v22 = vld [vmem:[%s8073_s3 + $0x28] sm:$0xff]  ;;  %vm1822_vm1 = vcmask 1043456   ;;  %vm1469_vm6 = vcmask 31744  }
   0xe   :  { %5782 = vmatpush3.bf16.msra.mxu0 %v5779_v9  ;;  %5466 = vmatprep.mubr.msk.f32.mxu0 %vm62_vm0, %v144_v15  ;;  %v150_v23 = vld [vmem:[%s8073_s3 + $0x30] sm:$0xff]  ;;  %v151_v24 = vld [vmem:[%s8073_s3 + $0x38] sm:$0xff]  ;;  %v152_v25 = vld [vmem:[%s8073_s3 + $0x40] sm:$0xff] }
   0xf   :  { %5784 = vmatprep.subr.bf16.mxu0 %v5783_v14  ;;  %5772 = vmatprep.subr.bf16.mxu1 %v5771_v17  ;;  %v153_v26 = vld [vmem:[%s8073_s3 + $0x48] sm:$0xff]  ;;  %v154_v27 = vld [vmem:[%s8073_s3 + $0x50] sm:$0xff]  ;;  %v155_v28 = vld [vmem:[%s8073_s3 + $0x58] sm:$0xff] }
  0x10   :  { %5774 = vmatpush3.bf16.msra.mxu1 %v5771_v17  ;;  %v156_v29 = vld [vmem:[%s8073_s3 + $0x60] sm:$0xff]  ;;  %v157_v30 = vld [vmem:[%s8073_s3 + $0x68] sm:$0xff]  ;;  %v158_v31 = vld [vmem:[%s8073_s3 + $0x70] sm:$0xff] }
  0x11   :  { %v159_v32 = vld [vmem:[%s8073_s3 + $0x78] sm:$0xff]  ;;  %v528_v33 = vld [vmem:[%s8078_s8 + $0x10] sm:$0xff]  ;;  %v160_v37 = vld [vmem:[%s8074_s4] sm:$0xff] }
  0x12   :  { %5786 = vmatpush3.bf16.msra.mxu0 %v5783_v14  ;;  %v529_v34 = vld [vmem:[%s8078_s8 + $0x18] sm:$0xff]  ;;  %v162_v36 = vld [vmem:[%s8074_s4 + $0x10] sm:$0xff]  ;;  %896 = vrot.lane.b32.xlu1 %v160_v37, %s6093_s22  ;;  %v164_v38 = vld [vmem:[%s8074_s4 + $0x20] sm:$0xff] }
  0x13   :  { %v5775_v35 = vpack.c.bf16 %v529_v34, %v528_v33  ;;  %900 = vrot.lane.b32.xlu0 %v162_v36, %s6093_s22  ;;  %v161_v39 = vld [vmem:[%s8074_s4 + $0x8] sm:$0xff]  ;;  %v166_v40 = vld [vmem:[%s8074_s4 + $0x30] sm:$0xff]  ;;  %v163_v41 = vld [vmem:[%s8074_s4 + $0x18] sm:$0xff] }
  0x14   :  { %v165_v42 = vld [vmem:[%s8074_s4 + $0x28] sm:$0xff]  ;;  %v167_v43 = vld [vmem:[%s8074_s4 + $0x38] sm:$0xff]  ;;  %v60_v44 = vld [vmem:[%s8071_s1] sm:$0xff] }
  0x15   :  { %5467 = vmatmul.mubr.msk.f32.vlgmr.msra.gmra.mrb[2].mxu0 %vm62_vm0, %v145_v18  ;;  %5776 = vmatprep.subr.bf16.mxu1 %v5775_v35  ;;  %v61_v45 = vld [vmem:[%s8071_s1 + $0x8] sm:$0xff]  ;;  %v521_v12 = vld [vmem:[%s8076_s6] sm:$0xff]  ;;  %v523_v14 = vld [vmem:[%s8076_s6 + $0x10] sm:$0xff] }
  0x16   :  { %5469 = vmatprep.mubr.msk.f32.mxu0 %vm62_vm0, %v146_v19  ;;  %5778 = vmatpush3.bf16.msra.mxu1 %v5775_v35  ;;  %v522_v13 = vld [vmem:[%s8076_s6 + $0x8] sm:$0xff]  ;;  %v524_v16 = vld [vmem:[%s8076_s6 + $0x18] sm:$0xff]  ;;  %s6094_s6 = smov 96  }
  0x17   :  { %904 = vrot.lane.b32.xlu0 %v164_v38, %s6093_s22  ;;  %898 = vrot.lane.b32.xlu1 %v161_v39, %s6093_s22  ;;  %v6382_v15 = vpack.c.bf16 %v522_v13, %v521_v12  ;;  %v6387_v18 = vpack.c.bf16 %v524_v16, %v523_v14  ;;  %v177_v13 = vld [vmem:[%s8075_s5] sm:$0xff] }
  0x19   :  { %5470 = vmatmul.mubr.msk.f32.gmra.mrb[4].mxu0 %vm62_vm0, %v147_v20  ;;  %8189 = vst [vmem:[#allocation13_spill] sm:$0xff] %v6382_v15  ;;  %8190 = vst [vmem:[#allocation14_spill] sm:$0xff] %v6387_v18  ;;  %5788 = vmatprep.subr.bf16.mxu1 %v6382_v15 }
  0x1a   :  { %5472 = vmatprep.mubr.msk.f32.mxu0 %vm62_vm0, %v148_v21 }
  0x1b   :  { %908 = vrot.lane.b32.xlu0 %v166_v40, %s6093_s22  ;;  %902 = vrot.lane.b32.xlu1 %v163_v41, %s6093_s22 }
  0x1d   :  { %5473 = vmatmul.mubr.msk.f32.gmra.mrb[6].mxu0 %vm62_vm0, %v149_v22 }
  0x1e   :  { %5475 = vmatprep.mubr.msk.f32.mxu0 %vm62_vm0, %v150_v23 }
  0x1f   :  { %906 = vrot.lane.b32.xlu1 %v165_v42, %s6093_s22 }
  0x21   :  { %5476 = vmatmul.mubr.msk.f32.gmra.mrb[8].mxu0 %vm62_vm0, %v151_v24 }
  0x22   :  { %5478 = vmatprep.mubr.msk.f32.mxu0 %vm62_vm0, %v152_v25 }
  0x23   :  { %910 = vrot.lane.b32.xlu1 %v167_v43, %s6093_s22 }
  0x25   :  { %5479 = vmatmul.mubr.msk.f32.gmra.mrb[10].mxu0 %vm62_vm0, %v153_v26 }
  0x26   :  { %5481 = vmatprep.mubr.msk.f32.mxu0 %vm62_vm0, %v154_v27 }
  0x29   :  { %5482 = vmatmul.mubr.msk.f32.gmra.mrb[12].mxu0 %vm62_vm0, %v155_v28 }
  0x2a   :  { %5484 = vmatprep.mubr.msk.f32.mxu0 %vm62_vm0, %v156_v29 }
  0x2d   :  { %5485 = vmatmul.mubr.msk.f32.gmra.mrb[14].mxu0 %vm62_vm0, %v157_v30 }
  0x2e   :  { %5487 = vmatprep.mubr.msk.f32.mxu0 %vm62_vm0, %v158_v31 }
  0x31   :  { %5488 = vmatmul.mubr.msk.f32.gmra.mrb[16].mxu0 %vm62_vm0, %v159_v32 }
  0x84   :  { %v6357_v2 = vpop.permute.xlu1 %896 }
  0x85   :  { %8181 = vst [vmem:[#allocation5_spill] sm:$0xff] %v6357_v2  ;;  %v6359_v3 = vpop.permute.xlu0 %900 }
  0x86   :  { %8182 = vst [vmem:[#allocation6_spill] sm:$0xff] %v6359_v3 }
  0x89   :  { %v6361_v4 = vpop.permute.xlu1 %898  ;;  %v6363_v5 = vpop.permute.xlu0 %904 }
  0x8a   :  { %8183 = vst [vmem:[#allocation7_spill] sm:$0xff] %v6361_v4  ;;  %8184 = vst [vmem:[#allocation8_spill] sm:$0xff] %v6363_v5 }
  0x8d   :  { %v6365_v6 = vpop.permute.xlu1 %902  ;;  %v6367_v7 = vpop.permute.xlu0 %908 }
  0x8e   :  { %8185 = vst [vmem:[#allocation9_spill] sm:$0xff] %v6365_v6  ;;  %8186 = vst [vmem:[#allocation10_spill] sm:$0xff] %v6367_v7 }
  0x91   :  { %v6369_v8 = vpop.permute.xlu1 %906 }
  0x92   :  { %8187 = vst [vmem:[#allocation11_spill] sm:$0xff] %v6369_v8 }
  0x95   :  { %v6371_v10 = vpop.permute.xlu1 %910 }
  0x96   :  { %8188 = vst [vmem:[#allocation12_spill] sm:$0xff] %v6371_v10 }
  0xe0   :  { %v5446_v46 = vpop.f32.mrb[0].mxu0 }
  0xe1   :  { %v135_v47 = vpop.f32.mrb[1].mxu0  ;;  %v6335_v49 = vadd.f32 %v5446_v46, %v61_v45 }
  0xe2   :  { %v6333_v48 = vadd.f32 %v135_v47, %v60_v44 }
  0xe4   :  { %5455 = vmatprep.mubr.msk.f32.mxu1 %vm62_vm0, %v6333_v48 }
  0xe5   :  { %5456 = vmatmul.mubr.msk.f32.vlgmr.msra.gmra.mrb[0].mxu1 %vm62_vm0, %v6335_v49 }
  0xe6   :  { %5790 = vmatpush3.bf16.msra.mxu1 %v6382_v15 }
  0xe7   :  { %5792 = vmatprep.subr.bf16.mxu1 %v6387_v18 }
  0xe8   :  { %v5468_v50 = vpop.f32.mrb[2].mxu0 }
  0xe9   :  { %826 = vrot.lane.b32.xlu0 %v5468_v50, %s6093_s22  ;;  %v729_v51 = vpop.f32.mrb[3].mxu0 }
  0xea   :  { %5794 = vmatpush3.bf16.msra.mxu1 %v6387_v18 }
  0xec   :  { %v5471_v52 = vpop.f32.mrb[4].mxu0 }
  0xed   :  { %824 = vrot.lane.b32.xlu0 %v729_v51, %s6093_s22  ;;  %v739_v53 = vpop.f32.mrb[5].mxu0  ;;  %830 = vrot.lane.b32.xlu1 %v5471_v52, %s6093_s22 }
  0xf0   :  { %v5474_v54 = vpop.f32.mrb[6].mxu0 }
  0xf1   :  { %828 = vrot.lane.b32.xlu0 %v739_v53, %s6093_s22  ;;  %v749_v55 = vpop.f32.mrb[7].mxu0  ;;  %834 = vrot.lane.b32.xlu1 %v5474_v54, %s6093_s22 }
  0xf4   :  { %v5477_v56 = vpop.f32.mrb[8].mxu0 }
  0xf5   :  { %832 = vrot.lane.b32.xlu0 %v749_v55, %s6093_s22  ;;  %v759_v57 = vpop.f32.mrb[9].mxu0  ;;  %838 = vrot.lane.b32.xlu1 %v5477_v56, %s6093_s22  ;;  %v179_v56 = vlaneseq }
  0xf8   :  { %v5480_v58 = vpop.f32.mrb[10].mxu0 }
  0xf9   :  { %836 = vrot.lane.b32.xlu0 %v759_v57, %s6093_s22  ;;  %v769_v59 = vpop.f32.mrb[11].mxu0  ;;  %842 = vrot.lane.b32.xlu1 %v5480_v58, %s6093_s22 }
  0xfc   :  { %v5483_v60 = vpop.f32.mrb[12].mxu0 }
  0xfd   :  { %840 = vrot.lane.b32.xlu0 %v769_v59, %s6093_s22  ;;  %v779_v61 = vpop.f32.mrb[13].mxu0  ;;  %846 = vrot.lane.b32.xlu1 %v5483_v60, %s6093_s22 }
 0x100   :  { %v5486_v62 = vpop.f32.mrb[14].mxu0 }
 0x101   :  { %844 = vrot.lane.b32.xlu0 %v779_v61, %s6093_s22  ;;  %v789_v63 = vpop.f32.mrb[15].mxu0  ;;  %850 = vrot.lane.b32.xlu1 %v5486_v62, %s6093_s22 }
 0x104   :  { %v5489_v0 = vpop.f32.mrb[16].mxu0 }
 0x105   :  { %848 = vrot.lane.b32.xlu0 %v789_v63, %s6093_s22  ;;  %v799_v1 = vpop.f32.mrb[17].mxu0  ;;  %854 = vrot.lane.b32.xlu1 %v5489_v0, %s6093_s22  ;;  %v6435_v63 = vshrl.u32 %v179_v56, 7 }
 0x107   :  { %v6444_v12 = vsub.s32 1, %v6435_v63 }
 0x109   :  { %852 = vrot.lane.b32.xlu0 %v799_v1, %s6093_s22 }
 0x15b   :  { %v827_v9 = vpop.permute.xlu0 %826 }
 0x15f   :  { %v825_v11 = vpop.permute.xlu0 %824  ;;  %v831_v17 = vpop.permute.xlu1 %830 }
 0x163   :  { %v829_v19 = vpop.permute.xlu0 %828  ;;  %v835_v20 = vpop.permute.xlu1 %834 }
 0x167   :  { %v833_v21 = vpop.permute.xlu0 %832  ;;  %v839_v22 = vpop.permute.xlu1 %838 }
 0x16b   :  { %v837_v24 = vpop.permute.xlu0 %836  ;;  %v843_v32 = vpop.permute.xlu1 %842 }
 0x16f   :  { %v841_v33 = vpop.permute.xlu0 %840  ;;  %v847_v42 = vpop.permute.xlu1 %846 }
 0x173   :  { %v845_v43 = vpop.permute.xlu0 %844  ;;  %v851_v50 = vpop.permute.xlu1 %850 }
 0x177   :  { %v849_v51 = vpop.permute.xlu0 %848  ;;  %v855_v61 = vpop.permute.xlu1 %854 }
 0x17b   :  { %v853_v62 = vpop.permute.xlu0 %852 }
 0x1b8   :  { %v6393_v23 = vpop.f32.mrb[0].mxu1 }
 0x1b9   :  { %v6395_v25 = vpop.f32.mrb[1].mxu1  ;;  %v881_v46 = vadd.f32 %v6393_v23, %v843_v32  ;;  %v880_v47 = vadd.f32 %v6393_v23, %v841_v33  ;;  %v883_v54 = vadd.f32 %v6393_v23, %v847_v42  ;;  %v882_v55 = vadd.f32 %v6393_v23, %v845_v43 }
 0x1ba   :  { %v873_v26 = vadd.f32 %v827_v9, %v6395_v25  ;;  %v872_v27 = vadd.f32 %v825_v11, %v6395_v25  ;;  %v875_v30 = vadd.f32 %v831_v17, %v6395_v25  ;;  %v874_v31 = vadd.f32 %v829_v19, %v6395_v25 }
 0x1bb   :  { %v877_v36 = vadd.f32 %v835_v20, %v6395_v25  ;;  %v876_v37 = vadd.f32 %v833_v21, %v6395_v25  ;;  %v879_v40 = vadd.f32 %v839_v22, %v6395_v25  ;;  %v878_v41 = vadd.f32 %v837_v24, %v6395_v25 }
 0x1bc   :  { %v921_v28 = vadd.f32 %v6361_v4, %v873_v26  ;;  %v920_v29 = vadd.f32 %v6357_v2, %v872_v27  ;;  %v923_v34 = vadd.f32 %v6365_v6, %v875_v30  ;;  %v922_v35 = vadd.f32 %v6359_v3, %v874_v31 }
 0x1bd   :  { %v925_v38 = vadd.f32 %v6369_v8, %v877_v36  ;;  %v924_v39 = vadd.f32 %v6363_v5, %v876_v37  ;;  %v927_v44 = vadd.f32 %v6371_v10, %v879_v40  ;;  %v926_v45 = vadd.f32 %v6367_v7, %v878_v41 }
 0x1be   :  { %1134 = vrot.lane.b32.xlu1 %v921_v28, %s6094_s6  ;;  %1132 = vrot.lane.b32.xlu0 %v920_v29, %s6094_s6  ;;  %v929_v52 = vadd.f32 %v6361_v4, %v881_v46  ;;  %v928_v53 = vadd.f32 %v6357_v2, %v880_v47  ;;  %v931_v57 = vadd.f32 %v6365_v6, %v883_v54  ;;  %v6452_v17 = vsub.s32 0, %v6435_v63  ;;  %v5089_v47 = vld [vmem:[%s8075_s5 + $0x28] sm:$0xff] }
 0x1bf   :  { %v930_v58 = vadd.f32 %v6359_v3, %v882_v55  ;;  %v885_v59 = vadd.f32 %v6393_v23, %v851_v50  ;;  %v884_v60 = vadd.f32 %v6393_v23, %v849_v51  ;;  %v887_v9 = vadd.f32 %v6393_v23, %v855_v61 }
 0x1c0   :  { %v886_v11 = vadd.f32 %v6393_v23, %v853_v62  ;;  %v189_v19 = vrot.slane %v177_v13, %v6444_v12  ;;  %v182_v20 = vrot.slane %v177_v13, %v6452_v17  ;;  %v6459_v21 = vsub.s32 3, %v6435_v63 }
 0x1c1   :  { %v933_v0 = vadd.f32 %v6369_v8, %v885_v59  ;;  %v932_v1 = vadd.f32 %v6363_v5, %v884_v60  ;;  %v935_v14 = vadd.f32 %v6371_v10, %v887_v9  ;;  %v6462_v22 = vsub.s32 2, %v6435_v63 }
 0x1c2   :  { %1138 = vrot.lane.b32.xlu1 %v923_v34, %s6094_s6  ;;  %1136 = vrot.lane.b32.xlu0 %v922_v35, %s6094_s6  ;;  %v934_v16 = vadd.f32 %v6367_v7, %v886_v11  ;;  %v203_v24 = vrot.slane %v177_v13, %v6459_v21  ;;  %v6467_v27 = vsub.s32 5, %v6435_v63  ;;  %v6470_v28 = vsub.s32 4, %v6435_v63  ;;  %v178_v35 = vld [vmem:[%s8075_s5 + $0x8] sm:$0xff]  ;;  %v6518_v11 = vld [vmem:[%s8075_s5 + $0x10] sm:$0xff] }
 0x1c3   :  { %v196_v26 = vrot.slane %v177_v13, %v6462_v22  ;;  %v6475_v31 = vsub.s32 7, %v6435_v63  ;;  %v6478_v32 = vsub.s32 6, %v6435_v63  ;;  %v245_v36 = vrot.slane %v178_v35, %v6444_v12 }
 0x1c4   :  { %8191 = vst [vmem:[#allocation15_spill] sm:$0xff] %v6467_v27  ;;  %8192 = vst [vmem:[#allocation16_spill] sm:$0xff] %v6470_v28  ;;  %v217_v29 = vrot.slane %v177_v13, %v6467_v27  ;;  %v210_v30 = vrot.slane %v177_v13, %v6470_v28  ;;  %v238_v37 = vrot.slane %v178_v35, %v6452_v17 }
 0x1c5   :  { %v231_v33 = vrot.slane %v177_v13, %v6475_v31  ;;  %v224_v34 = vrot.slane %v177_v13, %v6478_v32  ;;  %v273_v40 = vrot.slane %v178_v35, %v6467_v27  ;;  %v266_v41 = vrot.slane %v178_v35, %v6470_v28 }
 0x1c6   :  { %1142 = vrot.lane.b32.xlu1 %v925_v38, %s6094_s6  ;;  %1140 = vrot.lane.b32.xlu0 %v924_v39, %s6094_s6  ;;  %v259_v38 = vrot.slane %v178_v35, %v6459_v21  ;;  %v252_v39 = vrot.slane %v178_v35, %v6462_v22  ;;  %v287_v42 = vrot.slane %v178_v35, %v6475_v31 }
 0x1c7   :  { %v280_v43 = vrot.slane %v178_v35, %v6478_v32  ;;  %v468_v50 = vrot.slane %v5089_v47, %v6452_v17  ;;  %v482_v55 = vrot.slane %v5089_v47, %v6462_v22  ;;  %v496_v59 = vrot.slane %v5089_v47, %v6470_v28 }
 0x1c8   :  { %v503_v61 = vrot.slane %v5089_v47, %v6467_v27  ;;  %v517_v62 = vrot.slane %v5089_v47, %v6475_v31  ;;  %v304_v13 = vrot.slane %v6518_v11, %v6444_v12 }
 0x1ca   :  { %1146 = vrot.lane.b32.xlu1 %v927_v44, %s6094_s6  ;;  %1144 = vrot.lane.b32.xlu0 %v926_v45, %s6094_s6  ;;  %v5088_v44 = vld [vmem:[%s8075_s5 + $0x20] sm:$0xff] }
 0x1cb   :  { %v419_v45 = vrot.slane %v5088_v44, %v6444_v12  ;;  %v412_v46 = vrot.slane %v5088_v44, %v6452_v17  ;;  %v426_v51 = vrot.slane %v5088_v44, %v6462_v22  ;;  %v440_v54 = vrot.slane %v5088_v44, %v6470_v28 }
 0x1cc   :  { %v447_v56 = vrot.slane %v5088_v44, %v6467_v27  ;;  %v461_v60 = vrot.slane %v5088_v44, %v6475_v31 }
 0x1ce   :  { %1150 = vrot.lane.b32.xlu1 %v929_v52, %s6094_s6  ;;  %1148 = vrot.lane.b32.xlu0 %v928_v53, %s6094_s6  ;;  %v433_v52 = vrot.slane %v5088_v44, %v6459_v21  ;;  %v475_v53 = vrot.slane %v5089_v47, %v6444_v12 }
 0x1d2   :  { %1154 = vrot.lane.b32.xlu1 %v931_v57, %s6094_s6  ;;  %1152 = vrot.lane.b32.xlu0 %v930_v58, %s6094_s6  ;;  %v489_v57 = vrot.slane %v5089_v47, %v6459_v21  ;;  %v454_v58 = vrot.slane %v5088_v44, %v6478_v32 }
 0x1d6   :  { %1158 = vrot.lane.b32.xlu1 %v933_v0, %s6094_s6  ;;  %1156 = vrot.lane.b32.xlu0 %v932_v1, %s6094_s6  ;;  %v510_v0 = vrot.slane %v5089_v47, %v6478_v32  ;;  %v6095_v1 = vmov 1966171168  }
 0x1d7   :  { %v940_v9 = vunpack.c.l.s4 %v6095_v1 }
 0x1da   :  { %1162 = vrot.lane.b32.xlu1 %v935_v14, %s6094_s6  ;;  %1160 = vrot.lane.b32.xlu0 %v934_v16, %s6094_s6  ;;  %v297_v14 = vrot.slane %v6518_v11, %v6452_v17  ;;  %v941_v16 = vunpack.c.0.s8 %v940_v9 }
 0x1de   :  { %191 = vbcast.lane.b32.xlu1 %v189_v19, 256  ;;  %184 = vbcast.lane.b32.xlu0 %v182_v20, 256  ;;  %v6527_v19 = vld [vmem:[%s8075_s5 + $0x18] sm:$0xff] }
 0x1df   :  { %v353_v20 = vrot.slane %v6527_v19, %v6452_v17 }
 0x1e2   :  { %205 = vbcast.lane.b32.xlu1 %v203_v24, 256  ;;  %198 = vbcast.lane.b32.xlu0 %v196_v26, 256  ;;  %v311_v24 = vrot.slane %v6518_v11, %v6462_v22  ;;  %v6534_v26 = vsub.s32 %v941_v16, %v6435_v63  ;;  %v938_v63 = vcombine.high %v6395_v25, %v6395_v25 }
 0x1e4   :  { %8193 = vst [vmem:[#allocation17_spill] sm:$0xff] %v6534_v26 }
 0x1e6   :  { %219 = vbcast.lane.b32.xlu1 %v217_v29, 256  ;;  %212 = vbcast.lane.b32.xlu0 %v210_v30, 256  ;;  %v318_v29 = vrot.slane %v6518_v11, %v6459_v21  ;;  %v360_v30 = vrot.slane %v6527_v19, %v6444_v12 }
 0x1ea   :  { %233 = vbcast.lane.b32.xlu1 %v231_v33, 256  ;;  %226 = vbcast.lane.b32.xlu0 %v224_v34, 256  ;;  %v945_v33 = vrot.slane %v6395_v25, %v6534_v26  ;;  %v367_v34 = vrot.slane %v6527_v19, %v6462_v22 }
 0x1ec   :  { %v953_v35 = vcombine.high %v945_v33, %v945_v33 }
 0x1ee   :  { %247 = vbcast.lane.b32.xlu1 %v245_v36, 256  ;;  %240 = vbcast.lane.b32.xlu0 %v238_v37, 256  ;;  %v961_v36 = vrot.slane %v945_v33, %v6534_v26  ;;  %v975_v37 = vrot.slane %v953_v35, %v6534_v26 }
 0x1f2   :  { %261 = vbcast.lane.b32.xlu1 %v259_v38, 256  ;;  %254 = vbcast.lane.b32.xlu0 %v252_v39, 256  ;;  %v952_v38 = vrot.slane %v938_v63, %v6534_v26  ;;  %v1039_v39 = vrot.slane %v961_v36, %v6452_v17 }
 0x1f6   :  { %275 = vbcast.lane.b32.xlu1 %v273_v40, 256  ;;  %268 = vbcast.lane.b32.xlu0 %v266_v41, 256  ;;  %v1043_v40 = vrot.slane %v975_v37, %v6452_v17  ;;  %v985_v41 = vcombine.high %v975_v37, %v975_v37 }
 0x1fa   :  { %289 = vbcast.lane.b32.xlu1 %v287_v42, 256  ;;  %282 = vbcast.lane.b32.xlu0 %v280_v43, 256  ;;  %v983_v42 = vcombine.high %v961_v36, %v961_v36  ;;  %v954_v43 = vcombine.high %v952_v38, %v952_v38 }
 0x1fe   :  { %421 = vbcast.lane.b32.xlu1 %v419_v45, 256  ;;  %414 = vbcast.lane.b32.xlu0 %v412_v46, 256 }
 0x202   :  { %470 = vbcast.lane.b32.xlu1 %v468_v50, 256  ;;  %428 = vbcast.lane.b32.xlu0 %v426_v51, 256  ;;  %v994_v50 = vrot.slane %v6393_v23, %v6534_v26  ;;  %v1051_v51 = vrot.slane %v985_v41, %v6452_v17 }
 0x206   :  { %435 = vbcast.lane.b32.xlu1 %v433_v52, 256  ;;  %477 = vbcast.lane.b32.xlu0 %v475_v53, 256  ;;  %v1047_v52 = vrot.slane %v983_v42, %v6452_v17  ;;  %v982_v53 = vrot.slane %v954_v43, %v6534_v26 }
 0x20a   :  { %442 = vbcast.lane.b32.xlu1 %v440_v54, 256  ;;  %484 = vbcast.lane.b32.xlu0 %v482_v55, 256  ;;  %v968_v54 = vrot.slane %v952_v38, %v6534_v26 }
 0x20c   :  { %v984_v1 = vcombine.high %v968_v54, %v968_v54 }
 0x20e   :  { %449 = vbcast.lane.b32.xlu1 %v447_v56, 256  ;;  %491 = vbcast.lane.b32.xlu0 %v489_v57, 256 }
 0x212   :  { %456 = vbcast.lane.b32.xlu1 %v454_v58, 256  ;;  %498 = vbcast.lane.b32.xlu0 %v496_v59, 256  ;;  %v1002_v59 = vcombine.high %v994_v50, %v994_v50 }
 0x216   :  { %463 = vbcast.lane.b32.xlu1 %v461_v60, 256  ;;  %505 = vbcast.lane.b32.xlu0 %v503_v61, 256  ;;  %v987_v60 = vcombine.high %v6393_v23, %v6393_v23  ;;  %v1059_v61 = vrot.slane %v982_v53, %v6452_v17 }
 0x218   :  { %v1001_v33 = vrot.slane %v987_v60, %v6534_v26 }
 0x21a   :  { %519 = vbcast.lane.b32.xlu1 %v517_v62, 256  ;;  %512 = vbcast.lane.b32.xlu0 %v510_v0, 256  ;;  %v1055_v62 = vrot.slane %v968_v54, %v6452_v17  ;;  %v986_v0 = vcombine.high %v982_v53, %v982_v53  ;;  %v1003_v41 = vcombine.high %v1001_v33, %v1001_v33 }
 0x21e   :  { %306 = vbcast.lane.b32.xlu1 %v304_v13, 256  ;;  %299 = vbcast.lane.b32.xlu0 %v297_v14, 256 }
 0x222   :  { %355 = vbcast.lane.b32.xlu1 %v353_v20, 256  ;;  %313 = vbcast.lane.b32.xlu0 %v311_v24, 256  ;;  %v1010_v20 = vrot.slane %v994_v50, %v6534_v26  ;;  %v1067_v24 = vrot.slane %v986_v0, %v6452_v17  ;;  %v1031_v50 = vrot.slane %v1003_v41, %v6534_v26 }
 0x224   :  { %v1071_v37 = vrot.slane %v1010_v20, %v6452_v17 }
 0x226   :  { %320 = vbcast.lane.b32.xlu1 %v318_v29, 256  ;;  %362 = vbcast.lane.b32.xlu0 %v360_v30, 256  ;;  %v1063_v29 = vrot.slane %v984_v1, %v6452_v17  ;;  %v1024_v30 = vrot.slane %v1002_v59, %v6534_v26 }
 0x228   :  { %v1075_v38 = vrot.slane %v1024_v30, %v6452_v17 }
 0x22a   :  { %369 = vbcast.lane.b32.xlu0 %v367_v34, 256 }
 0x230   :  { %v1135_v44 = vpop.permute.xlu1 %1134  ;;  %v1133_v45 = vpop.permute.xlu0 %1132 }
 0x231   :  { %v1181_v46 = vmul.f32 %v1135_v44, %v1043_v40  ;;  %v1180_v47 = vmul.f32 %v1133_v45, %v1039_v39  ;;  %v1034_v39 = vcombine.high %v1024_v30, %v1024_v30  ;;  %v1032_v40 = vcombine.high %v1010_v20, %v1010_v20 }
 0x233   :  { %5498 = vmatprep.mubr.msk.f32.mxu1 %vm62_vm0, %v1180_v47  ;;  %v1079_v47 = vrot.slane %v1032_v40, %v6452_v17 }
 0x234   :  { %v1139_v55 = vpop.permute.xlu1 %1138  ;;  %5499 = vmatmul.mubr.msk.f32.vlgmr.msra.gmra.mrb[2].mxu1 %vm62_vm0, %v1181_v46  ;;  %v1137_v56 = vpop.permute.xlu0 %1136  ;;  %v1083_v46 = vrot.slane %v1034_v39, %v6452_v17 }
 0x235   :  { %v1183_v57 = vmul.f32 %v1139_v55, %v1051_v51  ;;  %v1182_v58 = vmul.f32 %v1137_v56, %v1047_v52  ;;  %v1017_v51 = vrot.slane %v1001_v33, %v6534_v26  ;;  %v1091_v56 = vrot.slane %v1031_v50, %v6452_v17 }
 0x237   :  { %5501 = vmatprep.mubr.msk.f32.mxu1 %vm62_vm0, %v1182_v58  ;;  %v1035_v58 = vcombine.high %v1031_v50, %v1031_v50  ;;  %v1033_v59 = vcombine.high %v1017_v51, %v1017_v51 }
 0x238   :  { %v1143_v9 = vpop.permute.xlu1 %1142  ;;  %5502 = vmatmul.mubr.msk.f32.gmra.mrb[4].mxu1 %vm62_vm0, %v1183_v57  ;;  %v1141_v13 = vpop.permute.xlu0 %1140  ;;  %v1087_v57 = vrot.slane %v1017_v51, %v6452_v17  ;;  %v374_v51 = vrot.slane %v6527_v19, %v6459_v21 }
 0x239   :  { %v1185_v14 = vmul.f32 %v1143_v9, %v1059_v61  ;;  %v1184_v16 = vmul.f32 %v1141_v13, %v1055_v62  ;;  %v1099_v1 = vrot.slane %v1035_v58, %v6452_v17  ;;  %v1095_v9 = vrot.slane %v1033_v59, %v6452_v17 }
 0x23a   :  { %v332_v58 = vrot.slane %v6518_v11, %v6467_v27 }
 0x23b   :  { %5504 = vmatprep.mubr.msk.f32.mxu1 %vm62_vm0, %v1184_v16 }
 0x23c   :  { %v1147_v34 = vpop.permute.xlu1 %1146  ;;  %5505 = vmatmul.mubr.msk.f32.gmra.mrb[6].mxu1 %vm62_vm0, %v1185_v14  ;;  %v1145_v35 = vpop.permute.xlu0 %1144 }
 0x23d   :  { %v1187_v63 = vmul.f32 %v1147_v34, %v1067_v24  ;;  %v1186_v36 = vmul.f32 %v1145_v35, %v1063_v29 }
 0x23f   :  { %5507 = vmatprep.mubr.msk.f32.mxu1 %vm62_vm0, %v1186_v36 }
 0x240   :  { %v1151_v42 = vpop.permute.xlu1 %1150  ;;  %5508 = vmatmul.mubr.msk.f32.gmra.mrb[8].mxu1 %vm62_vm0, %v1187_v63  ;;  %v1149_v43 = vpop.permute.xlu0 %1148 }
 0x241   :  { %v1189_v44 = vmul.f32 %v1151_v42, %v1075_v38  ;;  %v1188_v45 = vmul.f32 %v1149_v43, %v1071_v37 }
 0x243   :  { %5510 = vmatprep.mubr.msk.f32.mxu1 %vm62_vm0, %v1188_v45 }
 0x244   :  { %v1155_v52 = vpop.permute.xlu1 %1154  ;;  %5511 = vmatmul.mubr.msk.f32.gmra.mrb[10].mxu1 %vm62_vm0, %v1189_v44  ;;  %v1153_v53 = vpop.permute.xlu0 %1152 }
 0x245   :  { %v1191_v54 = vmul.f32 %v1155_v52, %v1083_v46  ;;  %v1190_v55 = vmul.f32 %v1153_v53, %v1079_v47  ;;  %v325_v52 = vrot.slane %v6518_v11, %v6470_v28 }
 0x247   :  { %5513 = vmatprep.mubr.msk.f32.mxu1 %vm62_vm0, %v1190_v55 }
 0x248   :  { %v1159_v60 = vpop.permute.xlu1 %1158  ;;  %5514 = vmatmul.mubr.msk.f32.gmra.mrb[12].mxu1 %vm62_vm0, %v1191_v54  ;;  %v1157_v61 = vpop.permute.xlu0 %1156 }
 0x249   :  { %v1193_v62 = vmul.f32 %v1159_v60, %v1091_v56  ;;  %v1192_v0 = vmul.f32 %v1157_v61, %v1087_v57  ;;  %v381_v61 = vrot.slane %v6527_v19, %v6470_v28 }
 0x24b   :  { %5516 = vmatprep.mubr.msk.f32.mxu1 %vm62_vm0, %v1192_v0 }
 0x24c   :  { %v1163_v13 = vpop.permute.xlu1 %1162  ;;  %5517 = vmatmul.mubr.msk.f32.gmra.mrb[14].mxu1 %vm62_vm0, %v1193_v62  ;;  %v1161_v14 = vpop.permute.xlu0 %1160 }
 0x24d   :  { %v1195_v16 = vmul.f32 %v1163_v13, %v1099_v1  ;;  %v1194_v20 = vmul.f32 %v1161_v14, %v1095_v9  ;;  %v5078_v1 = vld [vmem:[%s8074_s4 + $0x40] sm:$0xff]  ;;  %v339_v13 = vrot.slane %v6518_v11, %v6478_v32  ;;  %v5079_v14 = vld [vmem:[%s8074_s4 + $0x48] sm:$0xff] }
 0x24f   :  { %5519 = vmatprep.mubr.msk.f32.mxu1 %vm62_vm0, %v1194_v20  ;;  %v388_v20 = vrot.slane %v6527_v19, %v6467_v27 }
 0x250   :  { %v6591_v24 = vpop.permute.xlu1 %191  ;;  %5520 = vmatmul.mubr.msk.f32.gmra.mrb[16].mxu1 %vm62_vm0, %v1195_v16  ;;  %v6594_v29 = vpop.permute.xlu0 %184 }
 0x251   :  { %8194 = vst [vmem:[#allocation18_spill] sm:$0xff] %v6591_v24  ;;  %8195 = vst [vmem:[#allocation19_spill] sm:$0xff] %v6594_v29  ;;  %vm1406_vm2 = vcmp.gt.f32.partialorder %v6591_v24, 0.0  ;;  %vm1405_vm3 = vcmp.gt.f32.partialorder %v6594_v29, 0.0 }
 0x254   :  { %v6596_v30 = vpop.permute.xlu1 %205  ;;  %v6598_v33 = vpop.permute.xlu0 %198 }
 0x255   :  { %8196 = vst [vmem:[#allocation20_spill] sm:$0xff] %v6596_v30  ;;  %8197 = vst [vmem:[#allocation21_spill] sm:$0xff] %v6598_v33  ;;  %vm1408_vm4 = vcmp.gt.f32.partialorder %v6596_v30, 0.0  ;;  %vm1407_vm5 = vcmp.gt.f32.partialorder %v6598_v33, 0.0 }
 0x258   :  { %v6600_v34 = vpop.permute.xlu1 %219  ;;  %v6602_v35 = vpop.permute.xlu0 %212 }
 0x259   :  { %8198 = vst [vmem:[#allocation22_spill] sm:$0xff] %v6600_v34  ;;  %8199 = vst [vmem:[#allocation23_spill] sm:$0xff] %v6602_v35  ;;  %vm1410_vm7 = vcmp.gt.f32.partialorder %v6600_v34, 0.0  ;;  %vm1409_vm8 = vcmp.gt.f32.partialorder %v6602_v35, 0.0 }
 0x25c   :  { %v6604_v63 = vpop.permute.xlu1 %233  ;;  %v6606_v36 = vpop.permute.xlu0 %226 }
 0x25d   :  { %8200 = vst [vmem:[#allocation24_spill] sm:$0xff] %v6604_v63  ;;  %8201 = vst [vmem:[#allocation25_spill] sm:$0xff] %v6606_v36  ;;  %vm8177_vm9 = vcmp.gt.f32.partialorder %v6604_v63, 0.0  ;;  %vm8176_vm10 = vcmp.gt.f32.partialorder %v6606_v36, 0.0 }
 0x260   :  { %v6608_v37 = vpop.permute.xlu1 %247  ;;  %v6610_v38 = vpop.permute.xlu0 %240 }
 0x261   :  { %8202 = vst [vmem:[#allocation26_spill] sm:$0xff] %v6608_v37  ;;  %8203 = vst [vmem:[#allocation27_spill] sm:$0xff] %v6610_v38  ;;  %vm8175_vm11 = vcmp.gt.f32.partialorder %v6608_v37, 0.0  ;;  %vm8166_vm12 = vcmp.gt.f32.partialorder %v6610_v38, 0.0 }
 0x264   :  { %v6612_v39 = vpop.permute.xlu1 %261  ;;  %v6614_v40 = vpop.permute.xlu0 %254 }
 0x265   :  { %8204 = vst [vmem:[#allocation28_spill] sm:$0xff] %v6612_v39  ;;  %vm8164_vm13 = vcmp.gt.f32.partialorder %v6612_v39, 0.0  ;;  %vm8165_vm14 = vcmp.gt.f32.partialorder %v6614_v40, 0.0 }
 0x268   :  { %v6616_v41 = vpop.permute.xlu1 %275  ;;  %v6618_v42 = vpop.permute.xlu0 %268 }
 0x269   :  { %8205 = vst [vmem:[#allocation29_spill] sm:$0xff] %v6616_v41  ;;  %8206 = vst [vmem:[#allocation30_spill] sm:$0xff] %v6618_v42  ;;  %vm8174_vm15 = vcmp.gt.f32.partialorder %v6616_v41, 0.0 }
 0x26c   :  { %v6620_v43 = vpop.permute.xlu1 %289  ;;  %v6622_v44 = vpop.permute.xlu0 %282 }
 0x26d   :  { %8207 = vst [vmem:[#allocation31_spill] sm:$0xff] %v6620_v43  ;;  %8208 = vst [vmem:[#allocation32_spill] sm:$0xff] %v6622_v44 }
 0x270   :  { %v6624_v45 = vpop.permute.xlu1 %421  ;;  %v6626_v46 = vpop.permute.xlu0 %414 }
 0x271   :  { %8209 = vst [vmem:[#allocation33_spill] sm:$0xff] %v6624_v45  ;;  %8210 = vst [vmem:[#allocation34_spill] sm:$0xff] %v6626_v46  ;;  %v1988_v47 = vmul.f32 %v6395_v25, %v6624_v45  ;;  %v1987_v50 = vmul.f32 %v6395_v25, %v6626_v46 }
 0x273   :  { %2021 = vrot.lane.b32.xlu0 %v1988_v47, %s6094_s6  ;;  %2019 = vrot.lane.b32.xlu1 %v1987_v50, %s6094_s6 }
 0x274   :  { %v6638_v53 = vpop.permute.xlu0 %428  ;;  %v6640_v54 = vpop.permute.xlu1 %470 }
 0x275   :  { %8211 = vst [vmem:[#allocation35_spill] sm:$0xff] %v6638_v53  ;;  %8212 = vst [vmem:[#allocation36_spill] sm:$0xff] %v6640_v54  ;;  %v1995_v55 = vmul.f32 %v6393_v23, %v6640_v54  ;;  %v1989_v56 = vmul.f32 %v6395_v25, %v6638_v53 }
 0x277   :  { %376 = vbcast.lane.b32.xlu0 %v374_v51, 256  ;;  %327 = vbcast.lane.b32.xlu1 %v325_v52, 256  ;;  %v5080_v51 = vld [vmem:[%s8074_s4 + $0x50] sm:$0xff] }
 0x278   :  { %v6646_v57 = vpop.permute.xlu0 %477  ;;  %v6654_v60 = vpop.permute.xlu1 %435 }
 0x279   :  { %8213 = vst [vmem:[#allocation37_spill] sm:$0xff] %v6646_v57  ;;  %v1996_v59 = vmul.f32 %v6393_v23, %v6646_v57  ;;  %8214 = vst [vmem:[#allocation38_spill] sm:$0xff] %v6654_v60  ;;  %v1990_v62 = vmul.f32 %v6395_v25, %v6654_v60 }
 0x27b   :  { %2035 = vrot.lane.b32.xlu0 %v1995_v55, %s6094_s6  ;;  %2023 = vrot.lane.b32.xlu1 %v1989_v56, %s6094_s6  ;;  %v395_v55 = vrot.slane %v6527_v19, %v6478_v32  ;;  %v346_v56 = vrot.slane %v6518_v11, %v6475_v31  ;;  %v402_v32 = vrot.slane %v6527_v19, %v6475_v31  ;;  %v5082_v31 = vld [vmem:[%s8074_s4 + $0x60] sm:$0xff] }
 0x27c   :  { %v6661_v0 = vpop.permute.xlu0 %484  ;;  %v6676_v16 = vpop.permute.xlu1 %442 }
 0x27d   :  { %8215 = vst [vmem:[#allocation39_spill] sm:$0xff] %v6661_v0  ;;  %v1997_v9 = vmul.f32 %v6393_v23, %v6661_v0  ;;  %8216 = vst [vmem:[#allocation40_spill] sm:$0xff] %v6676_v16  ;;  %v1991_v47 = vmul.f32 %v6395_v25, %v6676_v16 }
 0x27f   :  { %334 = vbcast.lane.b32.xlu0 %v332_v58, 256  ;;  %2037 = vrot.lane.b32.xlu1 %v1996_v59, %s6094_s6 }
 0x280   :  { %v6683_v50 = vpop.permute.xlu0 %491  ;;  %v6697_v58 = vpop.permute.xlu1 %449 }
 0x281   :  { %8217 = vst [vmem:[#allocation41_spill] sm:$0xff] %v6683_v50  ;;  %v1998_v52 = vmul.f32 %v6393_v23, %v6683_v50  ;;  %8218 = vst [vmem:[#allocation42_spill] sm:$0xff] %v6697_v58 }
 0x283   :  { %2025 = vrot.lane.b32.xlu0 %v1990_v62, %s6094_s6  ;;  %383 = vbcast.lane.b32.xlu1 %v381_v61, 256  ;;  %v1992_v61 = vmul.f32 %v6395_v25, %v6697_v58 }
 0x284   :  { %v6699_v59 = vpop.permute.xlu0 %498  ;;  %v6709_v11 = vpop.permute.xlu1 %456 }
 0x285   :  { %8219 = vst [vmem:[#allocation43_spill] sm:$0xff] %v6699_v59  ;;  %v1999_v62 = vmul.f32 %v6393_v23, %v6699_v59  ;;  %8220 = vst [vmem:[#allocation44_spill] sm:$0xff] %v6709_v11 }
 0x287   :  { %2091 = vrot.lane.b32.xlu0 %v5078_v1, %s6096_s29  ;;  %2039 = vrot.lane.b32.xlu1 %v1997_v9, %s6094_s6  ;;  %v5081_v1 = vld [vmem:[%s8074_s4 + $0x58] sm:$0xff] }
 0x288   :  { %v6714_v9 = vpop.permute.xlu0 %505 }
 0x289   :  { %8221 = vst [vmem:[#allocation45_spill] sm:$0xff] %v6714_v9 }
 0x28b   :  { %341 = vbcast.lane.b32.xlu0 %v339_v13, 256  ;;  %2093 = vrot.lane.b32.xlu1 %v5079_v14, %s6096_s29  ;;  %v1993_v13 = vmul.f32 %v6395_v25, %v6709_v11  ;;  %v2000_v14 = vmul.f32 %v6393_v23, %v6714_v9 }
 0x28f   :  { %2027 = vrot.lane.b32.xlu0 %v1991_v47, %s6094_s6  ;;  %390 = vbcast.lane.b32.xlu1 %v388_v20, 256  ;;  %v6721_v20 = vpop.permute.xlu1 %463  ;;  %v6730_v47 = vpop.permute.xlu0 %512 }
 0x290   :  { %8222 = vst [vmem:[#allocation46_spill] sm:$0xff] %v6721_v20  ;;  %v1994_v19 = vmul.f32 %v6395_v25, %v6721_v20  ;;  %8223 = vst [vmem:[#allocation47_spill] sm:$0xff] %v6730_v47 }
 0x293   :  { %2095 = vrot.lane.b32.xlu0 %v5080_v51, %s6096_s29  ;;  %2041 = vrot.lane.b32.xlu1 %v1998_v52, %s6094_s6  ;;  %v5083_v51 = vld [vmem:[%s8074_s4 + $0x68] sm:$0xff]  ;;  %v2001_v52 = vmul.f32 %v6393_v23, %v6730_v47 }
 0x297   :  { %397 = vbcast.lane.b32.xlu0 %v395_v55, 256  ;;  %348 = vbcast.lane.b32.xlu1 %v346_v56, 256  ;;  %v6739_v55 = vpop.permute.xlu1 %519  ;;  %v5084_v56 = vld [vmem:[%s8074_s4 + $0x70] sm:$0xff] }
 0x298   :  { %8224 = vst [vmem:[#allocation48_spill] sm:$0xff] %v6739_v55 }
 0x29b   :  { %2029 = vrot.lane.b32.xlu1 %v1992_v61, %s6094_s6  ;;  %2043 = vrot.lane.b32.xlu0 %v1999_v62, %s6094_s6  ;;  %v2002_v61 = vmul.f32 %v6393_v23, %v6739_v55  ;;  %v5085_v62 = vld [vmem:[%s8074_s4 + $0x78] sm:$0xff] }
 0x29f   :  { %2097 = vrot.lane.b32.xlu1 %v5081_v1, %s6096_s29  ;;  %404 = vbcast.lane.b32.xlu0 %v402_v32, 256  ;;  %v6754_v32 = vpop.permute.xlu0 %299  ;;  %v6756_v1 = vpop.permute.xlu1 %306 }
 0x2a0   :  { %8225 = vst [vmem:[#allocation49_spill] sm:$0xff] %v6754_v32  ;;  %8226 = vst [vmem:[#allocation50_spill] sm:$0xff] %v6756_v1 }
 0x2a3   :  { %2031 = vrot.lane.b32.xlu1 %v1993_v13, %s6094_s6  ;;  %2045 = vrot.lane.b32.xlu0 %v2000_v14, %s6094_s6  ;;  %v6758_v13 = vpop.permute.xlu0 %313  ;;  %v6760_v14 = vpop.permute.xlu1 %355 }
 0x2a4   :  { %8227 = vst [vmem:[#allocation51_spill] sm:$0xff] %v6758_v13  ;;  %8228 = vst [vmem:[#allocation52_spill] sm:$0xff] %v6760_v14  ;;  %v1979_v58 = vmul.f32 %v6393_v23, %v6760_v14 }
 0x2a7   :  { %2099 = vrot.lane.b32.xlu1 %v5082_v31, %s6096_s29  ;;  %2033 = vrot.lane.b32.xlu0 %v1994_v19, %s6094_s6  ;;  %v6762_v31 = vpop.permute.xlu0 %362  ;;  %v6764_v19 = vpop.permute.xlu1 %320 }
 0x2a8   :  { %8229 = vst [vmem:[#allocation53_spill] sm:$0xff] %v6762_v31  ;;  %8230 = vst [vmem:[#allocation54_spill] sm:$0xff] %v6764_v19  ;;  %v1980_v60 = vmul.f32 %v6393_v23, %v6762_v31 }
 0x2ab   :  { %2101 = vrot.lane.b32.xlu0 %v5083_v51, %s6096_s29  ;;  %2047 = vrot.lane.b32.xlu1 %v2001_v52, %s6094_s6  ;;  %v6766_v51 = vpop.permute.xlu0 %369  ;;  %v525_v52 = vld [vmem:[%s8077_s7] sm:$0xf] }
 0x2ac   :  { %8231 = vst [vmem:[#allocation55_spill] sm:$0xff] %v6766_v51  ;;  %5522 = vmatprep.subr.msk.mxu0 %vm1822_vm1, %v525_v52 }
 0x2ad   :  { %5523 = vmatpush3.msk.msra.mxu0 %vm1822_vm1, %v525_v52  ;;  %v1972_v52 = vmul.f32 %v6395_v25, %v6756_v1 }
 0x2af   :  { %2103 = vrot.lane.b32.xlu0 %v5084_v56, %s6096_s29  ;;  %2049 = vrot.lane.b32.xlu1 %v2002_v61, %s6094_s6 }
 0x2b3   :  { %2105 = vrot.lane.b32.xlu1 %v5085_v62, %s6096_s29 }
 0x2e5   :  { %v2020_v56 = vpop.permute.xlu1 %2019  ;;  %v2022_v61 = vpop.permute.xlu0 %2021 }
 0x2e6   :  { %v2068_v54 = vadd.f32 %v2022_v61, %v1972_v52 }
 0x2e9   :  { %v6773_v62 = vpop.permute.xlu1 %327  ;;  %v6775_v26 = vpop.permute.xlu0 %376 }
 0x2ea   :  { %8232 = vst [vmem:[#allocation56_spill] sm:$0xff] %v6773_v62  ;;  %8233 = vst [vmem:[#allocation57_spill] sm:$0xff] %v6775_v26 }
 0x2ed   :  { %v2024_v55 = vpop.permute.xlu1 %2023  ;;  %v2036_v47 = vpop.permute.xlu0 %2035 }
 0x2ee   :  { %v2075_v50 = vadd.f32 %v2036_v47, %v1979_v58 }
 0x2f1   :  { %v2038_v20 = vpop.permute.xlu1 %2037  ;;  %v6777_v9 = vpop.permute.xlu0 %334 }
 0x2f2   :  { %8234 = vst [vmem:[#allocation58_spill] sm:$0xff] %v6777_v9  ;;  %v2076_v53 = vadd.f32 %v2038_v20, %v1980_v60  ;;  %v1981_v60 = vmul.f32 %v6393_v23, %v6766_v51 }
 0x2f5   :  { %v6779_v11 = vpop.permute.xlu1 %383  ;;  %v2026_v59 = vpop.permute.xlu0 %2025 }
 0x2f6   :  { %8235 = vst [vmem:[#allocation59_spill] sm:$0xff] %v6779_v11 }
 0x2f9   :  { %v2040_v16 = vpop.permute.xlu1 %2039  ;;  %v6783_v0 = vpop.permute.xlu0 %2091 }
 0x2fa   :  { %8236 = vst [vmem:[#allocation60_spill] sm:$0xff] %v6783_v0  ;;  %v2123_v57 = vadd.f32 %v6783_v0, %v2075_v50  ;;  %v2077_v50 = vadd.f32 %v2040_v16, %v1981_v60  ;;  %v1973_v16 = vmul.f32 %v6395_v25, %v6758_v13 }
 0x2fc   :  { %2163 = vrot.lane.b32.xlu1 %v2123_v57, %s6096_s29  ;;  %v2069_v13 = vadd.f32 %v2024_v55, %v1973_v16 }
 0x2fd   :  { %v6791_v45 = vpop.permute.xlu1 %2093  ;;  %v6793_v46 = vpop.permute.xlu0 %341 }
 0x2fe   :  { %8237 = vst [vmem:[#allocation61_spill] sm:$0xff] %v6791_v45  ;;  %8238 = vst [vmem:[#allocation62_spill] sm:$0xff] %v6793_v46  ;;  %v2124_v58 = vadd.f32 %v6791_v45, %v2076_v53  ;;  %v2116_v47 = vadd.f32 %v6791_v45, %v2068_v54  ;;  %v1971_v53 = vmul.f32 %v6395_v25, %v6754_v32 }
 0x300   :  { %2165 = vrot.lane.b32.xlu0 %v2124_v58, %s6096_s29  ;;  %2149 = vrot.lane.b32.xlu1 %v2116_v47, %s6096_s29  ;;  %v1974_v47 = vmul.f32 %v6395_v25, %v6764_v19  ;;  %v2067_v60 = vadd.f32 %v2020_v56, %v1971_v53  ;;  %v6835_v56 = vmul.f32 %v6393_v23, %v6779_v11 }
 0x301   :  { %v6799_v1 = vpop.permute.xlu1 %390  ;;  %v2028_v31 = vpop.permute.xlu0 %2027 }
 0x302   :  { %8239 = vst [vmem:[#allocation63_spill] sm:$0xff] %v6799_v1  ;;  %v2070_v53 = vadd.f32 %v2026_v59, %v1974_v47  ;;  %v6850_v59 = vmul.f32 %v6395_v25, %v6793_v46  ;;  %v6854_v47 = vmul.f32 %v6393_v23, %v6799_v1 }
 0x305   :  { %v2042_v57 = vpop.permute.xlu1 %2041  ;;  %v6803_v20 = vpop.permute.xlu0 %2095 }
 0x306   :  { %8240 = vst [vmem:[#allocation64_spill] sm:$0xff] %v6803_v20  ;;  %v2125_v61 = vadd.f32 %v6803_v20, %v2077_v50  ;;  %v1975_v50 = vmul.f32 %v6395_v25, %v6773_v62  ;;  %v6846_v62 = vadd.f32 %v6783_v0, %v2067_v60  ;;  %v6874_v10 = vadd.f32 %v6803_v20, %v2069_v13 }
 0x307   :  { %v5500_v54 = vpop.f32.mrb[2].mxu1 }
 0x308   :  { %v1390_v52 = vmul.f32 0.35355338, %v5500_v54  ;;  %v1310_v58 = vpop.f32.mrb[3].mxu1  ;;  %2167 = vrot.lane.b32.xlu0 %v2125_v61, %s6096_s29  ;;  %v1982_v54 = vmul.f32 %v6393_v23, %v6775_v26  ;;  %v6827_v61 = vmul.f32 %v6395_v25, %v6777_v9  ;;  %v6859_v19 = vadd.f32 %v2028_v31, %v1975_v50 }
 0x309   :  { %v1389_v32 = vmul.f32 0.35355338, %v1310_v58  ;;  %v6820_v51 = vpop.permute.xlu1 %348 }
 0x30a   :  { %8241 = vst [vmem:[#allocation65_spill] sm:$0xff] %v6820_v51  ;;  %v6831_v45 = vsel %vm1406_vm2, %v1390_v52, -1e+09 }
 0x30b   :  { %v1477_v58 = vsel %vm1469_vm6, %v6831_v45, -inf  ;;  %v6841_v26 = vsel %vm1405_vm3, %v1389_v32, -1e+09  ;;  %v5503_v55 = vpop.f32.mrb[4].mxu1 }
 0x30c   :  { %v1478_v16 = vrot.slane %v1477_v58, 4  ;;  %v1470_v9 = vsel %vm1469_vm6, %v6841_v26, -inf  ;;  %v1392_v24 = vmul.f32 0.35355338, %v5503_v55  ;;  %v1320_v52 = vpop.f32.mrb[5].mxu1  ;;  %v6861_v55 = vadd.f32 %v2042_v57, %v1982_v54 }
 0x30d   :  { %v1471_v32 = vrot.slane %v1470_v9, 4  ;;  %v1391_v29 = vmul.f32 0.35355338, %v1320_v52  ;;  %v6856_v11 = vpop.permute.xlu1 %2029 }
 0x30e   :  { %v1479_v60 = vmax.f32 %v1477_v58, %v1478_v16  ;;  %v6865_v0 = vsel %vm1408_vm4, %v1392_v24, -1e+09  ;;  %v6881_v58 = vmul.f32 %v6395_v25, %v6820_v51 }
 0x30f   :  { %v1472_v46 = vmax.f32 %v1470_v9, %v1471_v32  ;;  %v1491_v1 = vsel %vm1469_vm6, %v6865_v0, -inf  ;;  %v6871_v52 = vsel %vm1407_vm5, %v1391_v29, -1e+09  ;;  %v5506_v14 = vpop.f32.mrb[6].mxu1 }
 0x310   :  { %v1480_v31 = vrot.slane %v1479_v60, 2  ;;  %v1492_v57 = vrot.slane %v1491_v1, 4  ;;  %v1484_v50 = vsel %vm1469_vm6, %v6871_v52, -inf  ;;  %v1394_v54 = vmul.f32 0.35355338, %v5506_v14  ;;  %v1330_v24 = vpop.f32.mrb[7].mxu1 }
 0x311   :  { %v1473_v9 = vrot.slane %v1472_v46, 2  ;;  %v1485_v29 = vrot.slane %v1484_v50, 4  ;;  %v1393_v16 = vmul.f32 0.35355338, %v1330_v24  ;;  %v6883_v32 = vpop.permute.xlu1 %2097 }
 0x312   :  { %8242 = vst [vmem:[#allocation66_spill] sm:$0xff] %v6883_v32  ;;  %v1481_v13 = vmax.f32 %v1479_v60, %v1480_v31  ;;  %v1493_v33 = vmax.f32 %v1491_v1, %v1492_v57  ;;  %v6887_v30 = vsel %vm1410_vm7, %v1394_v54, -1e+09  ;;  %v2118_v14 = vadd.f32 %v6883_v32, %v2070_v53 }
 0x313   :  { %v1474_v20 = vmax.f32 %v1472_v46, %v1473_v9  ;;  %v1486_v7 = vmax.f32 %v1484_v50, %v1485_v29  ;;  %v1505_v8 = vsel %vm1469_vm6, %v6887_v30, -inf  ;;  %v6894_v25 = vsel %vm1409_vm8, %v1393_v16, -1e+09  ;;  %v5509_v24 = vpop.f32.mrb[8].mxu1  ;;  %v6899_v46 = vpop.permute.xlu0 %397 }
 0x314   :  { %v1482_v51 = vrot.slane %v1481_v13, 1  ;;  %v1494_v5 = vrot.slane %v1493_v33, 2  ;;  %v1506_v60 = vrot.slane %v1505_v8, 4  ;;  %v1498_v1 = vsel %vm1469_vm6, %v6894_v25, -inf  ;;  %v1340_v31 = vpop.f32.mrb[9].mxu1  ;;  %2153 = vrot.lane.b32.xlu1 %v2118_v14, %s6096_s29  ;;  %8243 = vst [vmem:[#allocation67_spill] sm:$0xff] %v6899_v46 }
 0x315   :  { %v1475_v53 = vrot.slane %v1474_v20, 1  ;;  %v1487_v57 = vrot.slane %v1486_v7, 2  ;;  %v1499_v50 = vrot.slane %v1498_v1, 4  ;;  %v1396_v54 = vmul.f32 0.35355338, %v5509_v24 }
 0x316   :  { %v1483_v9 = vmax.f32 %v1481_v13, %v1482_v51  ;;  %v1495_v29 = vmax.f32 %v1493_v33, %v1494_v5  ;;  %v1507_v16 = vmax.f32 %v1505_v8, %v1506_v60  ;;  %v1395_v35 = vmul.f32 0.35355338, %v1340_v31 }
 0x317   :  { %v1476_v34 = vmax.f32 %v1474_v20, %v1475_v53  ;;  %v1488_v6 = vmax.f32 %v1486_v7, %v1487_v57  ;;  %v1500_v3 = vmax.f32 %v1498_v1, %v1499_v50  ;;  %v6903_v2 = vsel %vm8177_vm9, %v1396_v54, -1e+09  ;;  %v5512_v4 = vpop.f32.mrb[10].mxu1  ;;  %v2044_v31 = vpop.permute.xlu0 %2043 }
 0x318   :  { %v1583_v14 = vsub.f32 %v6831_v45, %v1483_v9  ;;  %v1496_v18 = vrot.slane %v1495_v29, 1  ;;  %v1508_v27 = vrot.slane %v1507_v16, 2  ;;  %v1519_v28 = vsel %vm1469_vm6, %v6903_v2, -inf  ;;  %v1350_v24 = vpop.f32.mrb[11].mxu1 }
 0x319   :  { %v1582_v5 = vsub.f32 %v6841_v26, %v1476_v34  ;;  %v1489_v8 = vrot.slane %v1488_v6, 1  ;;  %v1501_v33 = vrot.slane %v1500_v3, 2  ;;  %v1520_v51 = vrot.slane %v1519_v28, 4 }
 0x31a   :  { %v1600_v7 = vmul.f32 1.442695, %v1583_v14  ;;  %v1497_v20 = vmax.f32 %v1495_v29, %v1496_v18  ;;  %v1509_v13 = vmax.f32 %v1507_v16, %v1508_v27  ;;  %v6912_v60 = vsel %vm8176_vm10, %v1395_v35, -1e+09 }
 0x31b   :  { %v1598_v45 = vmul.f32 1.442695, %v1582_v5  ;;  %v1490_v1 = vmax.f32 %v1488_v6, %v1489_v8  ;;  %v1502_v53 = vmax.f32 %v1500_v3, %v1501_v33  ;;  %v1521_v57 = vmax.f32 %v1519_v28, %v1520_v51  ;;  %v5515_v26 = vpop.f32.mrb[12].mxu1 }
 0x31c   :  { %5908 = vpow2.f32 %v1600_v7  ;;  %v1585_v34 = vsub.f32 %v6865_v0, %v1497_v20  ;;  %v1510_v50 = vrot.slane %v1509_v13, 1  ;;  %v1512_v18 = vsel %vm1469_vm6, %v6912_v60, -inf  ;;  %v6918_v27 = vpop.f32.mrb[13].mxu1  ;;  %v6939_v20 = vpop.permute.xlu0 %404 }
 0x31d   :  { %5910 = vpow2.f32 %v1598_v45  ;;  %v1584_v35 = vsub.f32 %v6871_v52, %v1490_v1  ;;  %v1503_v54 = vrot.slane %v1502_v53, 1  ;;  %v1522_v6 = vrot.slane %v1521_v57, 2 }
 0x31e   :  { %v1604_v9 = vmul.f32 1.442695, %v1585_v34  ;;  %v1511_v3 = vmax.f32 %v1509_v13, %v1510_v50  ;;  %v1513_v28 = vrot.slane %v1512_v18, 4  ;;  %v2126_v29 = vadd.f32 %v6883_v32, %v6861_v55  ;;  %v2032_v34 = vpop.permute.xlu1 %2031 }
 0x31f   :  { %v6926_v0 = vmul.f32 %v6393_v23, %v6899_v46  ;;  %v1602_v16 = vmul.f32 1.442695, %v1584_v35  ;;  %v1504_v14 = vmax.f32 %v1502_v53, %v1503_v54  ;;  %v1523_v5 = vmax.f32 %v1521_v57, %v1522_v6  ;;  %v6928_v8 = vpop.f32.mrb[14].mxu1 }
 0x320   :  { %5912 = vpow2.f32 %v1604_v9  ;;  %v6932_v52 = vadd.f32 %v6856_v11, %v6827_v61  ;;  %v1587_v33 = vsub.f32 %v6887_v30, %v1511_v3  ;;  %v1514_v51 = vmax.f32 %v1512_v18, %v1513_v28  ;;  %2169 = vrot.lane.b32.xlu0 %v2126_v29, %s6096_s29  ;;  %v6936_v55 = vpop.f32.mrb[15].mxu1 }
 0x321   :  { %5914 = vpow2.f32 %v1602_v16  ;;  %v1586_v7 = vsub.f32 %v6894_v25, %v1504_v14  ;;  %v1524_v13 = vrot.slane %v1523_v5, 1  ;;  %v1398_v45 = vmul.f32 0.35355338, %v5512_v4 }
 0x322   :  { %v6942_v1 = vadd.f32 %v2044_v31, %v6835_v56  ;;  %v1608_v53 = vmul.f32 1.442695, %v1587_v33  ;;  %v1515_v11 = vrot.slane %v1514_v51, 2  ;;  %v1397_v61 = vmul.f32 0.35355338, %v1350_v24 }
 0x323   :  { %v1606_v57 = vmul.f32 1.442695, %v1586_v7  ;;  %v1525_v30 = vmax.f32 %v1523_v5, %v1524_v13  ;;  %v6946_v50 = vsel %vm8175_vm11, %v1398_v45, -1e+09  ;;  %v1400_v18 = vmul.f32 0.35355338, %v5515_v26  ;;  %v2046_v5 = vpop.permute.xlu0 %2045 }
 0x324   :  { %5916 = vpow2.f32 %v1608_v53  ;;  %v1516_v25 = vmax.f32 %v1514_v51, %v1515_v11  ;;  %v1533_v35 = vsel %vm1469_vm6, %v6946_v50, -inf  ;;  %v6952_v4 = vsel %vm8166_vm12, %v1397_v61, -1e+09  ;;  %v6954_v56 = vpop.f32.mrb[16].mxu1 }
 0x325   :  { %5918 = vpow2.f32 %v1606_v57  ;;  %v1589_v24 = vsub.f32 %v6903_v2, %v1525_v30  ;;  %v1534_v31 = vrot.slane %v1533_v35, 4  ;;  %v1526_v54 = vsel %vm1469_vm6, %v6952_v4, -inf  ;;  %v6959_v6 = vpop.f32.mrb[17].mxu1 }
 0x326   :  { %v6961_v26 = vpop.eup %5908  ;;  %v1517_v9 = vrot.slane %v1516_v25, 1  ;;  %v6964_v3 = vadd.f32 %v2032_v34, %v6850_v59  ;;  %v1527_v28 = vrot.slane %v1526_v54, 4  ;;  %v6968_v29 = vsel %vm8164_vm13, %v1400_v18, -1e+09 }
 0x327   :  { %v6970_v16 = vpop.eup %5910  ;;  %v1637_v2 = vsel %vm1469_vm6, %v6961_v26, 0.0  ;;  %v1612_v14 = vmul.f32 1.442695, %v1589_v24  ;;  %v1535_v33 = vmax.f32 %v1533_v35, %v1534_v31  ;;  %v1547_v51 = vsel %vm1469_vm6, %v6968_v29, -inf }
 0x328   :  { %v1638_v7 = vrot.slane %v1637_v2, 4  ;;  %v1630_v59 = vsel %vm1469_vm6, %v6970_v16, 0.0  ;;  %v1518_v13 = vmax.f32 %v1516_v25, %v1517_v9  ;;  %v1528_v45 = vmax.f32 %v1526_v54, %v1527_v28 }
 0x329   :  { %v1631_v53 = vrot.slane %v1630_v59, 4  ;;  %5920 = vpow2.f32 %v1612_v14  ;;  %v1536_v11 = vrot.slane %v1535_v33, 2  ;;  %v1548_v61 = vrot.slane %v1547_v51, 4 }
 0x32a   :  { %v6978_v57 = vpop.eup %5912  ;;  %v1639_v30 = vadd.f32 %v1638_v7, %v1637_v2  ;;  %v1588_v34 = vsub.f32 %v6912_v60, %v1518_v13  ;;  %v6983_v18 = vadd.f32 %v2046_v5, %v6854_v47  ;;  %v1529_v35 = vrot.slane %v1528_v45, 2 }
 0x32b   :  { %v6985_v24 = vpop.eup %5914  ;;  %v1632_v31 = vadd.f32 %v1631_v53, %v1630_v59  ;;  %v1651_v25 = vsel %vm1469_vm6, %v6978_v57, 0.0  ;;  %v1537_v54 = vmax.f32 %v1535_v33, %v1536_v11  ;;  %v1549_v9 = vmax.f32 %v1547_v51, %v1548_v61  ;;  %v2034_v61 = vpop.permute.xlu0 %2033 }
 0x32c   :  { %v1640_v28 = vrot.slane %v1639_v30, 2  ;;  %v1652_v14 = vrot.slane %v1651_v25, 4  ;;  %v1644_v39 = vsel %vm1469_vm6, %v6985_v24, 0.0  ;;  %v1610_v2 = vmul.f32 1.442695, %v1588_v34 }
 0x32d   :  { %v1633_v7 = vrot.slane %v1632_v31, 2  ;;  %v1645_v60 = vrot.slane %v1644_v39, 4  ;;  %v1538_v13 = vrot.slane %v1537_v54, 1  ;;  %v1399_v47 = vmul.f32 0.35355338, %v6918_v27 }
 0x32e   :  { %v6992_v5 = vpop.eup %5916  ;;  %v1641_v38 = vadd.f32 %v1640_v28, %v1639_v30  ;;  %v1653_v59 = vadd.f32 %v1652_v14, %v1651_v25  ;;  %5922 = vpow2.f32 %v1610_v2  ;;  %v1530_v53 = vmax.f32 %v1528_v45, %v1529_v35  ;;  %v7003_v35 = vpop.permute.xlu1 %2099 }
 0x32f   :  { %v6994_v37 = vpop.eup %5918  ;;  %v1646_v33 = vadd.f32 %v1645_v60, %v1644_v39  ;;  %v1665_v51 = vsel %vm1469_vm6, %v6992_v5, 0.0  ;;  %v1539_v11 = vmax.f32 %v1537_v54, %v1538_v13  ;;  %v1550_v34 = vrot.slane %v1549_v9, 2 }
 0x330   :  { %v1642_v36 = vrot.slane %v1641_v38, 1  ;;  %v1654_v63 = vrot.slane %v1653_v59, 2  ;;  %v1666_v46 = vrot.slane %v1665_v51, 4  ;;  %v1658_v27 = vsel %vm1469_vm6, %v6994_v37, 0.0 }
 0x331   :  { %v7000_v32 = vadd.f32 %v1633_v7, %v1632_v31  ;;  %v1647_v30 = vrot.slane %v1646_v33, 2  ;;  %v1659_v25 = vrot.slane %v1658_v27, 4  ;;  %v1591_v45 = vsub.f32 %v6946_v50, %v1539_v11 }
 0x332   :  { %v1643_v39 = vadd.f32 %v1642_v36, %v1641_v38  ;;  %v1667_v28 = vadd.f32 %v1666_v46, %v1665_v51  ;;  %v1531_v14 = vrot.slane %v1530_v53, 1  ;;  %v7006_v54 = vadd.f32 %v2034_v61, %v6881_v58 }
 0x333   :  { %v7008_v2 = vpop.eup %5920  ;;  %v1660_v60 = vadd.f32 %v1659_v25, %v1658_v27  ;;  %v1616_v13 = vmul.f32 1.442695, %v1591_v45  ;;  %v1551_v15 = vmax.f32 %v1549_v9, %v1550_v34  ;;  %v7012_v31 = vsel %vm8165_vm14, %v1399_v47, -1e+09  ;;  %v2048_v27 = vpop.permute.xlu1 %2047 }
 0x334   :  { %vm8173_vm13 = vcmp.gt.f32.partialorder %v6618_v42, 0.0  ;;  %5924 = vrcp.f32 %v1643_v39  ;;  %v7016_v36 = vadd.f32 %v1654_v63, %v1653_v59  ;;  %v1668_v38 = vrot.slane %v1667_v28, 2 }
 0x335   :  { %v1679_v58 = vsel %vm1469_vm6, %v7008_v2, 0.0  ;;  %v7021_v50 = vadd.f32 %v1647_v30, %v1646_v33  ;;  %5926 = vpow2.f32 %v1616_v13  ;;  %v1661_v7 = vrot.slane %v1660_v60, 2  ;;  %v7040_v13 = vpop.permute.xlu0 %2101 }
 0x336   :  { %v1680_v9 = vrot.slane %v1679_v58, 4  ;;  %v1532_v47 = vmax.f32 %v1530_v53, %v1531_v14  ;;  %v1552_v51 = vrot.slane %v1551_v15, 1  ;;  %v1540_v11 = vsel %vm1469_vm6, %v7012_v31, -inf }
 0x337   :  { %v7025_v61 = vadd.f32 %v1668_v38, %v1667_v28  ;;  %v1541_v59 = vrot.slane %v1540_v11, 4  ;;  %v2119_v34 = vadd.f32 %v7003_v35, %v6859_v19  ;;  %v2127_v53 = vadd.f32 %v7003_v35, %v6942_v1 }
 0x338   :  { %v1681_v63 = vadd.f32 %v1680_v9, %v1679_v58  ;;  %v7029_v25 = vpop.eup %5922  ;;  %v1590_v30 = vsub.f32 %v6952_v4, %v1532_v47  ;;  %v1553_v45 = vmax.f32 %v1551_v15, %v1552_v51  ;;  %vm8172_vm14 = vcmp.gt.f32.partialorder %v6620_v43, 0.0 }
 0x339   :  { %v1672_v14 = vsel %vm1469_vm6, %v7029_v25, 0.0  ;;  %v1542_v19 = vmax.f32 %v1540_v11, %v1541_v59  ;;  %2155 = vrot.lane.b32.xlu1 %v2119_v34, %s6096_s29  ;;  %v7042_v38 = vadd.f32 %v1661_v7, %v1660_v60  ;;  %2171 = vrot.lane.b32.xlu0 %v2127_v53, %s6096_s29  ;;  %vm8171_vm12 = vcmp.gt.f32.partialorder %v6622_v44, 0.0  ;;  %v7080_v1 = vpop.permute.xlu0 %2103 }
 0x33a   :  { %v1682_v28 = vrot.slane %v1681_v63, 2  ;;  %v1673_v4 = vrot.slane %v1672_v14, 4  ;;  %v1614_v15 = vmul.f32 1.442695, %v1590_v30  ;;  %v1593_v58 = vsub.f32 %v6968_v29, %v1553_v45 }
 0x33b   :  { %v1543_v9 = vrot.slane %v1542_v19, 2  ;;  %v1402_v47 = vmul.f32 0.35355338, %v6928_v8  ;;  %v1401_v51 = vmul.f32 0.35355338, %v6936_v55  ;;  %v2120_v60 = vadd.f32 %v7040_v13, %v6932_v52  ;;  %v2050_v8 = vpop.permute.xlu1 %2049 }
 0x33c   :  { %v1674_v11 = vadd.f32 %v1673_v4, %v1672_v14  ;;  %5928 = vpow2.f32 %v1614_v15  ;;  %v1620_v59 = vmul.f32 1.442695, %v1593_v58  ;;  %v7052_v7 = vadd.f32 %v1682_v28, %v1681_v63 }
 0x33d   :  { %v1544_v29 = vmax.f32 %v1542_v19, %v1543_v9  ;;  %v7056_v34 = vsel %vm8174_vm15, %v1402_v47, -1e+09  ;;  %v7060_v30 = vsel %vm8173_vm13, %v1401_v51, -1e+09  ;;  %2147 = vrot.lane.b32.xlu0 %v6846_v62, %s6096_s29  ;;  %2157 = vrot.lane.b32.xlu1 %v2120_v60, %s6096_s29  ;;  %v2081_v9 = vadd.f32 %v2048_v27, %v6926_v0 }
 0x33e   :  { %v7062_v45 = vpop.eup %5924  ;;  %v1675_v55 = vrot.slane %v1674_v11, 2  ;;  %5930 = vpow2.f32 %v1620_v59  ;;  %v1561_v53 = vsel %vm1469_vm6, %v7056_v34, -inf  ;;  %v1554_v52 = vsel %vm1469_vm6, %v7060_v30, -inf }
 0x33f   :  { %v7071_v63 = vpop.eup %5926  ;;  %v1545_v14 = vrot.slane %v1544_v29, 1  ;;  %v1562_v19 = vrot.slane %v1561_v53, 4  ;;  %v1555_v4 = vrot.slane %v1554_v52, 4  ;;  %v1404_v47 = vmul.f32 0.35355338, %v6954_v56 }
 0x340   :  { %v7074_v15 = vadd.f32 %v1675_v55, %v1674_v11  ;;  %v1693_v58 = vsel %vm1469_vm6, %v7071_v63, 0.0  ;;  %v1986_v33 = vmul.f32 %v6393_v23, %v6939_v20  ;;  %v1403_v55 = vmul.f32 0.35355338, %v6959_v6 }
 0x341   :  { %v1694_v51 = vrot.slane %v1693_v58, 4  ;;  %v1546_v62 = vmax.f32 %v1544_v29, %v1545_v14  ;;  %v1563_v59 = vmax.f32 %v1561_v53, %v1562_v19  ;;  %v1556_v60 = vmax.f32 %v1554_v52, %v1555_v4  ;;  %2151 = vrot.lane.b32.xlu0 %v6874_v10, %s6096_s29  ;;  %v7093_v53 = vpop.permute.xlu1 %2105 }
 0x342   :  { %v7087_v11 = vsel %vm8172_vm14, %v1404_v47, -1e+09  ;;  %v1677_v52 = vrot.slane %v7074_v15, 1  ;;  %v7100_v14 = vsel %vm8171_vm12, %v1403_v55, -1e+09  ;;  %v2121_v6 = vadd.f32 %v7080_v1, %v6964_v3 }
 0x343   :  { %v1695_v0 = vadd.f32 %v1694_v51, %v1693_v58  ;;  %v1592_v56 = vsub.f32 %v7012_v31, %v1546_v62  ;;  %v1564_v27 = vrot.slane %v1563_v59, 2  ;;  %v1557_v29 = vrot.slane %v1556_v60, 2 }
 0x344   :  { %v1575_v23 = vsel %vm1469_vm6, %v7087_v11, -inf  ;;  %v2082_v31 = vadd.f32 %v2050_v8, %v1986_v33  ;;  %v1568_v51 = vsel %vm1469_vm6, %v7100_v14, -inf  ;;  %2159 = vrot.lane.b32.xlu1 %v2121_v6, %s6096_s29  ;;  %v2122_v62 = vadd.f32 %v7093_v53, %v7006_v54 }
 0x345   :  { %v1618_v10 = vmul.f32 1.442695, %v1592_v56  ;;  %v1565_v19 = vmax.f32 %v1563_v59, %v1564_v27  ;;  %v1558_v4 = vmax.f32 %v1556_v60, %v1557_v29  ;;  %v1576_v47 = vrot.slane %v1575_v23, 4 }
 0x346   :  { %v7104_v58 = vpop.eup %5928  ;;  %v2128_v55 = vadd.f32 %v7040_v13, %v6983_v18  ;;  %v1696_v28 = vrot.slane %v1695_v0, 2  ;;  %v1569_v27 = vrot.slane %v1568_v51, 4  ;;  %v2130_v18 = vadd.f32 %v7093_v53, %v2082_v31 }
 0x347   :  { %v1686_v3 = vsel %vm1469_vm6, %v7104_v58, 0.0  ;;  %5932 = vpow2.f32 %v1618_v10  ;;  %v1566_v33 = vrot.slane %v1565_v19, 1  ;;  %v1559_v60 = vrot.slane %v1558_v4, 1 }
 0x348   :  { %v7115_v8 = vpop.eup %5930  ;;  %v1687_v59 = vrot.slane %v1686_v3, 4  ;;  %v1577_v56 = vmax.f32 %v1575_v23, %v1576_v47  ;;  %2173 = vrot.lane.b32.xlu0 %v2128_v55, %s6096_s29  ;;  %v2129_v6 = vadd.f32 %v7080_v1, %v2081_v9  ;;  %2161 = vrot.lane.b32.xlu1 %v2122_v62, %s6096_s29  ;;  %v1697_v43 = vadd.f32 %v1696_v28, %v1695_v0 }
 0x349   :  { %v1707_v54 = vsel %vm1469_vm6, %v7115_v8, 0.0  ;;  %v1567_v29 = vmax.f32 %v1565_v19, %v1566_v33  ;;  %v1560_v10 = vmax.f32 %v1558_v4, %v1559_v60  ;;  %v1570_v47 = vmax.f32 %v1568_v51, %v1569_v27 }
 0x34a   :  { %v1688_v39 = vadd.f32 %v1687_v59, %v1686_v3  ;;  %v1708_v46 = vrot.slane %v1707_v54, 4  ;;  %v1578_v44 = vrot.slane %v1577_v56, 2  ;;  %v8244_v55 = vrot.slane %v7000_v32, 1 }
 0x34b   :  { %v1595_v23 = vsub.f32 %v7056_v34, %v1567_v29  ;;  %v1594_v31 = vsub.f32 %v7060_v30, %v1560_v10  ;;  %v1571_v4 = vrot.slane %v1570_v47, 2  ;;  %v8245_v28 = vrot.slane %v7021_v50, 1 }
 0x34c   :  { %v1636_v42 = vadd.f32 %v8244_v55, %v7000_v32  ;;  %v1689_v41 = vrot.slane %v1688_v39, 2  ;;  %v1709_v19 = vadd.f32 %v1708_v46, %v1707_v54  ;;  %v1579_v33 = vmax.f32 %v1577_v56, %v1578_v44  ;;  %2175 = vrot.lane.b32.xlu0 %v2129_v6, %s6096_s29  ;;  %2177 = vrot.lane.b32.xlu1 %v2130_v18, %s6096_s29 }
 0x34d   :  { %v1624_v9 = vmul.f32 1.442695, %v1595_v23  ;;  %v1650_v0 = vadd.f32 %v8245_v28, %v7021_v50  ;;  %v1622_v51 = vmul.f32 1.442695, %v1594_v31  ;;  %v8246_v32 = vrot.slane %v7016_v36, 1 }
 0x34e   :  { %5934 = vrcp.f32 %v1636_v42  ;;  %v1690_v34 = vadd.f32 %v1689_v41, %v1688_v39  ;;  %v1580_v62 = vrot.slane %v1579_v33, 1  ;;  %v1710_v30 = vrot.slane %v1709_v19, 2 }
 0x34f   :  { %v1657_v46 = vadd.f32 %v8246_v32, %v7016_v36  ;;  %5936 = vpow2.f32 %v1624_v9  ;;  %v1572_v44 = vmax.f32 %v1570_v47, %v1571_v4  ;;  %v8247_v3 = vrot.slane %v7042_v38, 1 }
 0x350   :  { %v1691_v59 = vrot.slane %v1690_v34, 1  ;;  %5938 = vpow2.f32 %v1622_v51  ;;  %v1581_v60 = vmax.f32 %v1579_v33, %v1580_v62  ;;  %v8248_v41 = vrot.slane %v7025_v61, 1 }
 0x351   :  { %v1664_v42 = vadd.f32 %v8247_v3, %v7042_v38  ;;  %v7142_v39 = vpop.eup %5932  ;;  %v1573_v56 = vrot.slane %v1572_v44, 1  ;;  %5940 = vrcp.f32 %v1650_v0  ;;  %v1678_v36 = vadd.f32 %v1677_v52, %v7074_v15 }
 0x352   :  { %v1671_v50 = vadd.f32 %v8248_v41, %v7025_v61  ;;  %v1698_v27 = vrot.slane %v1697_v43, 1  ;;  %v1700_v54 = vsel %vm1469_vm6, %v7142_v39, 0.0  ;;  %v1597_v29 = vsub.f32 %v7087_v11, %v1581_v60 }
 0x353   :  { %5942 = vrcp.f32 %v1657_v46  ;;  %v1701_v38 = vrot.slane %v1700_v54, 4  ;;  %v1574_v18 = vmax.f32 %v1572_v44, %v1573_v56  ;;  %v8249_v6 = vrot.slane %v7052_v7, 1 }
 0x354   :  { %5944 = vrcp.f32 %v1664_v42  ;;  %v1711_v10 = vadd.f32 %v1710_v30, %v1709_v19  ;;  %v1628_v23 = vmul.f32 1.442695, %v1597_v29  ;;  %v1692_v47 = vadd.f32 %v1691_v59, %v1690_v34 }
 0x355   :  { %v1685_v61 = vadd.f32 %v8249_v6, %v7052_v7  ;;  %5946 = vrcp.f32 %v1671_v50  ;;  %v1702_v55 = vadd.f32 %v1701_v38, %v1700_v54  ;;  %v1596_v15 = vsub.f32 %v7100_v14, %v1574_v18 }
 0x356   :  { %5948 = vrcp.f32 %v1678_v36  ;;  %v1712_v33 = vrot.slane %v1711_v10, 1  ;;  %v1699_v4 = vadd.f32 %v1698_v27, %v1697_v43  ;;  %v1759_v7 = vmul.f32 %v7062_v45, %v6961_v26 }
 0x357   :  { %5950 = vpow2.f32 %v1628_v23  ;;  %v1703_v31 = vrot.slane %v1702_v55, 2  ;;  %v1626_v11 = vmul.f32 1.442695, %v1596_v15  ;;  %vm2343_vm12 = vcmask 1041409  }
 0x358   :  { %v5935_v52 = vpop.eup %5934  ;;  %5952 = vrcp.f32 %v1685_v61  ;;  %v1713_v45 = vadd.f32 %v1712_v33, %v1711_v10  ;;  %vm2345_vm14 = vcmask 1042434   ;;  %vm2347_vm13 = vcmask 1043459  }
 0x359   :  { %v1758_v9 = vmul.f32 %v5935_v52, %v6970_v16  ;;  %5954 = vrcp.f32 %v1692_v47  ;;  %v7153_v28 = vpop.eup %5936  ;;  %v1704_v19 = vadd.f32 %v1703_v31, %v1702_v55  ;;  %vm2349_vm15 = vcmask 1044484  }
 0x35a   :  { %5956 = vpow2.f32 %v1626_v11  ;;  %v7157_v0 = vpop.eup %5938  ;;  %v1721_v14 = vsel %vm1469_vm6, %v7153_v28, 0.0  ;;  %vm2351_vm11 = vcmask 1045509   ;;  %vm2353_vm10 = vcmask 1046534  }
 0x35b   :  { %5524 = vmatprep.mubr.msk.f32.mxu0 %vm1469_vm6, %v1758_v9  ;;  %v5941_v34 = vpop.eup %5940  ;;  %v1705_v51 = vrot.slane %v1704_v19, 1  ;;  %v1722_v62 = vrot.slane %v1721_v14, 4  ;;  %v1714_v43 = vsel %vm1469_vm6, %v7157_v0, 0.0  ;;  %5958 = vrcp.f32 %v1699_v4 }
 0x35c   :  { %5525 = vmatmul.mubr.msk.f32.vlgmr.msra.gmra.mrb[18].mxu0 %vm1469_vm6, %v1759_v7  ;;  %v1715_v32 = vrot.slane %v1714_v43, 4  ;;  %v1760_v26 = vmul.f32 %v5941_v34, %v6985_v24  ;;  %vm8178_vm9 = vcmask 1047559  }
 0x35d   :  { %v5943_v16 = vpop.eup %5942  ;;  %v1723_v30 = vadd.f32 %v1722_v62, %v1721_v14  ;;  %v1706_v3 = vadd.f32 %v1705_v51, %v1704_v19 }
 0x35e   :  { %v5945_v46 = vpop.eup %5944  ;;  %v1761_v44 = vmul.f32 %v5943_v16, %v6978_v57  ;;  %v1716_v59 = vadd.f32 %v1715_v32, %v1714_v43  ;;  %5527 = vmatprep.mubr.msk.f32.mxu0 %vm1469_vm6, %v1760_v26 }
 0x35f   :  { %v5947_v42 = vpop.eup %5946  ;;  %v1762_v60 = vmul.f32 %v5945_v46, %v6994_v37  ;;  %v1724_v50 = vrot.slane %v1723_v30, 2  ;;  %5960 = vrcp.f32 %v1706_v3  ;;  %v2325_v3 = vld [vmem:[%s8080_s10 + $0x10] sm:$0xff] }
 0x360   :  { %v5949_v41 = vpop.eup %5948  ;;  %5528 = vmatmul.mubr.msk.f32.gmra.mrb[20].mxu0 %vm1469_vm6, %v1761_v44  ;;  %v1717_v24 = vrot.slane %v1716_v59, 2  ;;  %5962 = vrcp.f32 %v1713_v45  ;;  %v1763_v29 = vmul.f32 %v5947_v42, %v6992_v5  ;;  %v2326_v42 = vld [vmem:[%s8080_s10 + $0x18] sm:$0xff] }
 0x361   :  { %v5951_v56 = vpop.eup %5950  ;;  %5530 = vmatprep.mubr.msk.f32.mxu0 %vm1469_vm6, %v1762_v60  ;;  %v1764_v36 = vmul.f32 %v5949_v41, %v7029_v25  ;;  %v1725_v27 = vadd.f32 %v1724_v50, %v1723_v30 }
 0x362   :  { %v5953_v57 = vpop.eup %5952  ;;  %v1735_v54 = vsel %vm1469_vm6, %v5951_v56, 0.0  ;;  %v1718_v37 = vadd.f32 %v1717_v24, %v1716_v59  ;;  %v5799_v59 = vpack.c.bf16 %v2326_v42, %v2325_v3 }
 0x363   :  { %v5955_v38 = vpop.eup %5954  ;;  %v1736_v18 = vrot.slane %v1735_v54, 4  ;;  %v1726_v61 = vrot.slane %v1725_v27, 1  ;;  %v1765_v15 = vmul.f32 %v5953_v57, %v7008_v2 }
 0x364   :  { %v5957_v6 = vpop.eup %5956  ;;  %5531 = vmatmul.mubr.msk.f32.gmra.mrb[22].mxu0 %vm1469_vm6, %v1763_v29  ;;  %v1719_v10 = vrot.slane %v1718_v37, 1  ;;  %v1766_v25 = vmul.f32 %v5955_v38, %v7104_v58 }
 0x365   :  { %v1737_v23 = vadd.f32 %v1736_v18, %v1735_v54  ;;  %v1728_v47 = vsel %vm1469_vm6, %v5957_v6, 0.0  ;;  %5533 = vmatprep.mubr.msk.f32.mxu0 %vm1469_vm6, %v1764_v36  ;;  %v1727_v52 = vadd.f32 %v1726_v61, %v1725_v27  ;;  %v5959_v5 = vpop.eup %5958 }
 0x366   :  { %v1729_v55 = vrot.slane %v1728_v47, 4  ;;  %v1720_v11 = vadd.f32 %v1719_v10, %v1718_v37  ;;  %v1767_v19 = vmul.f32 %v5959_v5, %v7071_v63 }
 0x367   :  { %v1738_v31 = vrot.slane %v1737_v23, 2  ;;  %5964 = vrcp.f32 %v1727_v52 }
 0x368   :  { %v1730_v33 = vadd.f32 %v1729_v55, %v1728_v47  ;;  %5534 = vmatmul.mubr.msk.f32.gmra.mrb[24].mxu0 %vm1469_vm6, %v1765_v15  ;;  %5966 = vrcp.f32 %v1720_v11 }
 0x369   :  { %v1739_v9 = vadd.f32 %v1738_v31, %v1737_v23  ;;  %5536 = vmatprep.mubr.msk.f32.mxu0 %vm1469_vm6, %v1766_v25  ;;  %v5961_v4 = vpop.eup %5960 }
 0x36a   :  { %v1731_v7 = vrot.slane %v1730_v33, 2  ;;  %v5963_v58 = vpop.eup %5962  ;;  %v1768_v2 = vmul.f32 %v5961_v4, %v7142_v39 }
 0x36b   :  { %v1740_v14 = vrot.slane %v1739_v9, 1  ;;  %v1769_v43 = vmul.f32 %v5963_v58, %v7115_v8  ;;  %v2323_v8 = vld [vmem:[%s8080_s10] sm:$0xff] }
 0x36c   :  { %v1732_v34 = vadd.f32 %v1731_v7, %v1730_v33  ;;  %5537 = vmatmul.mubr.msk.f32.gmra.mrb[26].mxu0 %vm1469_vm6, %v1767_v19 }
 0x36d   :  { %5539 = vmatprep.mubr.msk.f32.mxu0 %vm1469_vm6, %v1768_v2  ;;  %v1741_v51 = vadd.f32 %v1740_v14, %v1739_v9 }
 0x36e   :  { %v1733_v62 = vrot.slane %v1732_v34, 1  ;;  %v7205_v60 = vpop.permute.xlu1 %2163 }
 0x36f   :  { %5968 = vrcp.f32 %v1741_v51 }
 0x370   :  { %5540 = vmatmul.mubr.msk.f32.gmra.mrb[28].mxu0 %vm1469_vm6, %v1769_v43  ;;  %v1734_v16 = vadd.f32 %v1733_v62, %v1732_v34 }
 0x371   :  { %v5965_v32 = vpop.eup %5964 }
 0x372   :  { %5970 = vrcp.f32 %v1734_v16  ;;  %v5967_v63 = vpop.eup %5966  ;;  %v1771_v39 = vmul.f32 %v5965_v32, %v7153_v28  ;;  %v2324_v28 = vld [vmem:[%s8080_s10 + $0x8] sm:$0xff]  ;;  %v7207_v41 = vpop.permute.xlu0 %2165 }
 0x373   :  { %v1770_v26 = vmul.f32 %v5967_v63, %v7157_v0  ;;  %v5795_v0 = vpack.c.bf16 %v2324_v28, %v2323_v8 }
 0x375   :  { %5542 = vmatprep.mubr.msk.f32.mxu0 %vm1469_vm6, %v1770_v26  ;;  %5796 = vmatprep.subr.bf16.mxu1 %v5795_v0 }
 0x376   :  { %5543 = vmatmul.mubr.msk.f32.gmra.mrb[30].mxu0 %vm1469_vm6, %v1771_v39  ;;  %5798 = vmatpush3.bf16.msra.mxu1 %v5795_v0 }
 0x377   :  { %5800 = vmatprep.subr.bf16.mxu1 %v5799_v59 }
 0x379   :  { %v5969_v45 = vpop.eup %5968 }
 0x37a   :  { %v1773_v44 = vmul.f32 %v5969_v45, %v5951_v56  ;;  %5802 = vmatpush3.bf16.msra.mxu1 %v5799_v59  ;;  %v7209_v50 = vpop.permute.xlu0 %2167  ;;  %v2150_v56 = vpop.permute.xlu1 %2149 }
 0x37c   :  { %v5971_v46 = vpop.eup %5970 }
 0x37d   :  { %v1772_v30 = vmul.f32 %v5971_v46, %v5957_v6 }
 0x37f   :  { %5545 = vmatprep.mubr.msk.f32.mxu0 %vm1469_vm6, %v1772_v30 }
 0x380   :  { %5546 = vmatmul.mubr.msk.f32.gmra.mrb[32].mxu0 %vm1469_vm6, %v1773_v44 }
 0x386   :  { %v2154_v36 = vpop.permute.xlu1 %2153 }
 0x392   :  { %v7211_v24 = vpop.permute.xlu0 %2169 }
 0x3ab   :  { %v7213_v57 = vpop.permute.xlu0 %2171  ;;  %v2156_v27 = vpop.permute.xlu1 %2155 }
 0x3af   :  { %v2148_v54 = vpop.permute.xlu0 %2147  ;;  %v2158_v29 = vpop.permute.xlu1 %2157 }
 0x3b3   :  { %v2152_v25 = vpop.permute.xlu0 %2151 }
 0x3b6   :  { %v2160_v5 = vpop.permute.xlu1 %2159 }
 0x3ba   :  { %v2162_v39 = vpop.permute.xlu1 %2161 }
 0x42f   :  { %v5526_v38 = vpop.f32.mrb[18].mxu0 }
 0x430   :  { %v2196_v37 = vmul.f32 %v5526_v38, %v2150_v56  ;;  %v1892_v18 = vpop.f32.mrb[19].mxu0 }
 0x431   :  { %v2195_v6 = vmul.f32 %v2148_v54, %v1892_v18 }
 0x432   :  { %v2218_v61 = vsel %vm62_vm0, %v2196_v37, 0.0 }
 0x433   :  { %v2219_v10 = vrot.slane %v2218_v61, 4  ;;  %v2211_v23 = vsel %vm62_vm0, %v2195_v6, 0.0  ;;  %v5529_v47 = vpop.f32.mrb[20].mxu0 }
 0x434   :  { %v2212_v55 = vrot.slane %v2211_v23, 4  ;;  %v2198_v15 = vmul.f32 %v5529_v47, %v2154_v36  ;;  %v1902_v52 = vpop.f32.mrb[21].mxu0 }
 0x435   :  { %v2220_v31 = vadd.f32 %v2219_v10, %v2218_v61  ;;  %v2197_v11 = vmul.f32 %v2152_v25, %v1902_v52 }
 0x436   :  { %v2213_v33 = vadd.f32 %v2212_v55, %v2211_v23  ;;  %v2232_v9 = vsel %vm62_vm0, %v2198_v15, 0.0 }
 0x437   :  { %v2221_v4 = vrot.slane %v2220_v31, 2  ;;  %v2233_v7 = vrot.slane %v2232_v9, 4  ;;  %v2225_v19 = vsel %vm62_vm0, %v2197_v11, 0.0  ;;  %v5532_v58 = vpop.f32.mrb[22].mxu0 }
 0x438   :  { %v2214_v14 = vrot.slane %v2213_v33, 2  ;;  %v2226_v2 = vrot.slane %v2225_v19, 4  ;;  %v2200_v34 = vmul.f32 %v5532_v58, %v2158_v29  ;;  %v1912_v51 = vpop.f32.mrb[23].mxu0 }
 0x439   :  { %v2222_v62 = vadd.f32 %v2221_v4, %v2220_v31  ;;  %v2234_v43 = vadd.f32 %v2233_v7, %v2232_v9  ;;  %v2199_v16 = vmul.f32 %v2156_v27, %v1912_v51 }
 0x43a   :  { %v2215_v32 = vadd.f32 %v2214_v14, %v2213_v33  ;;  %v2227_v63 = vadd.f32 %v2226_v2, %v2225_v19  ;;  %v2246_v26 = vsel %vm62_vm0, %v2200_v34, 0.0 }
 0x43b   :  { %v2223_v45 = vrot.slane %v2222_v62, 1  ;;  %v2235_v46 = vrot.slane %v2234_v43, 2  ;;  %v2247_v30 = vrot.slane %v2246_v26, 4  ;;  %v2239_v44 = vsel %vm62_vm0, %v2199_v16, 0.0  ;;  %v5535_v8 = vpop.f32.mrb[24].mxu0 }
 0x43c   :  { %v2216_v28 = vrot.slane %v2215_v32, 1  ;;  %v2228_v0 = vrot.slane %v2227_v63, 2  ;;  %v2240_v3 = vrot.slane %v2239_v44, 4  ;;  %v2202_v42 = vmul.f32 %v5535_v8, %v2162_v39  ;;  %v1922_v59 = vpop.f32.mrb[25].mxu0 }
 0x43d   :  { %v2224_v56 = vadd.f32 %v2223_v45, %v2222_v62  ;;  %v2236_v36 = vadd.f32 %v2235_v46, %v2234_v43  ;;  %v2248_v27 = vadd.f32 %v2247_v30, %v2246_v26  ;;  %v2201_v54 = vmul.f32 %v2160_v5, %v1922_v59 }
 0x43e   :  { %v2217_v29 = vadd.f32 %v2216_v28, %v2215_v32  ;;  %v2229_v38 = vadd.f32 %v2228_v0, %v2227_v63  ;;  %v2241_v37 = vadd.f32 %v2240_v3, %v2239_v44  ;;  %v2260_v18 = vsel %vm62_vm0, %v2202_v42, 0.0 }
 0x43f   :  { %v2237_v6 = vrot.slane %v2236_v36, 1  ;;  %v2249_v61 = vrot.slane %v2248_v27, 2  ;;  %v2261_v10 = vrot.slane %v2260_v18, 4  ;;  %v2253_v23 = vsel %vm62_vm0, %v2201_v54, 0.0  ;;  %v5538_v47 = vpop.f32.mrb[26].mxu0  ;;  %v2174_v54 = vpop.permute.xlu0 %2173 }
 0x440   :  { %v2344_v25 = vsel %vm2343_vm12, %v2224_v56, %v2217_v29  ;;  %v2230_v55 = vrot.slane %v2229_v38, 1  ;;  %v2242_v15 = vrot.slane %v2241_v37, 2  ;;  %v2254_v52 = vrot.slane %v2253_v23, 4  ;;  %v1932_v31 = vpop.f32.mrb[27].mxu0 }
 0x441   :  { %v2250_v11 = vadd.f32 %v2249_v61, %v2248_v27  ;;  %v2262_v33 = vadd.f32 %v2261_v10, %v2260_v18  ;;  %v2204_v5 = vmul.f32 %v5538_v47, %v7207_v41  ;;  %v2203_v19 = vmul.f32 %v7205_v60, %v1932_v31 }
 0x442   :  { %v2231_v9 = vadd.f32 %v2230_v55, %v2229_v38  ;;  %v2243_v4 = vadd.f32 %v2242_v15, %v2241_v37  ;;  %v2255_v7 = vadd.f32 %v2254_v52, %v2253_v23  ;;  %v2238_v58 = vadd.f32 %v2237_v6, %v2236_v36 }
 0x443   :  { %v2263_v14 = vrot.slane %v2262_v33, 2  ;;  %v2274_v2 = vsel %vm62_vm0, %v2204_v5, 0.0  ;;  %v5541_v34 = vpop.f32.mrb[28].mxu0  ;;  %v2251_v63 = vrot.slane %v2250_v11, 1  ;;  %v2267_v26 = vsel %vm62_vm0, %v2203_v19, 0.0 }
 0x444   :  { %v2346_v51 = vsel %vm2345_vm14, %v2231_v9, %v2344_v25  ;;  %v2244_v62 = vrot.slane %v2243_v4, 1  ;;  %v2256_v43 = vrot.slane %v2255_v7, 2  ;;  %v2275_v16 = vrot.slane %v2274_v2, 4  ;;  %v1942_v32 = vpop.f32.mrb[29].mxu0 }
 0x445   :  { %v2264_v41 = vadd.f32 %v2263_v14, %v2262_v33  ;;  %v2206_v39 = vmul.f32 %v5541_v34, %v7211_v24  ;;  %v2268_v30 = vrot.slane %v2267_v26, 4  ;;  %v2205_v8 = vmul.f32 %v7209_v50, %v1942_v32 }
 0x446   :  { %v2245_v45 = vadd.f32 %v2244_v62, %v2243_v4  ;;  %v2257_v60 = vadd.f32 %v2256_v43, %v2255_v7  ;;  %v2276_v46 = vadd.f32 %v2275_v16, %v2274_v2  ;;  %v2348_v28 = vsel %vm2347_vm13, %v2238_v58, %v2346_v51 }
 0x447   :  { %v2288_v44 = vsel %vm62_vm0, %v2206_v39, 0.0  ;;  %v2269_v42 = vadd.f32 %v2268_v30, %v2267_v26  ;;  %v2252_v56 = vadd.f32 %v2251_v63, %v2250_v11  ;;  %v2265_v36 = vrot.slane %v2264_v41, 1  ;;  %v2178_v63 = vpop.permute.xlu1 %2177  ;;  %v2176_v39 = vpop.permute.xlu0 %2175 }
 0x448   :  { %v2258_v0 = vrot.slane %v2257_v60, 1  ;;  %v2277_v3 = vrot.slane %v2276_v46, 2  ;;  %v2289_v59 = vrot.slane %v2288_v44, 4  ;;  %v2281_v27 = vsel %vm62_vm0, %v2205_v8, 0.0 }
 0x449   :  { %v2350_v24 = vsel %vm2349_vm15, %v2245_v45, %v2348_v28  ;;  %v2270_v37 = vrot.slane %v2269_v42, 2  ;;  %v5544_v6 = vpop.f32.mrb[30].mxu0  ;;  %v2282_v50 = vrot.slane %v2281_v27, 4  ;;  %v2266_v52 = vadd.f32 %v2265_v36, %v2264_v41 }
 0x44a   :  { %v2259_v29 = vadd.f32 %v2258_v0, %v2257_v60  ;;  %v2278_v38 = vadd.f32 %v2277_v3, %v2276_v46  ;;  %v2290_v18 = vadd.f32 %v2289_v59, %v2288_v44  ;;  %v2208_v61 = vmul.f32 %v5544_v6, %v2174_v54  ;;  %v1952_v10 = vpop.f32.mrb[31].mxu0 }
 0x44b   :  { %v2352_v23 = vsel %vm2351_vm11, %v2252_v56, %v2350_v24  ;;  %v2271_v25 = vadd.f32 %v2270_v37, %v2269_v42  ;;  %v2207_v15 = vmul.f32 %v7213_v57, %v1952_v10  ;;  %v2283_v31 = vadd.f32 %v2282_v50, %v2281_v27 }
 0x44c   :  { %v2279_v47 = vrot.slane %v2278_v38, 1  ;;  %v2291_v55 = vrot.slane %v2290_v18, 2  ;;  %v2302_v11 = vsel %vm62_vm0, %v2208_v61, 0.0  ;;  %v2354_v33 = vsel %vm2353_vm10, %v2259_v29, %v2352_v23 }
 0x44d   :  { %v2272_v9 = vrot.slane %v2271_v25, 1  ;;  %v2303_v7 = vrot.slane %v2302_v11, 4  ;;  %v2284_v19 = vrot.slane %v2283_v31, 2  ;;  %v2295_v58 = vsel %vm62_vm0, %v2207_v15, 0.0 }
 0x44e   :  { %v2280_v5 = vadd.f32 %v2279_v47, %v2278_v38  ;;  %v2292_v4 = vadd.f32 %v2291_v55, %v2290_v18  ;;  %v2356_v14 = vsel %vm8178_vm9, %v2266_v52, %v2354_v33  ;;  %v2296_v51 = vrot.slane %v2295_v58, 4 }
 0x44f   :  { %v2273_v2 = vadd.f32 %v2272_v9, %v2271_v25  ;;  %v2304_v34 = vadd.f32 %v2303_v7, %v2302_v11  ;;  %5556 = vmatprep.mubr.msk.f32.mxu1 %vm62_vm0, %v2356_v14  ;;  %v2285_v57 = vadd.f32 %v2284_v19, %v2283_v31 }
 0x450   :  { %v2293_v43 = vrot.slane %v2292_v4, 1  ;;  %v2297_v32 = vadd.f32 %v2296_v51, %v2295_v58 }
 0x451   :  { %v2357_v62 = vsel %vm2343_vm12, %v2280_v5, %v2273_v2  ;;  %v2305_v16 = vrot.slane %v2304_v34, 2  ;;  %v2286_v41 = vrot.slane %v2285_v57, 1 }
 0x452   :  { %v2298_v60 = vrot.slane %v2297_v32, 2  ;;  %v2294_v28 = vadd.f32 %v2293_v43, %v2292_v4 }
 0x453   :  { %v5547_v26 = vpop.f32.mrb[32].mxu0  ;;  %v2306_v45 = vadd.f32 %v2305_v16, %v2304_v34  ;;  %v2287_v44 = vadd.f32 %v2286_v41, %v2285_v57 }
 0x454   :  { %v2210_v46 = vmul.f32 %v5547_v26, %v2178_v63  ;;  %v1962_v30 = vpop.f32.mrb[33].mxu0  ;;  %v2299_v0 = vadd.f32 %v2298_v60, %v2297_v32  ;;  %v2486_v32 = vld [vmem:[%s8081_s11 + $0x8] sm:$0xff]  ;;  %v2487_v63 = vld [vmem:[%s8081_s11 + $0x10] sm:$0xff]  ;;  %v2488_v26 = vld [vmem:[%s8081_s11 + $0x18] sm:$0xff] }
 0x455   :  { %v2209_v8 = vmul.f32 %v2176_v39, %v1962_v30  ;;  %v2358_v42 = vsel %vm2345_vm14, %v2287_v44, %v2357_v62  ;;  %v2307_v59 = vrot.slane %v2306_v45, 1  ;;  %v5807_v39 = vpack.c.bf16 %v2488_v26, %v2487_v63  ;;  %v2577_v60 = vld [vmem:[%s8082_s12 + $0x8] sm:$0xff]  ;;  %v5156_v63 = vld [vmem:[%s8079_s9 + $0x38] sm:$0xff] }
 0x456   :  { %v2316_v3 = vsel %vm62_vm0, %v2210_v46, 0.0  ;;  %v2300_v27 = vrot.slane %v2299_v0, 1  ;;  %v2359_v24 = vsel %vm2347_vm13, %v2294_v28, %v2358_v42  ;;  %v7279_v42 = vld [vmem:[%s8083_s13] sm:$0x3f]  ;;  %v5148_v26 = vld [vmem:[%s8078_s8 + $0x28] sm:$0xff] }
 0x457   :  { %v2317_v56 = vrot.slane %v2316_v3, 4  ;;  %v2309_v36 = vsel %vm62_vm0, %v2209_v8, 0.0  ;;  %v2308_v18 = vadd.f32 %v2307_v59, %v2306_v45  ;;  %v2576_v45 = vld [vmem:[%s8082_s12] sm:$0xff]  ;;  %v2476_v59 = vrot.slane %v7279_v42, %v6452_v17 }
 0x458   :  { %v2310_v54 = vrot.slane %v2309_v36, 4  ;;  %v2301_v38 = vadd.f32 %v2300_v27, %v2299_v0  ;;  %v5811_v46 = vpack.c.bf16 %v2577_v60, %v2576_v45  ;;  %v2482_v27 = vrot.slane %v7279_v42, %v6444_v12  ;;  %v6053_v60 = vld [vmem:[%s8077_s7] sm:$0xf] }
 0x459   :  { %v2318_v29 = vadd.f32 %v2317_v56, %v2316_v3 }
 0x45a   :  { %v2311_v37 = vadd.f32 %v2310_v54, %v2309_v36  ;;  %v2360_v50 = vsel %vm2349_vm15, %v2301_v38, %v2359_v24 }
 0x45b   :  { %v2319_v6 = vrot.slane %v2318_v29, 2  ;;  %v2361_v23 = vsel %vm2351_vm11, %v2308_v18, %v2360_v50  ;;  %v2579_v18 = vld [vmem:[%s8082_s12 + $0x18] sm:$0xff] }
 0x45c   :  { %v2312_v61 = vrot.slane %v2311_v37, 2 }
 0x45d   :  { %v2320_v10 = vadd.f32 %v2319_v6, %v2318_v29 }
 0x45e   :  { %v2313_v47 = vadd.f32 %v2312_v61, %v2311_v37  ;;  %v2578_v37 = vld [vmem:[%s8082_s12 + $0x10] sm:$0xff] }
 0x45f   :  { %v2321_v25 = vrot.slane %v2320_v10, 1  ;;  %v5815_v61 = vpack.c.bf16 %v2579_v18, %v2578_v37 }
 0x460   :  { %v2314_v55 = vrot.slane %v2313_v47, 1 }
 0x461   :  { %v2322_v52 = vadd.f32 %v2321_v25, %v2320_v10  ;;  %v2580_v10 = vld [vmem:[%s8082_s12 + $0x20] sm:$0xff]  ;;  %v2582_v25 = vld [vmem:[%s8082_s12 + $0x30] sm:$0xff] }
 0x462   :  { %v2315_v15 = vadd.f32 %v2314_v55, %v2313_v47  ;;  %v2583_v55 = vld [vmem:[%s8082_s12 + $0x38] sm:$0xff] }
 0x464   :  { %v2362_v31 = vsel %vm2353_vm10, %v2315_v15, %v2361_v23  ;;  %v2581_v23 = vld [vmem:[%s8082_s12 + $0x28] sm:$0xff]  ;;  %v5823_v15 = vpack.c.bf16 %v2583_v55, %v2582_v25 }
 0x465   :  { %v2363_v11 = vsel %vm8178_vm9, %v2322_v52, %v2362_v31  ;;  %v5819_v47 = vpack.c.bf16 %v2581_v23, %v2580_v10  ;;  %v2492_v52 = vrot.slane %v7279_v42, %v6462_v22  ;;  %vm2588_vm9 = vcmask 523264  }
 0x466   :  { %5557 = vmatmul.mubr.msk.f32.vlgmr.msra.gmra.mrb[18].mxu1 %vm62_vm0, %v2363_v11 }
 0x539   :  { %v5558_v33 = vpop.f32.mrb[18].mxu1 }
 0x53a   :  { %v2445_v5 = vadd.f32 %v5558_v33, %v6335_v49  ;;  %v2434_v9 = vpop.f32.mrb[19].mxu1 }
 0x53b   :  { %v2444_v4 = vadd.f32 %v2434_v9, %v6333_v48  ;;  %v2485_v48 = vld [vmem:[%s8081_s11] sm:$0xff] }
 0x53c   :  { %v2449_v7 = vsel %vm62_vm0, %v2445_v5, 0.0  ;;  %v5803_v41 = vpack.c.bf16 %v2486_v32, %v2485_v48  ;;  %v5155_v48 = vld [vmem:[%s8079_s9 + $0x30] sm:$0xff] }
 0x53d   :  { %2450 = vadd.xlane.f32.xlu1 %v2449_v7  ;;  %v2446_v19 = vsel %vm62_vm0, %v2444_v4, 0.0  ;;  %v6052_v7 = vld [vmem:[%s8073_s3] sm:$0xff] }
 0x53e   :  { %2447 = vadd.xlane.f32.xlu0 %v2446_v19  ;;  %5804 = vmatprep.subr.bf16.mxu1 %v5803_v41  ;;  %v2587_v19 = vrot.slane %v7279_v42, %v6459_v21 }
 0x53f   :  { %5806 = vmatpush3.bf16.msra.mxu1 %v5803_v41  ;;  %v5147_v41 = vld [vmem:[%s8078_s8 + $0x20] sm:$0xff] }
 0x540   :  { %5808 = vmatprep.subr.bf16.mxu1 %v5807_v39  ;;  %v5827_v45 = vpack.c.bf16 %v5148_v26, %v5147_v41 }
 0x542   :  { %5828 = vmatprep.subr.bf16.mxu0 %v5827_v45 }
 0x543   :  { %5810 = vmatpush3.bf16.msra.mxu1 %v5807_v39  ;;  %v5839_v39 = vpack.c.bf16 %v5156_v63, %v5155_v48  ;;  %5830 = vmatpush3.bf16.msra.mxu0 %v5827_v45  ;;  %v8251_v45 = vld [vmem:[#allocation16_spill] sm:$0xff] }
 0x544   :  { %5812 = vmatprep.subr.bf16.mxu1 %v5811_v46 }
 0x5ca   :  { %v2451_v58 = vpop.xlane.xlu1 %2450 }
 0x5cb   :  { %v2454_v14 = vmul.f32 0.03125, %v2451_v58  ;;  %v2448_v2 = vpop.xlane.xlu0 %2447 }
 0x5cc   :  { %v2453_v34 = vmul.f32 0.03125, %v2448_v2 }
 0x5cd   :  { %v2456_v51 = vsub.f32 %v2445_v5, %v2454_v14 }
 0x5ce   :  { %v2455_v57 = vsub.f32 %v2444_v4, %v2453_v34 }
 0x5cf   :  { %v2458_v16 = vmul.f32 %v2456_v51, %v2456_v51 }
 0x5d0   :  { %v2457_v62 = vmul.f32 %v2455_v57, %v2455_v57 }
 0x5d1   :  { %v2462_v49 = vsel %vm62_vm0, %v2458_v16, 0.0  ;;  %v5153_v16 = vld [vmem:[%s8079_s9 + $0x20] sm:$0xff] }
 0x5d2   :  { %v2459_v43 = vsel %vm62_vm0, %v2457_v62, 0.0 }
 0x5d3   :  { %2460 = vadd.xlane.f32.xlu0 %v2459_v43 }
 0x5d7   :  { %2463 = vadd.xlane.f32.xlu0 %v2462_v49  ;;  %v5154_v49 = vld [vmem:[%s8079_s9 + $0x28] sm:$0xff] }
 0x5d8   :  { %v5835_v32 = vpack.c.bf16 %v5154_v49, %v5153_v16 }
 0x660   :  { %v2461_v30 = vpop.xlane.xlu0 %2460 }
 0x661   :  { %v2465_v44 = vmul.f32 0.03125, %v2461_v30  ;;  %v6055_v30 = vld [vmem:[%s8073_s3 + $0x10] sm:$0xff] }
 0x663   :  { %v2467_v8 = vadd.f32 1e-05, %v2465_v44  ;;  %v6056_v44 = vld [vmem:[%s8073_s3 + $0x18] sm:$0xff] }
 0x664   :  { %v2464_v28 = vpop.xlane.xlu0 %2463 }
 0x665   :  { %5972 = vrsqrt.f32 %v2467_v8  ;;  %v2466_v0 = vmul.f32 0.03125, %v2464_v28  ;;  %v6057_v8 = vld [vmem:[%s8073_s3 + $0x20] sm:$0xff]  ;;  %v6058_v28 = vld [vmem:[%s8073_s3 + $0x28] sm:$0xff] }
 0x667   :  { %v2468_v3 = vadd.f32 1e-05, %v2466_v0  ;;  %v6059_v0 = vld [vmem:[%s8073_s3 + $0x30] sm:$0xff] }
 0x669   :  { %5974 = vrsqrt.f32 %v2468_v3  ;;  %v6060_v3 = vld [vmem:[%s8073_s3 + $0x38] sm:$0xff] }
 0x66f   :  { %v5973_v56 = vpop.eup %5972 }
 0x670   :  { %v2471_v36 = vmul.f32 %v5973_v56, %v2455_v57  ;;  %v6062_v56 = vld [vmem:[%s8073_s3 + $0x48] sm:$0xff] }
 0x672   :  { %v2477_v24 = vmul.f32 %v2476_v59, %v2471_v36  ;;  %v6063_v36 = vld [vmem:[%s8073_s3 + $0x50] sm:$0xff] }
 0x673   :  { %v5975_v54 = vpop.eup %5974 }
 0x674   :  { %v2472_v29 = vmul.f32 %v5975_v54, %v2456_v51  ;;  %v2483_v38 = vadd.f32 %v2482_v27, %v2477_v24  ;;  %v6065_v24 = vld [vmem:[%s8073_s3 + $0x60] sm:$0xff]  ;;  %v6066_v54 = vld [vmem:[%s8073_s3 + $0x68] sm:$0xff] }
 0x676   :  { %v2478_v6 = vmul.f32 %v2476_v59, %v2472_v29  ;;  %5567 = vmatprep.mubr.msk.f32.mxu1 %vm62_vm0, %v2483_v38  ;;  %v6061_v59 = vld [vmem:[%s8073_s3 + $0x40] sm:$0xff]  ;;  %v6067_v29 = vld [vmem:[%s8073_s3 + $0x70] sm:$0xff] }
 0x678   :  { %v2484_v50 = vadd.f32 %v2482_v27, %v2478_v6  ;;  %v6064_v27 = vld [vmem:[%s8073_s3 + $0x58] sm:$0xff] }
 0x67a   :  { %5568 = vmatmul.mubr.msk.f32.vlgmr.msra.gmra.mrb[20].mxu1 %vm62_vm0, %v2484_v50 }
 0x67b   :  { %5814 = vmatpush3.bf16.msra.mxu1 %v5811_v46  ;;  %v6054_v46 = vld [vmem:[%s8073_s3 + $0x8] sm:$0xff] }
 0x67c   :  { %5816 = vmatprep.subr.bf16.mxu1 %v5815_v61 }
 0x67f   :  { %5818 = vmatpush3.bf16.msra.mxu1 %v5815_v61 }
 0x680   :  { %5820 = vmatprep.subr.bf16.mxu1 %v5819_v47 }
 0x683   :  { %5822 = vmatpush3.bf16.msra.mxu1 %v5819_v47 }
 0x684   :  { %5824 = vmatprep.subr.bf16.mxu1 %v5823_v15 }
 0x687   :  { %5826 = vmatpush3.bf16.msra.mxu1 %v5823_v15  ;;  %v5149_v15 = vld [vmem:[%s8078_s8 + $0x30] sm:$0xff] }
 0x688   :  { %5836 = vmatprep.subr.bf16.mxu1 %v5835_v32 }
 0x74d   :  { %v5569_v31 = vpop.f32.mrb[20].mxu1 }
 0x74e   :  { %v2571_v11 = vadd.f32 %v5569_v31, %v2492_v52  ;;  %v2565_v33 = vpop.f32.mrb[21].mxu1 }
 0x74f   :  { %v2566_v5 = vadd.f32 %v2565_v33, %v2492_v52  ;;  %v5150_v52 = vld [vmem:[%s8078_s8 + $0x38] sm:$0xff] }
 0x750   :  { %v2575_v4 = vmax.f32 %v2571_v11, 0.0  ;;  %v5831_v31 = vpack.c.bf16 %v5150_v52, %v5149_v15  ;;  %v8250_v11 = vld [vmem:[#allocation13_spill] sm:$0xff] }
 0x751   :  { %v2574_v9 = vmax.f32 %v2566_v5, 0.0 }
 0x752   :  { %5832 = vmatprep.subr.bf16.mxu0 %v5831_v31 }
 0x753   :  { %5586 = vmatprep.mubr.msk.f32.mxu1 %vm2588_vm9, %v2574_v9  ;;  %5834 = vmatpush3.bf16.msra.mxu0 %v5831_v31 }
 0x754   :  { %5587 = vmatmul.mubr.msk.f32.vlgmr.msra.gmra.mrb[22].mxu1 %vm2588_vm9, %v2575_v4  ;;  %5844 = vmatprep.subr.bf16.mxu0 %v8250_v11 }
 0x755   :  { %5608 = vmatprep.mubr.msk.f32.mxu1 %vm62_vm0, %v6052_v7  ;;  %5838 = vmatpush3.bf16.msra.mxu1 %v5835_v32 }
 0x756   :  { %5840 = vmatprep.subr.bf16.mxu1 %v5839_v39 }
 0x759   :  { %5842 = vmatpush3.bf16.msra.mxu1 %v5839_v39 }
 0x75a   :  { %5664 = vmatprep.subr.msk.mxu1 %vm1822_vm1, %v6053_v60 }
 0x75c   :  { %5609 = vmatmul.mubr.msk.f32.vlgmr.msra.gmra.mrb[24].mxu1 %vm62_vm0, %v6054_v46 }
 0x75d   :  { %5611 = vmatprep.mubr.msk.f32.mxu1 %vm62_vm0, %v6055_v30  ;;  %5665 = vmatpush3.msk.msra.mxu1 %vm1822_vm1, %v6053_v60  ;;  %v2701_v60 = vrot.slane %v7279_v42, %v8251_v45 }
 0x760   :  { %5612 = vmatmul.mubr.msk.f32.gmra.mrb[26].mxu1 %vm62_vm0, %v6056_v44 }
 0x761   :  { %5614 = vmatprep.mubr.msk.f32.mxu1 %vm62_vm0, %v6057_v8 }
 0x764   :  { %5615 = vmatmul.mubr.msk.f32.gmra.mrb[28].mxu1 %vm62_vm0, %v6058_v28  ;;  %v8252_v28 = vld [vmem:[#allocation15_spill] sm:$0xff] }
 0x765   :  { %5617 = vmatprep.mubr.msk.f32.mxu1 %vm62_vm0, %v6059_v0  ;;  %v2707_v0 = vrot.slane %v7279_v42, %v8252_v28 }
 0x768   :  { %5618 = vmatmul.mubr.msk.f32.gmra.mrb[30].mxu1 %vm62_vm0, %v6060_v3 }
 0x769   :  { %5620 = vmatprep.mubr.msk.f32.mxu1 %vm62_vm0, %v6061_v59 }
 0x76c   :  { %5621 = vmatmul.mubr.msk.f32.gmra.mrb[32].mxu1 %vm62_vm0, %v6062_v56 }
 0x76d   :  { %5623 = vmatprep.mubr.msk.f32.mxu1 %vm62_vm0, %v6063_v36 }
 0x770   :  { %5624 = vmatmul.mubr.msk.f32.gmra.mrb[34].mxu1 %vm62_vm0, %v6064_v27  ;;  %v8253_v27 = vld [vmem:[#allocation14_spill] sm:$0xff] }
 0x771   :  { %5626 = vmatprep.mubr.msk.f32.mxu1 %vm62_vm0, %v6065_v24 }
 0x774   :  { %5627 = vmatmul.mubr.msk.f32.gmra.mrb[36].mxu1 %vm62_vm0, %v6066_v54 }
 0x775   :  { %5629 = vmatprep.mubr.msk.f32.mxu1 %vm62_vm0, %v6067_v29 }
 0x827   :  { %v5588_v58 = vpop.f32.mrb[22].mxu1 }
 0x828   :  { %v2667_v14 = vadd.f32 %v5588_v58, %v2587_v19  ;;  %v2661_v2 = vpop.f32.mrb[23].mxu1 }
 0x829   :  { %v2662_v34 = vadd.f32 %v2661_v2, %v2587_v19 }
 0x82a   :  { %v2671_v51 = vadd.f32 %v2667_v14, %v2484_v50 }
 0x82b   :  { %v2670_v57 = vadd.f32 %v2662_v34, %v2483_v38  ;;  %v6068_v38 = vld [vmem:[%s8073_s3 + $0x78] sm:$0xff] }
 0x82c   :  { %v2675_v62 = vsel %vm62_vm0, %v2671_v51, 0.0  ;;  %5630 = vmatmul.mubr.msk.f32.gmra.mrb[38].mxu1 %vm62_vm0, %v6068_v38 }
 0x82d   :  { %2676 = vadd.xlane.f32.xlu0 %v2675_v62  ;;  %v2672_v43 = vsel %vm62_vm0, %v2670_v57, 0.0 }
 0x82e   :  { %2673 = vadd.xlane.f32.xlu1 %v2672_v43 }
 0x82f   :  { %v5610_v33 = vpop.f32.mrb[24].mxu1 }
 0x830   :  { %v2867_v5 = vpop.f32.mrb[25].mxu1 }
 0x833   :  { %v5613_v9 = vpop.f32.mrb[26].mxu1 }
 0x834   :  { %v2877_v4 = vpop.f32.mrb[27].mxu1 }
 0x837   :  { %v5616_v7 = vpop.f32.mrb[28].mxu1 }
 0x838   :  { %v2887_v19 = vpop.f32.mrb[29].mxu1 }
 0x83b   :  { %v5619_v58 = vpop.f32.mrb[30].mxu1 }
 0x83c   :  { %v2897_v14 = vpop.f32.mrb[31].mxu1 }
 0x83f   :  { %v5622_v2 = vpop.f32.mrb[32].mxu1 }
 0x840   :  { %v2907_v34 = vpop.f32.mrb[33].mxu1 }
 0x8ba   :  { %v2677_v37 = vpop.xlane.xlu0 %2676 }
 0x8bb   :  { %v2679_v18 = vmul.f32 0.03125, %v2677_v37  ;;  %v2674_v6 = vpop.xlane.xlu1 %2673 }
 0x8bc   :  { %v2678_v50 = vmul.f32 0.03125, %v2674_v6 }
 0x8bd   :  { %v2681_v61 = vsub.f32 %v2671_v51, %v2679_v18  ;;  %v5625_v51 = vpop.f32.mrb[34].mxu1 }
 0x8be   :  { %v2680_v10 = vsub.f32 %v2670_v57, %v2678_v50  ;;  %v2917_v57 = vpop.f32.mrb[35].mxu1 }
 0x8bf   :  { %v2683_v23 = vmul.f32 %v2681_v61, %v2681_v61  ;;  %v5628_v62 = vpop.f32.mrb[36].mxu1 }
 0x8c0   :  { %v2682_v47 = vmul.f32 %v2680_v10, %v2680_v10  ;;  %v2927_v43 = vpop.f32.mrb[37].mxu1 }
 0x8c1   :  { %v2687_v25 = vsel %vm62_vm0, %v2683_v23, 0.0 }
 0x8c2   :  { %2688 = vadd.xlane.f32.xlu0 %v2687_v25  ;;  %v2684_v55 = vsel %vm62_vm0, %v2682_v47, 0.0  ;;  %v8254_v47 = vld [vmem:[#allocation7_spill] sm:$0xff] }
 0x8c3   :  { %2685 = vadd.xlane.f32.xlu1 %v2684_v55  ;;  %v8255_v55 = vld [vmem:[#allocation5_spill] sm:$0xff] }
 0x8d4   :  { %2962 = vrot.lane.b32.xlu1 %v2867_v5, %s6093_s22  ;;  %v8256_v5 = vld [vmem:[#allocation6_spill] sm:$0xff] }
 0x8d8   :  { %2964 = vrot.lane.b32.xlu0 %v5610_v33, %s6093_s22  ;;  %2966 = vrot.lane.b32.xlu1 %v2877_v4, %s6093_s22  ;;  %v8257_v4 = vld [vmem:[#allocation9_spill] sm:$0xff] }
 0x8dc   :  { %2968 = vrot.lane.b32.xlu1 %v5613_v9, %s6093_s22  ;;  %2970 = vrot.lane.b32.xlu0 %v2887_v19, %s6093_s22 }
 0x8e0   :  { %2972 = vrot.lane.b32.xlu1 %v5616_v7, %s6093_s22  ;;  %2974 = vrot.lane.b32.xlu0 %v2897_v14, %s6093_s22  ;;  %v8258_v14 = vld [vmem:[#allocation8_spill] sm:$0xff] }
 0x8e4   :  { %2976 = vrot.lane.b32.xlu1 %v5619_v58, %s6093_s22  ;;  %2978 = vrot.lane.b32.xlu0 %v2907_v34, %s6093_s22  ;;  %v8259_v34 = vld [vmem:[#allocation11_spill] sm:$0xff] }
 0x8e8   :  { %2980 = vrot.lane.b32.xlu1 %v5622_v2, %s6093_s22  ;;  %2982 = vrot.lane.b32.xlu0 %v2917_v57, %s6093_s22 }
 0x8ec   :  { %2984 = vrot.lane.b32.xlu1 %v5625_v51, %s6093_s22  ;;  %2986 = vrot.lane.b32.xlu0 %v2927_v43, %s6093_s22 }
 0x8f0   :  { %2988 = vrot.lane.b32.xlu1 %v5628_v62, %s6093_s22 }
 0x8ff   :  { %v5631_v16 = vpop.f32.mrb[38].mxu1 }
 0x900   :  { %v2937_v49 = vpop.f32.mrb[39].mxu1  ;;  %2992 = vrot.lane.b32.xlu1 %v5631_v16, %s6093_s22 }
 0x901   :  { %2990 = vrot.lane.b32.xlu0 %v2937_v49, %s6093_s22  ;;  %v8260_v49 = vld [vmem:[#allocation10_spill] sm:$0xff]  ;;  %s6099_s22 = smov [#allocation2]  }
 0x94f   :  { %v2689_v48 = vpop.xlane.xlu0 %2688 }
 0x950   :  { %v2691_v32 = vmul.f32 0.03125, %v2689_v48  ;;  %v2686_v63 = vpop.xlane.xlu1 %2685 }
 0x951   :  { %v2690_v41 = vmul.f32 0.03125, %v2686_v63 }
 0x952   :  { %v2693_v26 = vadd.f32 1e-05, %v2691_v32  ;;  %v8261_v32 = vld [vmem:[#allocation12_spill] sm:$0xff] }
 0x953   :  { %v2692_v39 = vadd.f32 1e-05, %v2690_v41  ;;  %v2965_v54 = vpop.permute.xlu0 %2964 }
 0x954   :  { %5976 = vrsqrt.f32 %v2693_v26  ;;  %v2963_v24 = vpop.permute.xlu1 %2962 }
 0x955   :  { %5978 = vrsqrt.f32 %v2692_v39 }
 0x957   :  { %v2971_v38 = vpop.permute.xlu0 %2970 }
 0x958   :  { %v2967_v42 = vpop.permute.xlu1 %2966 }
 0x95b   :  { %v2975_v18 = vpop.permute.xlu0 %2974 }
 0x95c   :  { %v2969_v29 = vpop.permute.xlu1 %2968 }
 0x95e   :  { %v5977_v46 = vpop.eup %5976 }
 0x95f   :  { %v5979_v30 = vpop.eup %5978  ;;  %v2697_v44 = vmul.f32 %v5977_v46, %v2681_v61 }
 0x960   :  { %v2696_v8 = vmul.f32 %v5979_v30, %v2680_v10  ;;  %v2973_v37 = vpop.permute.xlu1 %2972 }
 0x961   :  { %v2703_v3 = vmul.f32 %v2701_v60, %v2697_v44 }
 0x962   :  { %v2702_v59 = vmul.f32 %v2701_v60, %v2696_v8 }
 0x963   :  { %v7431_v36 = vadd.f32 %v2707_v0, %v2703_v3 }
 0x964   :  { %v7429_v56 = vadd.f32 %v2707_v0, %v2702_v59  ;;  %v2977_v50 = vpop.permute.xlu1 %2976 }
 0x966   :  { %5597 = vmatprep.mubr.msk.f32.mxu0 %vm62_vm0, %v7429_v56 }
 0x967   :  { %5598 = vmatmul.mubr.msk.f32.vlgmr.msra.gmra.mrb[34].mxu0 %vm62_vm0, %v7431_v36 }
 0x968   :  { %5846 = vmatpush3.bf16.msra.mxu0 %v8250_v11  ;;  %v2979_v11 = vpop.permute.xlu0 %2978  ;;  %v2981_v33 = vpop.permute.xlu1 %2980 }
 0x969   :  { %5848 = vmatprep.subr.bf16.mxu0 %v8253_v27 }
 0x96c   :  { %5850 = vmatpush3.bf16.msra.mxu0 %v8253_v27  ;;  %v2983_v43 = vpop.permute.xlu0 %2982  ;;  %v2985_v16 = vpop.permute.xlu1 %2984 }
 0x970   :  { %v2987_v39 = vpop.permute.xlu0 %2986  ;;  %v2989_v60 = vpop.permute.xlu1 %2988 }
 0xa3a   :  { %v7440_v6 = vpop.f32.mrb[34].mxu0 }
 0xa3b   :  { %v7442_v61 = vpop.f32.mrb[35].mxu0  ;;  %v3018_v41 = vadd.f32 %v7440_v6, %v2979_v11  ;;  %v3019_v26 = vadd.f32 %v7440_v6, %v2981_v33  ;;  %v3020_v44 = vadd.f32 %v7440_v6, %v2983_v43  ;;  %v3021_v8 = vadd.f32 %v7440_v6, %v2985_v16  ;;  %v8266_v11 = vld [vmem:[#allocation37_spill] sm:$0xff]  ;;  %v8273_v43 = vld [vmem:[#allocation44_spill] sm:$0xff] }
 0xa3c   :  { %v3011_v10 = vadd.f32 %v2965_v54, %v7442_v61  ;;  %v3010_v23 = vadd.f32 %v2963_v24, %v7442_v61  ;;  %v3012_v52 = vadd.f32 %v2967_v42, %v7442_v61  ;;  %v3013_v31 = vadd.f32 %v2969_v29, %v7442_v61  ;;  %v2991_v24 = vpop.permute.xlu0 %2990  ;;  %v2993_v42 = vpop.permute.xlu1 %2992 }
 0xa3d   :  { %v3014_v19 = vadd.f32 %v2971_v38, %v7442_v61  ;;  %v3015_v58 = vadd.f32 %v2973_v37, %v7442_v61  ;;  %v3016_v57 = vadd.f32 %v2975_v18, %v7442_v61  ;;  %v3017_v62 = vadd.f32 %v2977_v50, %v7442_v61 }
 0xa3e   :  { %v3027_v25 = vadd.f32 %v3011_v10, %v8254_v47  ;;  %v3026_v15 = vadd.f32 %v3010_v23, %v8255_v55  ;;  %v3028_v9 = vadd.f32 %v3012_v52, %v8256_v5  ;;  %v3029_v7 = vadd.f32 %v3013_v31, %v8257_v4  ;;  %v8262_v10 = vld [vmem:[#allocation34_spill] sm:$0xff]  ;;  %v8265_v52 = vld [vmem:[#allocation36_spill] sm:$0xff] }
 0xa3f   :  { %v3030_v2 = vadd.f32 %v3014_v19, %v8258_v14  ;;  %v3031_v51 = vadd.f32 %v3015_v58, %v8259_v34  ;;  %v3032_v48 = vadd.f32 %v3016_v57, %v8260_v49  ;;  %v3033_v63 = vadd.f32 %v3017_v62, %v8261_v32  ;;  %v8269_v19 = vld [vmem:[#allocation40_spill] sm:$0xff]  ;;  %v8272_v57 = vld [vmem:[#allocation43_spill] sm:$0xff] }
 0xa40   :  { %3240 = vrot.lane.b32.xlu1 %v3027_v25, %s6094_s6  ;;  %3238 = vrot.lane.b32.xlu0 %v3026_v15, %s6094_s6  ;;  %v3034_v46 = vadd.f32 %v3018_v41, %v8255_v55  ;;  %v3035_v30 = vadd.f32 %v3019_v26, %v8254_v47  ;;  %v3036_v0 = vadd.f32 %v3020_v44, %v8256_v5  ;;  %v8263_v47 = vld [vmem:[#allocation33_spill] sm:$0xff]  ;;  %v8264_v55 = vld [vmem:[#allocation35_spill] sm:$0xff]  ;;  %v8267_v5 = vld [vmem:[#allocation38_spill] sm:$0xff] }
 0xa41   :  { %v3037_v3 = vadd.f32 %v3021_v8, %v8257_v4  ;;  %v3022_v59 = vadd.f32 %v7440_v6, %v2987_v39  ;;  %v3023_v27 = vadd.f32 %v7440_v6, %v2989_v60  ;;  %v3025_v54 = vadd.f32 %v7440_v6, %v2993_v42  ;;  %v8268_v4 = vld [vmem:[#allocation39_spill] sm:$0xff]  ;;  %v8277_v39 = vld [vmem:[#allocation48_spill] sm:$0xff] }
 0xa42   :  { %v3024_v37 = vadd.f32 %v7440_v6, %v2991_v24  ;;  %v4040_v23 = vmul.f32 %v7442_v61, %v8262_v10  ;;  %v4041_v25 = vmul.f32 %v7442_v61, %v8263_v47  ;;  %v4042_v15 = vmul.f32 %v7442_v61, %v8264_v55  ;;  %v8276_v41 = vld [vmem:[#allocation47_spill] sm:$0xff] }
 0xa43   :  { %v3038_v29 = vadd.f32 %v3022_v59, %v8258_v14  ;;  %v3039_v38 = vadd.f32 %v3023_v27, %v8259_v34  ;;  %v3041_v18 = vadd.f32 %v3025_v54, %v8261_v32  ;;  %v4048_v31 = vmul.f32 %v7440_v6, %v8265_v52  ;;  %v8270_v14 = vld [vmem:[#allocation41_spill] sm:$0xff]  ;;  %v8271_v34 = vld [vmem:[#allocation42_spill] sm:$0xff] }
 0xa44   :  { %3242 = vrot.lane.b32.xlu0 %v3028_v9, %s6094_s6  ;;  %3244 = vrot.lane.b32.xlu1 %v3029_v7, %s6094_s6  ;;  %v3040_v50 = vadd.f32 %v3024_v37, %v8260_v49  ;;  %v4049_v33 = vmul.f32 %v7440_v6, %v8266_v11  ;;  %v4043_v9 = vmul.f32 %v7442_v61, %v8267_v5  ;;  %v8274_v49 = vld [vmem:[#allocation45_spill] sm:$0xff]  ;;  %v8275_v32 = vld [vmem:[#allocation46_spill] sm:$0xff] }
 0xa45   :  { %v4050_v7 = vmul.f32 %v7440_v6, %v8268_v4  ;;  %v4044_v58 = vmul.f32 %v7442_v61, %v8269_v19  ;;  %v4052_v62 = vmul.f32 %v7440_v6, %v8272_v57  ;;  %v4046_v16 = vmul.f32 %v7442_v61, %v8273_v43 }
 0xa46   :  { %v4054_v26 = vmul.f32 %v7440_v6, %v8276_v41  ;;  %v4055_v60 = vmul.f32 %v7440_v6, %v8277_v39  ;;  %v3044_v8 = vcombine.high %v7442_v61, %v7442_v61  ;;  %v3093_v5 = vcombine.high %v7440_v6, %v7440_v6 }
 0xa48   :  { %3246 = vrot.lane.b32.xlu0 %v3030_v2, %s6094_s6  ;;  %3248 = vrot.lane.b32.xlu1 %v3031_v51, %s6094_s6  ;;  %v4051_v2 = vmul.f32 %v7440_v6, %v8270_v14  ;;  %v4045_v51 = vmul.f32 %v7442_v61, %v8271_v34 }
 0xa4c   :  { %3250 = vrot.lane.b32.xlu0 %v3032_v48, %s6094_s6  ;;  %3252 = vrot.lane.b32.xlu1 %v3033_v63, %s6094_s6  ;;  %v4053_v48 = vmul.f32 %v7440_v6, %v8274_v49  ;;  %v4047_v63 = vmul.f32 %v7442_v61, %v8275_v32 }
 0xa50   :  { %3254 = vrot.lane.b32.xlu0 %v3034_v46, %s6094_s6  ;;  %3256 = vrot.lane.b32.xlu1 %v3035_v30, %s6094_s6  ;;  %v8278_v46 = vld [vmem:[#allocation17_spill] sm:$0xff] }
 0xa51   :  { %v3051_v30 = vrot.slane %v7442_v61, %v8278_v46  ;;  %v3058_v59 = vrot.slane %v3044_v8, %v8278_v46  ;;  %v3100_v10 = vrot.slane %v7440_v6, %v8278_v46 }
 0xa53   :  { %v3059_v44 = vcombine.high %v3051_v30, %v3051_v30 }
 0xa54   :  { %3258 = vrot.lane.b32.xlu0 %v3036_v0, %s6094_s6  ;;  %3260 = vrot.lane.b32.xlu1 %v3037_v3, %s6094_s6  ;;  %v3067_v0 = vrot.slane %v3051_v30, %v8278_v46 }
 0xa55   :  { %v3081_v3 = vrot.slane %v3059_v44, %v8278_v46 }
 0xa56   :  { %v3145_v27 = vrot.slane %v3067_v0, %v6452_v17  ;;  %v3089_v42 = vcombine.high %v3067_v0, %v3067_v0 }
 0xa57   :  { %v3149_v24 = vrot.slane %v3081_v3, %v6452_v17  ;;  %v3091_v54 = vcombine.high %v3081_v3, %v3081_v3 }
 0xa58   :  { %3262 = vrot.lane.b32.xlu0 %v3038_v29, %s6094_s6  ;;  %3264 = vrot.lane.b32.xlu1 %v3039_v38, %s6094_s6  ;;  %v3060_v29 = vcombine.high %v3058_v59, %v3058_v59 }
 0xa59   :  { %v3157_v47 = vrot.slane %v3091_v54, %v6452_v17 }
 0xa5a   :  { %v3088_v55 = vrot.slane %v3060_v29, %v8278_v46 }
 0xa5c   :  { %3266 = vrot.lane.b32.xlu0 %v3040_v50, %s6094_s6  ;;  %3268 = vrot.lane.b32.xlu1 %v3041_v18, %s6094_s6  ;;  %v3165_v4 = vrot.slane %v3088_v55, %v6452_v17  ;;  %v3092_v19 = vcombine.high %v3088_v55, %v3088_v55 }
 0xa60   :  { %4072 = vrot.lane.b32.xlu0 %v4040_v23, %s6094_s6  ;;  %4074 = vrot.lane.b32.xlu1 %v4041_v25, %s6094_s6  ;;  %v3153_v23 = vrot.slane %v3089_v42, %v6452_v17  ;;  %v3074_v25 = vrot.slane %v3058_v59, %v8278_v46 }
 0xa64   :  { %4076 = vrot.lane.b32.xlu0 %v4042_v15, %s6094_s6  ;;  %4088 = vrot.lane.b32.xlu1 %v4048_v31, %s6094_s6 }
 0xa68   :  { %4090 = vrot.lane.b32.xlu0 %v4049_v33, %s6094_s6  ;;  %4078 = vrot.lane.b32.xlu1 %v4043_v9, %s6094_s6  ;;  %v3108_v33 = vcombine.high %v3100_v10, %v3100_v10  ;;  %v3161_v9 = vrot.slane %v3074_v25, %v6452_v17 }
 0xa6a   :  { %v3130_v43 = vrot.slane %v3108_v33, %v8278_v46 }
 0xa6c   :  { %4092 = vrot.lane.b32.xlu0 %v4050_v7, %s6094_s6  ;;  %4080 = vrot.lane.b32.xlu1 %v4044_v58, %s6094_s6  ;;  %v3090_v7 = vcombine.high %v3074_v25, %v3074_v25 }
 0xa6e   :  { %v3169_v57 = vrot.slane %v3090_v7, %v6452_v17  ;;  %v8279_v7 = vld [vmem:[#allocation52_spill] sm:$0xff] }
 0xa70   :  { %4094 = vrot.lane.b32.xlu0 %v4051_v2, %s6094_s6  ;;  %4082 = vrot.lane.b32.xlu1 %v4045_v51, %s6094_s6  ;;  %v3116_v51 = vrot.slane %v3100_v10, %v8278_v46 }
 0xa72   :  { %v3177_v41 = vrot.slane %v3116_v51, %v6452_v17  ;;  %v3138_v39 = vcombine.high %v3116_v51, %v3116_v51 }
 0xa74   :  { %4096 = vrot.lane.b32.xlu0 %v4052_v62, %s6094_s6  ;;  %4084 = vrot.lane.b32.xlu1 %v4046_v16, %s6094_s6  ;;  %v3173_v62 = vrot.slane %v3092_v19, %v6452_v17  ;;  %v3107_v16 = vrot.slane %v3093_v5, %v8278_v46  ;;  %v3185_v59 = vrot.slane %v3138_v39, %v6452_v17  ;;  %v8284_v39 = vld [vmem:[#allocation61_spill] sm:$0xff] }
 0xa75   :  { %v4032_v19 = vmul.f32 %v7440_v6, %v8279_v7  ;;  %v8292_v7 = vld [vmem:[#allocation49_spill] sm:$0xff] }
 0xa76   :  { %v3109_v30 = vcombine.high %v3107_v16, %v3107_v16 }
 0xa78   :  { %4098 = vrot.lane.b32.xlu0 %v4053_v48, %s6094_s6  ;;  %4086 = vrot.lane.b32.xlu1 %v4047_v63, %s6094_s6  ;;  %v3137_v42 = vrot.slane %v3109_v30, %v8278_v46 }
 0xa7c   :  { %4100 = vrot.lane.b32.xlu0 %v4054_v26, %s6094_s6  ;;  %4102 = vrot.lane.b32.xlu1 %v4055_v60, %s6094_s6  ;;  %v3181_v26 = vrot.slane %v3130_v43, %v6452_v17  ;;  %v3140_v60 = vcombine.high %v3130_v43, %v3130_v43  ;;  %s5065_s6 = sshll.u32 %s6099_s22, 4  ;;  %s5066_s6 = int_to_ptr.vmem [resolvable:$true] %s5065_s6 }
 0xa7d   :  { %p6074_p1 = scmp.lt.s32.totalorder %s5066_s6, %s5066_s6 }
 0xab2   :  { %v3239_v38 = vpop.permute.xlu0 %3238  ;;  %v3241_v37 = vpop.permute.xlu1 %3240 }
 0xab3   :  { %v3286_v18 = vmul.f32 %v3239_v38, %v3145_v27  ;;  %v3287_v50 = vmul.f32 %v3241_v37, %v3149_v24  ;;  %v3189_v27 = vrot.slane %v3140_v60, %v6452_v17  ;;  %v3123_v24 = vrot.slane %v3107_v16, %v8278_v46  ;;  %v8282_v16 = vld [vmem:[#allocation53_spill] sm:$0xff] }
 0xab5   :  { %5640 = vmatprep.mubr.msk.f32.mxu0 %vm62_vm0, %v3286_v18  ;;  %v3193_v18 = vrot.slane %v3123_v24, %v6452_v17  ;;  %v3139_v10 = vcombine.high %v3123_v24, %v3123_v24  ;;  %v8286_v24 = vld [vmem:[#allocation56_spill] sm:$0xff] }
 0xab6   :  { %v3243_v15 = vpop.permute.xlu0 %3242  ;;  %5641 = vmatmul.mubr.msk.f32.vlgmr.msra.gmra.mrb[36].mxu0 %vm62_vm0, %v3287_v50  ;;  %v3245_v52 = vpop.permute.xlu1 %3244  ;;  %v3197_v50 = vrot.slane %v3137_v42, %v6452_v17 }
 0xab7   :  { %v3288_v31 = vmul.f32 %v3243_v15, %v3153_v23  ;;  %v3289_v11 = vmul.f32 %v3245_v52, %v3157_v47  ;;  %v3141_v23 = vcombine.high %v3137_v42, %v3137_v42  ;;  %v3201_v15 = vrot.slane %v3139_v10, %v6452_v17 }
 0xab8   :  { %v4028_v42 = vmul.f32 %v7442_v61, %v8286_v24 }
 0xab9   :  { %5643 = vmatprep.mubr.msk.f32.mxu0 %vm62_vm0, %v3288_v31  ;;  %v3205_v52 = vrot.slane %v3141_v23, %v6452_v17 }
 0xaba   :  { %v3247_v58 = vpop.permute.xlu0 %3246  ;;  %5644 = vmatmul.mubr.msk.f32.gmra.mrb[38].mxu0 %vm62_vm0, %v3289_v11  ;;  %v3249_v14 = vpop.permute.xlu1 %3248 }
 0xabb   :  { %v3290_v2 = vmul.f32 %v3247_v58, %v3161_v9  ;;  %v3291_v34 = vmul.f32 %v3249_v14, %v3165_v4 }
 0xabd   :  { %5646 = vmatprep.mubr.msk.f32.mxu0 %vm62_vm0, %v3290_v2  ;;  %v8280_v2 = vld [vmem:[#allocation50_spill] sm:$0xff] }
 0xabe   :  { %v3251_v49 = vpop.permute.xlu0 %3250  ;;  %5647 = vmatmul.mubr.msk.f32.gmra.mrb[40].mxu0 %vm62_vm0, %v3291_v34  ;;  %v3253_v48 = vpop.permute.xlu1 %3252  ;;  %v4025_v34 = vmul.f32 %v7442_v61, %v8280_v2  ;;  %v8293_v2 = vld [vmem:[#allocation62_spill] sm:$0xff] }
 0xabf   :  { %v3292_v32 = vmul.f32 %v3251_v49, %v3169_v57  ;;  %v3293_v63 = vmul.f32 %v3253_v48, %v3173_v62  ;;  %v8281_v62 = vld [vmem:[#allocation60_spill] sm:$0xff]  ;;  %v4033_v49 = vmul.f32 %v7440_v6, %v8282_v16 }
 0xac1   :  { %5649 = vmatprep.mubr.msk.f32.mxu0 %vm62_vm0, %v3292_v32 }
 0xac2   :  { %v3255_v44 = vpop.permute.xlu0 %3254  ;;  %5650 = vmatmul.mubr.msk.f32.gmra.mrb[42].mxu0 %vm62_vm0, %v3293_v63  ;;  %v3257_v8 = vpop.permute.xlu1 %3256 }
 0xac3   :  { %v3294_v0 = vmul.f32 %v3255_v44, %v3177_v41  ;;  %v3295_v3 = vmul.f32 %v3257_v8, %v3181_v26  ;;  %v8283_v41 = vld [vmem:[#allocation54_spill] sm:$0xff]  ;;  %v8285_v8 = vld [vmem:[#allocation55_spill] sm:$0xff] }
 0xac4   :  { %v4027_v26 = vmul.f32 %v7442_v61, %v8283_v41 }
 0xac5   :  { %5652 = vmatprep.mubr.msk.f32.mxu0 %vm62_vm0, %v3294_v0  ;;  %v4034_v0 = vmul.f32 %v7440_v6, %v8285_v8 }
 0xac6   :  { %v3259_v54 = vpop.permute.xlu0 %3258  ;;  %5653 = vmatmul.mubr.msk.f32.gmra.mrb[44].mxu0 %vm62_vm0, %v3295_v3  ;;  %v3261_v29 = vpop.permute.xlu1 %3260 }
 0xac7   :  { %v3296_v38 = vmul.f32 %v3259_v54, %v3185_v59  ;;  %v3297_v37 = vmul.f32 %v3261_v29, %v3189_v27  ;;  %v8287_v54 = vld [vmem:[#allocation66_spill] sm:$0xff] }
 0xac9   :  { %5655 = vmatprep.mubr.msk.f32.mxu0 %vm62_vm0, %v3296_v38  ;;  %v8288_v38 = vld [vmem:[#allocation64_spill] sm:$0xff] }
 0xaca   :  { %v3263_v47 = vpop.permute.xlu0 %3262  ;;  %5656 = vmatmul.mubr.msk.f32.gmra.mrb[46].mxu0 %vm62_vm0, %v3297_v37  ;;  %v3265_v25 = vpop.permute.xlu1 %3264 }
 0xacb   :  { %v3298_v55 = vmul.f32 %v3263_v47, %v3193_v18  ;;  %v3299_v46 = vmul.f32 %v3265_v25, %v3197_v50  ;;  %v8289_v50 = vld [vmem:[#allocation57_spill] sm:$0xff] }
 0xacc   :  { %v4035_v10 = vmul.f32 %v7440_v6, %v8289_v50 }
 0xacd   :  { %5658 = vmatprep.mubr.msk.f32.mxu0 %vm62_vm0, %v3298_v55  ;;  %v8290_v55 = vld [vmem:[#allocation58_spill] sm:$0xff] }
 0xace   :  { %v3267_v31 = vpop.permute.xlu0 %3266  ;;  %5659 = vmatmul.mubr.msk.f32.gmra.mrb[48].mxu0 %vm62_vm0, %v3299_v46  ;;  %v3269_v11 = vpop.permute.xlu1 %3268  ;;  %v4029_v46 = vmul.f32 %v7442_v61, %v8290_v55 }
 0xacf   :  { %v3300_v33 = vmul.f32 %v3267_v31, %v3201_v15  ;;  %v3301_v5 = vmul.f32 %v3269_v11, %v3205_v52  ;;  %v8291_v11 = vld [vmem:[#allocation59_spill] sm:$0xff] }
 0xad1   :  { %5661 = vmatprep.mubr.msk.f32.mxu0 %vm62_vm0, %v3300_v33  ;;  %v4036_v33 = vmul.f32 %v7440_v6, %v8291_v11 }
 0xad2   :  { %v4073_v9 = vpop.permute.xlu0 %4072  ;;  %5662 = vmatmul.mubr.msk.f32.gmra.mrb[50].mxu0 %vm62_vm0, %v3301_v5  ;;  %v4075_v4 = vpop.permute.xlu1 %4074 }
 0xad3   :  { %v4121_v57 = vadd.f32 %v4075_v4, %v4025_v34  ;;  %v4030_v34 = vmul.f32 %v7442_v61, %v8293_v2 }
 0xad5   :  { %v4137_v60 = vadd.f32 %v4121_v57, %v8284_v39 }
 0xad6   :  { %v4077_v58 = vpop.permute.xlu0 %4076  ;;  %v4089_v14 = vpop.permute.xlu1 %4088 }
 0xad7   :  { %v4128_v51 = vadd.f32 %v4089_v14, %v4032_v19  ;;  %v4024_v19 = vmul.f32 %v7442_v61, %v8292_v7  ;;  %v8306_v7 = vld [vmem:[#allocation25_spill] sm:$0xff] }
 0xad9   :  { %v4144_v43 = vadd.f32 %v4128_v51, %v8281_v62  ;;  %v4120_v51 = vadd.f32 %v4073_v9, %v4024_v19 }
 0xada   :  { %v4091_v48 = vpop.permute.xlu0 %4090  ;;  %v4079_v32 = vpop.permute.xlu1 %4078 }
 0xadb   :  { %v4129_v63 = vadd.f32 %v4091_v48, %v4033_v49  ;;  %4184 = vrot.lane.b32.xlu1 %v4144_v43, %s6096_s29  ;;  %v4123_v44 = vadd.f32 %v4079_v32, %v4027_v26  ;;  %v8294_v48 = vld [vmem:[#allocation51_spill] sm:$0xff] }
 0xadc   :  { %v4026_v32 = vmul.f32 %v7442_v61, %v8294_v48 }
 0xadd   :  { %v4145_v30 = vadd.f32 %v4129_v63, %v8284_v39  ;;  %v4139_v29 = vadd.f32 %v4123_v44, %v8287_v54  ;;  %v8295_v63 = vld [vmem:[#allocation65_spill] sm:$0xff]  ;;  %v4136_v39 = vadd.f32 %v4120_v51, %v8281_v62  ;;  %v8296_v44 = vld [vmem:[#allocation63_spill] sm:$0xff] }
 0xade   :  { %v4093_v3 = vpop.permute.xlu0 %4092  ;;  %v4081_v59 = vpop.permute.xlu1 %4080  ;;  %v4031_v41 = vmul.f32 %v7442_v61, %v8295_v63  ;;  %v4122_v9 = vadd.f32 %v4077_v58, %v4026_v32  ;;  %v4037_v8 = vmul.f32 %v7440_v6, %v8296_v44 }
 0xadf   :  { %v4130_v27 = vadd.f32 %v4093_v3, %v4034_v0  ;;  %4186 = vrot.lane.b32.xlu0 %v4145_v30, %s6096_s29  ;;  %4170 = vrot.lane.b32.xlu1 %v4137_v60, %s6096_s29  ;;  %v4124_v18 = vadd.f32 %v4081_v59, %v4028_v42  ;;  %v4039_v0 = vmul.f32 %v7440_v6, %v6939_v20 }
 0xae0   :  { %v4138_v61 = vadd.f32 %v4122_v9, %v8288_v38 }
 0xae1   :  { %v4146_v37 = vadd.f32 %v4130_v27, %v8288_v38  ;;  %v4140_v15 = vadd.f32 %v4124_v18, %v7003_v35  ;;  %v8297_v27 = vld [vmem:[#allocation67_spill] sm:$0xff] }
 0xae2   :  { %v4095_v23 = vpop.permute.xlu0 %4094  ;;  %v4083_v47 = vpop.permute.xlu1 %4082  ;;  %v4038_v24 = vmul.f32 %v7440_v6, %v8297_v27 }
 0xae3   :  { %v4131_v25 = vadd.f32 %v4095_v23, %v4035_v10  ;;  %4188 = vrot.lane.b32.xlu0 %v4146_v37, %s6096_s29  ;;  %4174 = vrot.lane.b32.xlu1 %v4139_v29, %s6096_s29  ;;  %v4125_v31 = vadd.f32 %v4083_v47, %v4029_v46 }
 0xae5   :  { %v4147_v52 = vadd.f32 %v4131_v25, %v8287_v54  ;;  %v4141_v57 = vadd.f32 %v4125_v31, %v7040_v13 }
 0xae6   :  { %v4097_v5 = vpop.permute.xlu0 %4096  ;;  %v4085_v4 = vpop.permute.xlu1 %4084 }
 0xae7   :  { %v4132_v14 = vadd.f32 %v4097_v5, %v4036_v33  ;;  %4190 = vrot.lane.b32.xlu0 %v4147_v52, %s6096_s29  ;;  %4176 = vrot.lane.b32.xlu1 %v4140_v15, %s6096_s29  ;;  %v4126_v16 = vadd.f32 %v4085_v4, %v4030_v34 }
 0xae9   :  { %v4148_v43 = vadd.f32 %v4132_v14, %v7003_v35  ;;  %v4142_v60 = vadd.f32 %v4126_v16, %v7080_v1 }
 0xaea   :  { %v4087_v49 = vpop.permute.xlu1 %4086  ;;  %v4099_v26 = vpop.permute.xlu0 %4098 }
 0xaeb   :  { %4192 = vrot.lane.b32.xlu0 %v4148_v43, %s6096_s29  ;;  %4178 = vrot.lane.b32.xlu1 %v4141_v57, %s6096_s29  ;;  %v4127_v30 = vadd.f32 %v4087_v49, %v4031_v41  ;;  %v4133_v3 = vadd.f32 %v4099_v26, %v4037_v8 }
 0xaed   :  { %v4143_v62 = vadd.f32 %v4127_v30, %v7093_v53  ;;  %v4149_v20 = vadd.f32 %v4133_v3, %v7040_v13 }
 0xaee   :  { %v4103_v35 = vpop.permute.xlu1 %4102  ;;  %v4101_v59 = vpop.permute.xlu0 %4100 }
 0xaef   :  { %4168 = vrot.lane.b32.xlu0 %v4136_v39, %s6096_s29  ;;  %4180 = vrot.lane.b32.xlu1 %v4142_v60, %s6096_s29  ;;  %v4135_v58 = vadd.f32 %v4103_v35, %v4039_v0  ;;  %v4134_v42 = vadd.f32 %v4101_v59, %v4038_v24 }
 0xaf1   :  { %v4151_v54 = vadd.f32 %v4135_v58, %v7093_v53  ;;  %v4150_v29 = vadd.f32 %v4134_v42, %v7080_v1 }
 0xaf3   :  { %4172 = vrot.lane.b32.xlu0 %v4138_v61, %s6096_s29  ;;  %4182 = vrot.lane.b32.xlu1 %v4143_v62, %s6096_s29 }
 0xaf7   :  { %4194 = vrot.lane.b32.xlu0 %v4149_v20, %s6096_s29  ;;  %4198 = vrot.lane.b32.xlu1 %v4151_v54, %s6096_s29 }
 0xafb   :  { %4196 = vrot.lane.b32.xlu0 %v4150_v29, %s6096_s29  ;;  %s6069_s29 = scalar_lea.vmem %s5066_s6, 256 }
 0xafc   :  { %p6070_p0 = scmp.ne.s32.totalorder %s5066_s6, %s6069_s29  ;;  %p6075_p2 = scmp.lt.s32.totalorder %s6069_s29, %s6069_s29 }
 0xafe   :  { %p6076_p3 = por %p6075_p2, %p6074_p1 }
 0xb00   :  { %p6077_p4 = pnand %p6076_p3, %p6070_p0 }
 0xb89   :  { %v5642_v38 = vpop.f32.mrb[36].mxu0 }
 0xb8a   :  { %v3496_v37 = vmul.f32 0.35355338, %v5642_v38  ;;  %v3416_v6 = vpop.f32.mrb[37].mxu0 }
 0xb8b   :  { %v3495_v18 = vmul.f32 0.35355338, %v3416_v6 }
 0xb8c   :  { %v3512_v10 = vsel %vm1406_vm2, %v3496_v37, -1e+09  ;;  %vm8307_vm2 = vcmp.gt.f32.partialorder %v8306_v7, 0.0 }
 0xb8d   :  { %v3534_v13 = vsel %vm1469_vm6, %v3512_v10, -inf  ;;  %v3511_v53 = vsel %vm1405_vm3, %v3495_v18, -1e+09  ;;  %v5645_v47 = vpop.f32.mrb[38].mxu0  ;;  %v8304_v18 = vld [vmem:[#allocation24_spill] sm:$0xff] }
 0xb8e   :  { %v3535_v25 = vrot.slane %v3534_v13, 4  ;;  %v3527_v55 = vsel %vm1469_vm6, %v3511_v53, -inf  ;;  %v3498_v46 = vmul.f32 0.35355338, %v5645_v47  ;;  %v3426_v1 = vpop.f32.mrb[39].mxu0  ;;  %vm8305_vm1 = vcmp.gt.f32.partialorder %v8304_v18, 0.0 }
 0xb8f   :  { %v3528_v15 = vrot.slane %v3527_v55, 4  ;;  %v3497_v52 = vmul.f32 0.35355338, %v3426_v1 }
 0xb90   :  { %v3536_v31 = vmax.f32 %v3534_v13, %v3535_v25  ;;  %v7662_v33 = vsel %vm1408_vm4, %v3498_v46, -1e+09 }
 0xb91   :  { %v3529_v5 = vmax.f32 %v3527_v55, %v3528_v15  ;;  %v3548_v4 = vsel %vm1469_vm6, %v7662_v33, -inf  ;;  %v7668_v19 = vsel %vm1407_vm5, %v3497_v52, -1e+09  ;;  %v5648_v14 = vpop.f32.mrb[40].mxu0 }
 0xb92   :  { %v3537_v2 = vrot.slane %v3536_v31, 2  ;;  %v3549_v34 = vrot.slane %v3548_v4, 4  ;;  %v3541_v51 = vsel %vm1469_vm6, %v7668_v19, -inf  ;;  %v3500_v57 = vmul.f32 0.35355338, %v5648_v14  ;;  %v3436_v43 = vpop.f32.mrb[41].mxu0 }
 0xb93   :  { %v3530_v16 = vrot.slane %v3529_v5, 2  ;;  %v3542_v49 = vrot.slane %v3541_v51, 4  ;;  %v3499_v48 = vmul.f32 0.35355338, %v3436_v43 }
 0xb94   :  { %v3538_v32 = vmax.f32 %v3536_v31, %v3537_v2  ;;  %v3550_v63 = vmax.f32 %v3548_v4, %v3549_v34  ;;  %v7674_v26 = vsel %vm1410_vm7, %v3500_v57, -1e+09  ;;  %vm8314_vm7 = vcmp.gt.f32.partialorder %v6614_v40, 0.0 }
 0xb95   :  { %v3531_v39 = vmax.f32 %v3529_v5, %v3530_v16  ;;  %v3543_v9 = vmax.f32 %v3541_v51, %v3542_v49  ;;  %v3562_v60 = vsel %vm1469_vm6, %v7674_v26, -inf  ;;  %v7680_v35 = vsel %vm1409_vm8, %v3499_v48, -1e+09  ;;  %v5651_v44 = vpop.f32.mrb[42].mxu0 }
 0xb96   :  { %v3539_v8 = vrot.slane %v3538_v32, 1  ;;  %v3551_v0 = vrot.slane %v3550_v63, 2  ;;  %v3563_v61 = vrot.slane %v3562_v60, 4  ;;  %v3555_v3 = vsel %vm1469_vm6, %v7680_v35, -inf  ;;  %v3446_v62 = vpop.f32.mrb[43].mxu0 }
 0xb97   :  { %v3532_v58 = vrot.slane %v3531_v39, 1  ;;  %v3544_v59 = vrot.slane %v3543_v9, 2  ;;  %v3556_v27 = vrot.slane %v3555_v3, 4  ;;  %v3502_v24 = vmul.f32 0.35355338, %v5651_v44 }
 0xb98   :  { %v3540_v20 = vmax.f32 %v3538_v32, %v3539_v8  ;;  %v3552_v42 = vmax.f32 %v3550_v63, %v3551_v0  ;;  %v3564_v54 = vmax.f32 %v3562_v60, %v3563_v61  ;;  %v3501_v29 = vmul.f32 0.35355338, %v3446_v62  ;;  %v8308_v62 = vld [vmem:[#allocation26_spill] sm:$0xff] }
 0xb99   :  { %v3533_v38 = vmax.f32 %v3531_v39, %v3532_v58  ;;  %v3545_v37 = vmax.f32 %v3543_v9, %v3544_v59  ;;  %v3557_v6 = vmax.f32 %v3555_v3, %v3556_v27  ;;  %v7686_v50 = vsel %vm8305_vm1, %v3502_v24, -1e+09  ;;  %v5654_v13 = vpop.f32.mrb[44].mxu0 }
 0xb9a   :  { %v3640_v23 = vsub.f32 %v3512_v10, %v3540_v20  ;;  %v3553_v47 = vrot.slane %v3552_v42, 1  ;;  %v3565_v25 = vrot.slane %v3564_v54, 2  ;;  %v3576_v55 = vsel %vm1469_vm6, %v7686_v50, -inf  ;;  %v3456_v46 = vpop.f32.mrb[45].mxu0 }
 0xb9b   :  { %v3639_v1 = vsub.f32 %v3511_v53, %v3533_v38  ;;  %v3546_v15 = vrot.slane %v3545_v37, 1  ;;  %v3558_v52 = vrot.slane %v3557_v6, 2  ;;  %v3577_v31 = vrot.slane %v3576_v55, 4 }
 0xb9c   :  { %v3657_v11 = vmul.f32 1.442695, %v3640_v23  ;;  %v3554_v5 = vmax.f32 %v3552_v42, %v3553_v47  ;;  %v3566_v4 = vmax.f32 %v3564_v54, %v3565_v25  ;;  %v7692_v14 = vsel %vm8307_vm2, %v3501_v29, -1e+09  ;;  %v8310_v29 = vld [vmem:[#allocation27_spill] sm:$0xff] }
 0xb9d   :  { %v3655_v2 = vmul.f32 1.442695, %v3639_v1  ;;  %v3547_v34 = vmax.f32 %v3545_v37, %v3546_v15  ;;  %v3559_v10 = vmax.f32 %v3557_v6, %v3558_v52  ;;  %v3578_v51 = vmax.f32 %v3576_v55, %v3577_v31  ;;  %v5657_v57 = vpop.f32.mrb[46].mxu0 }
 0xb9e   :  { %5980 = vpow2.f32 %v3657_v11  ;;  %v3642_v43 = vsub.f32 %v7662_v33, %v3554_v5  ;;  %v3567_v16 = vrot.slane %v3566_v4, 1  ;;  %v3569_v53 = vsel %vm1469_vm6, %v7692_v14, -inf  ;;  %v3466_v49 = vpop.f32.mrb[47].mxu0 }
 0xb9f   :  { %5982 = vpow2.f32 %v3655_v2  ;;  %v3641_v48 = vsub.f32 %v7668_v19, %v3547_v34  ;;  %v3560_v32 = vrot.slane %v3559_v10, 1  ;;  %v3579_v63 = vrot.slane %v3578_v51, 2 }
 0xba0   :  { %v3661_v41 = vmul.f32 1.442695, %v3642_v43  ;;  %v3568_v39 = vmax.f32 %v3566_v4, %v3567_v16  ;;  %v3570_v9 = vrot.slane %v3569_v53, 4  ;;  %v3504_v60 = vmul.f32 0.35355338, %v5654_v13 }
 0xba1   :  { %v3659_v30 = vmul.f32 1.442695, %v3641_v48  ;;  %v3561_v44 = vmax.f32 %v3559_v10, %v3560_v32  ;;  %v3580_v8 = vmax.f32 %v3578_v51, %v3579_v63  ;;  %v3503_v0 = vmul.f32 0.35355338, %v3456_v46  ;;  %v7698_v61 = vpop.f32.mrb[48].mxu0  ;;  %v8312_v46 = vld [vmem:[#allocation28_spill] sm:$0xff] }
 0xba2   :  { %5984 = vpow2.f32 %v3661_v41  ;;  %v3644_v33 = vsub.f32 %v7674_v26, %v3568_v39  ;;  %v3571_v3 = vmax.f32 %v3569_v53, %v3570_v9  ;;  %vm8309_vm3 = vcmp.gt.f32.partialorder %v8308_v62, 0.0  ;;  %v7705_v19 = vpop.f32.mrb[49].mxu0 }
 0xba3   :  { %v7703_v58 = vsel %vm8309_vm3, %v3504_v60, -1e+09  ;;  %5986 = vpow2.f32 %v3659_v30  ;;  %v3643_v59 = vsub.f32 %v7680_v35, %v3561_v44  ;;  %v3581_v27 = vrot.slane %v3580_v8, 1 }
 0xba4   :  { %v3590_v24 = vsel %vm1469_vm6, %v7703_v58, -inf  ;;  %v3665_v20 = vmul.f32 1.442695, %v3644_v33  ;;  %v3572_v42 = vrot.slane %v3571_v3, 2  ;;  %vm8311_vm4 = vcmp.gt.f32.partialorder %v8310_v29, 0.0 }
 0xba5   :  { %v3591_v54 = vrot.slane %v3590_v24, 4  ;;  %v7712_v26 = vsel %vm8311_vm4, %v3503_v0, -1e+09  ;;  %v3663_v38 = vmul.f32 1.442695, %v3643_v59  ;;  %v3582_v37 = vmax.f32 %v3580_v8, %v3581_v27  ;;  %v7716_v13 = vpop.f32.mrb[50].mxu0 }
 0xba6   :  { %v3583_v6 = vsel %vm1469_vm6, %v7712_v26, -inf  ;;  %v3506_v18 = vmul.f32 0.35355338, %v5657_v57  ;;  %5988 = vpow2.f32 %v3665_v20  ;;  %v3573_v35 = vmax.f32 %v3571_v3, %v3572_v42  ;;  %v7718_v25 = vpop.f32.mrb[51].mxu0 }
 0xba7   :  { %v3592_v23 = vmax.f32 %v3590_v24, %v3591_v54  ;;  %v3584_v47 = vrot.slane %v3583_v6, 4  ;;  %5990 = vpow2.f32 %v3663_v38  ;;  %v3646_v55 = vsub.f32 %v7686_v50, %v3582_v37 }
 0xba8   :  { %vm8313_vm5 = vcmp.gt.f32.partialorder %v8312_v46, 0.0  ;;  %v7725_v15 = vpop.eup %5980  ;;  %v3574_v52 = vrot.slane %v3573_v35, 1  ;;  %v3505_v50 = vmul.f32 0.35355338, %v3466_v49 }
 0xba9   :  { %v7723_v1 = vsel %vm8313_vm5, %v3506_v18, -1e+09  ;;  %v3593_v31 = vrot.slane %v3592_v23, 2  ;;  %v3585_v11 = vmax.f32 %v3583_v6, %v3584_v47  ;;  %v7729_v4 = vpop.eup %5982  ;;  %v3694_v7 = vsel %vm1469_vm6, %v7725_v15, 0.0 }
 0xbaa   :  { %v3604_v5 = vsel %vm1469_vm6, %v7723_v1, -inf  ;;  %v3669_v2 = vmul.f32 1.442695, %v3646_v55  ;;  %v3695_v10 = vrot.slane %v3694_v7, 4  ;;  %v3687_v51 = vsel %vm1469_vm6, %v7729_v4, 0.0 }
 0xbab   :  { %v3605_v34 = vrot.slane %v3604_v5, 4  ;;  %v3575_v57 = vmax.f32 %v3573_v35, %v3574_v52  ;;  %v3594_v43 = vmax.f32 %v3592_v23, %v3593_v31  ;;  %v3688_v16 = vrot.slane %v3687_v51, 4 }
 0xbac   :  { %5992 = vpow2.f32 %v3669_v2  ;;  %v3586_v53 = vrot.slane %v3585_v11, 2  ;;  %v7735_v32 = vpop.eup %5984  ;;  %v3696_v63 = vadd.f32 %v3695_v10, %v3694_v7 }
 0xbad   :  { %v3606_v48 = vmax.f32 %v3604_v5, %v3605_v34  ;;  %v3645_v41 = vsub.f32 %v7692_v14, %v3575_v57  ;;  %v3595_v39 = vrot.slane %v3594_v43, 1  ;;  %v7738_v9 = vpop.eup %5986  ;;  %v3689_v60 = vadd.f32 %v3688_v16, %v3687_v51 }
 0xbae   :  { %v3708_v49 = vsel %vm1469_vm6, %v7735_v32, 0.0  ;;  %v3587_v30 = vmax.f32 %v3585_v11, %v3586_v53  ;;  %v3697_v8 = vrot.slane %v3696_v63, 2  ;;  %v3701_v33 = vsel %vm1469_vm6, %v7738_v9, 0.0 }
 0xbaf   :  { %v3607_v44 = vrot.slane %v3606_v48, 2  ;;  %v3709_v0 = vrot.slane %v3708_v49, 4  ;;  %v3667_v3 = vmul.f32 1.442695, %v3645_v41  ;;  %v3690_v62 = vrot.slane %v3689_v60, 2 }
 0xbb0   :  { %v3702_v59 = vrot.slane %v3701_v33, 4  ;;  %v3596_v27 = vmax.f32 %v3594_v43, %v3595_v39  ;;  %v7746_v14 = vsel %vm8314_vm7, %v3505_v50, -1e+09  ;;  %v7748_v24 = vpop.eup %5988  ;;  %v3698_v20 = vadd.f32 %v3697_v8, %v3696_v63 }
 0xbb1   :  { %v3710_v42 = vadd.f32 %v3709_v0, %v3708_v49  ;;  %5994 = vpow2.f32 %v3667_v3  ;;  %v3588_v54 = vrot.slane %v3587_v30, 1  ;;  %v7750_v29 = vpop.eup %5990  ;;  %v3722_v37 = vsel %vm1469_vm6, %v7748_v24, 0.0  ;;  %v8315_v3 = vld [vmem:[#allocation29_spill] sm:$0xff] }
 0xbb2   :  { %v3703_v38 = vadd.f32 %v3702_v59, %v3701_v33  ;;  %v3648_v6 = vsub.f32 %v7703_v58, %v3596_v27  ;;  %v3608_v18 = vmax.f32 %v3606_v48, %v3607_v44  ;;  %v3699_v35 = vrot.slane %v3698_v20, 1 }
 0xbb3   :  { %v7755_v23 = vadd.f32 %v3690_v62, %v3689_v60  ;;  %v3723_v40 = vrot.slane %v3722_v37, 4  ;;  %v3715_v47 = vsel %vm1469_vm6, %v7750_v29, 0.0  ;;  %v3711_v55 = vrot.slane %v3710_v42, 2 }
 0xbb4   :  { %v3704_v46 = vrot.slane %v3703_v38, 2  ;;  %v3716_v52 = vrot.slane %v3715_v47, 4  ;;  %v3673_v31 = vmul.f32 1.442695, %v3648_v6  ;;  %v3700_v11 = vadd.f32 %v3699_v35, %v3698_v20 }
 0xbb5   :  { %v3589_v5 = vmax.f32 %v3587_v30, %v3588_v54  ;;  %v3724_v2 = vadd.f32 %v3723_v40, %v3722_v37  ;;  %v3609_v34 = vrot.slane %v3608_v18, 1  ;;  %v3597_v58 = vsel %vm1469_vm6, %v7746_v14, -inf }
 0xbb6   :  { %v7759_v7 = vpop.eup %5992  ;;  %5996 = vpow2.f32 %v3673_v31  ;;  %v3692_v50 = vrot.slane %v7755_v23, 1  ;;  %v3717_v10 = vadd.f32 %v3716_v52, %v3715_v47  ;;  %v7766_v57 = vadd.f32 %v3711_v55, %v3710_v42  ;;  %v8319_v31 = vld [vmem:[#allocation31_spill] sm:$0xff] }
 0xbb7   :  { %v3736_v51 = vsel %vm1469_vm6, %v7759_v7, 0.0  ;;  %v7768_v43 = vadd.f32 %v3704_v46, %v3703_v38  ;;  %v3647_v53 = vsub.f32 %v7712_v26, %v3589_v5  ;;  %5998 = vrcp.f32 %v3700_v11  ;;  %v8317_v38 = vld [vmem:[#allocation30_spill] sm:$0xff] }
 0xbb8   :  { %v3737_v16 = vrot.slane %v3736_v51, 4  ;;  %v3610_v48 = vmax.f32 %v3608_v18, %v3609_v34  ;;  %v3598_v63 = vrot.slane %v3597_v58, 4  ;;  %v3508_v41 = vmul.f32 0.35355338, %v7698_v61 }
 0xbb9   :  { %v3725_v39 = vrot.slane %v3724_v2, 2  ;;  %v3671_v49 = vmul.f32 1.442695, %v3647_v53  ;;  %v3507_v30 = vmul.f32 0.35355338, %v7705_v19  ;;  %v3718_v8 = vrot.slane %v3717_v10, 2 }
 0xbba   :  { %v3738_v60 = vadd.f32 %v3737_v16, %v3736_v51  ;;  %v3650_v0 = vsub.f32 %v7723_v1, %v3610_v48  ;;  %v3599_v33 = vmax.f32 %v3597_v58, %v3598_v63  ;;  %vm8316_vm8 = vcmp.gt.f32.partialorder %v8315_v3, 0.0 }
 0xbbb   :  { %v7773_v44 = vpop.eup %5994  ;;  %v7778_v62 = vsel %vm8316_vm8, %v3508_v41, -1e+09  ;;  %v3713_v26 = vrot.slane %v7766_v57, 1  ;;  %6000 = vpow2.f32 %v3671_v49  ;;  %v7785_v54 = vadd.f32 %v3725_v39, %v3724_v2 }
 0xbbc   :  { %v3739_v59 = vrot.slane %v3738_v60, 2  ;;  %v3729_v61 = vsel %vm1469_vm6, %v7773_v44, 0.0  ;;  %v3677_v20 = vmul.f32 1.442695, %v3650_v0  ;;  %v3600_v19 = vrot.slane %v3599_v33, 2 }
 0xbbd   :  { %v3730_v27 = vrot.slane %v3729_v61, 4  ;;  %v3618_v42 = vsel %vm1469_vm6, %v7778_v62, -inf  ;;  %vm8318_vm1 = vcmp.gt.f32.partialorder %v8317_v38, 0.0  ;;  %v3510_v6 = vmul.f32 0.35355338, %v7716_v13 }
 0xbbe   :  { %v3619_v1 = vrot.slane %v3618_v42, 4  ;;  %v7789_v37 = vsel %vm8318_vm1, %v3507_v30, -1e+09  ;;  %v7792_v18 = vadd.f32 %v3718_v8, %v3717_v10  ;;  %6002 = vpow2.f32 %v3677_v20 }
 0xbbf   :  { %v3601_v35 = vmax.f32 %v3599_v33, %v3600_v19  ;;  %v3611_v40 = vsel %vm1469_vm6, %v7789_v37, -inf  ;;  %v7798_v55 = vadd.f32 %v3739_v59, %v3738_v60  ;;  %vm8320_vm2 = vcmp.gt.f32.partialorder %v8319_v31, 0.0  ;;  %v8321_v59 = vld [vmem:[#allocation32_spill] sm:$0xff] }
 0xbc0   :  { %v7796_v47 = vpop.eup %5996  ;;  %v3620_v46 = vmax.f32 %v3618_v42, %v3619_v1  ;;  %v3612_v52 = vrot.slane %v3611_v40, 4  ;;  %v7802_v11 = vsel %vm8320_vm2, %v3510_v6, -1e+09  ;;  %v3731_v5 = vadd.f32 %v3730_v27, %v3729_v61 }
 0xbc1   :  { %v3750_v13 = vsel %vm1469_vm6, %v7796_v47, 0.0  ;;  %v3602_v2 = vrot.slane %v3601_v35, 1  ;;  %v3632_v34 = vsel %vm1469_vm6, %v7802_v11, -inf  ;;  %v3706_v58 = vrot.slane %v7768_v43, 1  ;;  %v7809_v53 = vpop.eup %5998 }
 0xbc2   :  { %v3751_v10 = vrot.slane %v3750_v13, 4  ;;  %v3621_v51 = vrot.slane %v3620_v46, 2  ;;  %v3613_v16 = vmax.f32 %v3611_v40, %v3612_v52  ;;  %v3727_v48 = vrot.slane %v7785_v54, 1 }
 0xbc3   :  { %v3603_v63 = vmax.f32 %v3601_v35, %v3602_v2  ;;  %v3633_v41 = vrot.slane %v3632_v34, 4  ;;  %v3509_v39 = vmul.f32 0.35355338, %v7718_v25  ;;  %v3720_v60 = vrot.slane %v7792_v18, 1 }
 0xbc4   :  { %v3741_v49 = vrot.slane %v7798_v55, 1  ;;  %v3622_v30 = vmax.f32 %v3620_v46, %v3621_v51  ;;  %v3614_v8 = vrot.slane %v3613_v16, 2  ;;  %v3732_v0 = vrot.slane %v3731_v5, 2 }
 0xbc5   :  { %v3649_v33 = vsub.f32 %v7746_v14, %v3603_v63  ;;  %v3634_v3 = vmax.f32 %v3632_v34, %v3633_v41  ;;  %vm8322_vm3 = vcmp.gt.f32.partialorder %v8321_v59, 0.0  ;;  %v7818_v27 = vpop.eup %6000  ;;  %v3752_v20 = vadd.f32 %v3751_v10, %v3750_v13 }
 0xbc6   :  { %v3525_v61 = vsel %vm8322_vm3, %v3509_v39, -1e+09  ;;  %v3623_v19 = vrot.slane %v3622_v30, 1  ;;  %v3615_v42 = vmax.f32 %v3613_v16, %v3614_v8  ;;  %v3743_v1 = vsel %vm1469_vm6, %v7818_v27, 0.0 }
 0xbc7   :  { %v3625_v25 = vsel %vm1469_vm6, %v3525_v61, -inf  ;;  %v3675_v38 = vmul.f32 1.442695, %v3649_v33  ;;  %v3635_v6 = vrot.slane %v3634_v3, 2  ;;  %v3744_v40 = vrot.slane %v3743_v1, 4 }
 0xbc8   :  { %v3626_v35 = vrot.slane %v3625_v25, 4  ;;  %v3624_v46 = vmax.f32 %v3622_v30, %v3623_v19  ;;  %v3616_v14 = vrot.slane %v3615_v42, 1  ;;  %v3693_v52 = vadd.f32 %v3692_v50, %v7755_v23  ;;  %v7826_v31 = vpop.eup %6002 }
 0xbc9   :  { %v3733_v13 = vadd.f32 %v3732_v0, %v3731_v5  ;;  %6004 = vpow2.f32 %v3675_v38  ;;  %v3636_v2 = vmax.f32 %v3634_v3, %v3635_v6  ;;  %v3753_v10 = vrot.slane %v3752_v20, 2 }
 0xbca   :  { %v3627_v34 = vmax.f32 %v3625_v25, %v3626_v35  ;;  %v3745_v51 = vadd.f32 %v3744_v40, %v3743_v1  ;;  %v3764_v16 = vsel %vm1469_vm6, %v7826_v31, 0.0  ;;  %v3652_v63 = vsub.f32 %v7778_v62, %v3624_v46 }
 0xbcb   :  { %v3765_v41 = vrot.slane %v3764_v16, 4  ;;  %v3617_v39 = vmax.f32 %v3615_v42, %v3616_v14  ;;  %v3637_v30 = vrot.slane %v3636_v2, 1  ;;  %6006 = vrcp.f32 %v3693_v52 }
 0xbcc   :  { %v3628_v8 = vrot.slane %v3627_v34, 2  ;;  %v3746_v33 = vrot.slane %v3745_v51, 2  ;;  %v3681_v59 = vmul.f32 1.442695, %v3652_v63  ;;  %v3707_v23 = vadd.f32 %v3706_v58, %v7768_v43 }
 0xbcd   :  { %v3766_v50 = vadd.f32 %v3765_v41, %v3764_v16  ;;  %v3651_v5 = vsub.f32 %v7789_v37, %v3617_v39  ;;  %v3638_v0 = vmax.f32 %v3636_v2, %v3637_v30  ;;  %v3734_v19 = vrot.slane %v3733_v13, 1 }
 0xbce   :  { %v3629_v3 = vmax.f32 %v3627_v34, %v3628_v8  ;;  %v3747_v25 = vadd.f32 %v3746_v33, %v3745_v51  ;;  %6008 = vpow2.f32 %v3681_v59  ;;  %v3714_v62 = vadd.f32 %v3713_v26, %v7766_v57 }
 0xbcf   :  { %v3754_v42 = vadd.f32 %v3753_v10, %v3752_v20  ;;  %v3679_v1 = vmul.f32 1.442695, %v3651_v5  ;;  %v3654_v38 = vsub.f32 %v7802_v11, %v3638_v0  ;;  %v3767_v35 = vrot.slane %v3766_v50, 2 }
 0xbd0   :  { %v3630_v6 = vrot.slane %v3629_v3, 1  ;;  %6010 = vrcp.f32 %v3707_v23  ;;  %v3721_v43 = vadd.f32 %v3720_v60, %v7792_v18  ;;  %v3728_v37 = vadd.f32 %v3727_v48, %v7785_v54 }
 0xbd1   :  { %v3748_v58 = vrot.slane %v3747_v25, 1  ;;  %6012 = vpow2.f32 %v3679_v1  ;;  %v3685_v40 = vmul.f32 1.442695, %v3654_v38  ;;  %v3735_v14 = vadd.f32 %v3734_v19, %v3733_v13 }
 0xbd2   :  { %v3631_v46 = vmax.f32 %v3629_v3, %v3630_v6  ;;  %6014 = vrcp.f32 %v3714_v62  ;;  %v3755_v57 = vrot.slane %v3754_v42, 1  ;;  %v3768_v20 = vadd.f32 %v3767_v35, %v3766_v50 }
 0xbd3   :  { %v7839_v52 = vpop.eup %6004  ;;  %6016 = vpow2.f32 %v3685_v40  ;;  %v3742_v54 = vadd.f32 %v3741_v49, %v7798_v55  ;;  %v3749_v60 = vadd.f32 %v3748_v58, %v3747_v25  ;;  %v3816_v10 = vmul.f32 %v7809_v53, %v7725_v15 }
 0xbd4   :  { %v3653_v26 = vsub.f32 %v3525_v61, %v3631_v46  ;;  %v3757_v11 = vsel %vm1469_vm6, %v7839_v52, 0.0  ;;  %6018 = vrcp.f32 %v3721_v43  ;;  %v3769_v51 = vrot.slane %v3768_v20, 1 }
 0xbd5   :  { %v3758_v18 = vrot.slane %v3757_v11, 4  ;;  %6020 = vrcp.f32 %v3728_v37  ;;  %v6007_v2 = vpop.eup %6006  ;;  %v3756_v16 = vadd.f32 %v3755_v57, %v3754_v42 }
 0xbd6   :  { %v3683_v48 = vmul.f32 1.442695, %v3653_v26  ;;  %6022 = vrcp.f32 %v3735_v14  ;;  %v3815_v34 = vmul.f32 %v6007_v2, %v7729_v4  ;;  %v3770_v33 = vadd.f32 %v3769_v51, %v3768_v20 }
 0xbd7   :  { %v3759_v13 = vadd.f32 %v3758_v18, %v3757_v11 }
 0xbd8   :  { %6024 = vpow2.f32 %v3683_v48  ;;  %v7847_v61 = vpop.eup %6008  ;;  %5666 = vmatprep.mubr.msk.f32.mxu1 %vm1469_vm6, %v3815_v34 }
 0xbd9   :  { %6026 = vrcp.f32 %v3742_v54  ;;  %v3760_v63 = vrot.slane %v3759_v13, 2  ;;  %v3778_v55 = vsel %vm1469_vm6, %v7847_v61, 0.0  ;;  %5667 = vmatmul.mubr.msk.f32.vlgmr.msra.gmra.mrb[40].mxu1 %vm1469_vm6, %v3816_v10 }
 0xbda   :  { %6028 = vrcp.f32 %v3749_v60  ;;  %v6011_v49 = vpop.eup %6010  ;;  %v3779_v41 = vrot.slane %v3778_v55, 4 }
 0xbdb   :  { %v7855_v4 = vpop.eup %6012  ;;  %v3761_v39 = vadd.f32 %v3760_v63, %v3759_v13  ;;  %v3817_v30 = vmul.f32 %v6011_v49, %v7738_v9  ;;  %6030 = vrcp.f32 %v3756_v16 }
 0xbdc   :  { %v6015_v15 = vpop.eup %6014  ;;  %v3780_v53 = vadd.f32 %v3779_v41, %v3778_v55  ;;  %v3771_v8 = vsel %vm1469_vm6, %v7855_v4, 0.0  ;;  %6032 = vrcp.f32 %v3770_v33  ;;  %v5206_v33 = vld [vmem:[%s8080_s10 + $0x20] sm:$0xff] }
 0xbdd   :  { %v7860_v59 = vpop.eup %6016  ;;  %v3762_v23 = vrot.slane %v3761_v39, 1  ;;  %v3772_v50 = vrot.slane %v3771_v8, 4  ;;  %5669 = vmatprep.mubr.msk.f32.mxu1 %vm1469_vm6, %v3817_v30  ;;  %v3818_v5 = vmul.f32 %v6015_v15, %v7735_v32 }
 0xbde   :  { %v6019_v0 = vpop.eup %6018  ;;  %v3781_v3 = vrot.slane %v3780_v53, 2  ;;  %v3792_v9 = vsel %vm1469_vm6, %v7860_v59, 0.0 }
 0xbdf   :  { %v6021_v19 = vpop.eup %6020  ;;  %v3773_v25 = vadd.f32 %v3772_v50, %v3771_v8  ;;  %v3793_v62 = vrot.slane %v3792_v9, 4  ;;  %5670 = vmatmul.mubr.msk.f32.gmra.mrb[42].mxu1 %vm1469_vm6, %v3818_v5  ;;  %v3819_v42 = vmul.f32 %v6019_v0, %v7750_v29  ;;  %v3763_v1 = vadd.f32 %v3762_v23, %v3761_v39  ;;  %v5208_v23 = vld [vmem:[%s8080_s10 + $0x30] sm:$0xff]  ;;  %v7903_v5 = vpop.permute.xlu0 %4186 }
 0xbe0   :  { %v6023_v38 = vpop.eup %6022  ;;  %v3782_v6 = vadd.f32 %v3781_v3, %v3780_v53  ;;  %v3820_v35 = vmul.f32 %v6021_v19, %v7748_v24  ;;  %v7905_v0 = vpop.permute.xlu1 %4184 }
 0xbe1   :  { %v3774_v32 = vrot.slane %v3773_v25, 2  ;;  %v3794_v37 = vadd.f32 %v3793_v62, %v3792_v9  ;;  %5672 = vmatprep.mubr.msk.f32.mxu1 %vm1469_vm6, %v3819_v42  ;;  %v3821_v58 = vmul.f32 %v6023_v38, %v7773_v44  ;;  %6034 = vrcp.f32 %v3763_v1 }
 0xbe2   :  { %v6025_v43 = vpop.eup %6024  ;;  %v3783_v46 = vrot.slane %v3782_v6, 1 }
 0xbe3   :  { %v6027_v40 = vpop.eup %6026  ;;  %v3785_v14 = vsel %vm1469_vm6, %v6025_v43, 0.0  ;;  %v3775_v29 = vadd.f32 %v3774_v32, %v3773_v25  ;;  %v3795_v26 = vrot.slane %v3794_v37, 2  ;;  %5673 = vmatmul.mubr.msk.f32.gmra.mrb[44].mxu1 %vm1469_vm6, %v3820_v35  ;;  %v7907_v3 = vpop.permute.xlu0 %4188 }
 0xbe4   :  { %v6029_v57 = vpop.eup %6028  ;;  %v3786_v20 = vrot.slane %v3785_v14, 4  ;;  %5675 = vmatprep.mubr.msk.f32.mxu1 %vm1469_vm6, %v3821_v58  ;;  %v3784_v11 = vadd.f32 %v3783_v46, %v3782_v6  ;;  %v3822_v44 = vmul.f32 %v6027_v40, %v7759_v7  ;;  %v4171_v9 = vpop.permute.xlu1 %4170 }
 0xbe5   :  { %v3823_v24 = vmul.f32 %v6029_v57, %v7818_v27  ;;  %v3776_v54 = vrot.slane %v3775_v29, 1  ;;  %v3796_v18 = vadd.f32 %v3795_v26, %v3794_v37  ;;  %v6031_v60 = vpop.eup %6030 }
 0xbe6   :  { %v3787_v48 = vadd.f32 %v3786_v20, %v3785_v14  ;;  %6036 = vrcp.f32 %v3784_v11  ;;  %v3824_v51 = vmul.f32 %v6031_v60, %v7796_v47  ;;  %v6033_v27 = vpop.eup %6032 }
 0xbe7   :  { %v3797_v2 = vrot.slane %v3796_v18, 1  ;;  %5676 = vmatmul.mubr.msk.f32.gmra.mrb[46].mxu1 %vm1469_vm6, %v3822_v44  ;;  %v3777_v34 = vadd.f32 %v3776_v54, %v3775_v29  ;;  %v3826_v49 = vmul.f32 %v6033_v27, %v7826_v31  ;;  %v7909_v19 = vpop.permute.xlu0 %4190 }
 0xbe8   :  { %v3788_v13 = vrot.slane %v3787_v48, 2  ;;  %5678 = vmatprep.mubr.msk.f32.mxu1 %vm1469_vm6, %v3823_v24  ;;  %v4175_v25 = vpop.permute.xlu1 %4174 }
 0xbe9   :  { %6038 = vrcp.f32 %v3777_v34  ;;  %v3798_v16 = vadd.f32 %v3797_v2, %v3796_v18 }
 0xbea   :  { %v3789_v10 = vadd.f32 %v3788_v13, %v3787_v48 }
 0xbeb   :  { %v6035_v63 = vpop.eup %6034  ;;  %5679 = vmatmul.mubr.msk.f32.gmra.mrb[48].mxu1 %vm1469_vm6, %v3824_v51  ;;  %6040 = vrcp.f32 %v3798_v16  ;;  %v7911_v62 = vpop.permute.xlu0 %4192 }
 0xbec   :  { %v3790_v55 = vrot.slane %v3789_v10, 1  ;;  %v3825_v7 = vmul.f32 %v6035_v63, %v7839_v52  ;;  %v4177_v42 = vpop.permute.xlu1 %4176 }
 0xbee   :  { %v3791_v41 = vadd.f32 %v3790_v55, %v3789_v10  ;;  %5681 = vmatprep.mubr.msk.f32.mxu1 %vm1469_vm6, %v3825_v7 }
 0xbef   :  { %5682 = vmatmul.mubr.msk.f32.gmra.mrb[50].mxu1 %vm1469_vm6, %v3826_v49  ;;  %v4169_v1 = vpop.permute.xlu0 %4168 }
 0xbf0   :  { %6042 = vrcp.f32 %v3791_v41  ;;  %v6037_v39 = vpop.eup %6036  ;;  %v4179_v6 = vpop.permute.xlu1 %4178 }
 0xbf1   :  { %v3828_v15 = vmul.f32 %v6037_v39, %v7847_v61  ;;  %v5207_v61 = vld [vmem:[%s8080_s10 + $0x28] sm:$0xff] }
 0xbf3   :  { %v6039_v47 = vpop.eup %6038  ;;  %v4173_v57 = vpop.permute.xlu0 %4172 }
 0xbf4   :  { %v3827_v30 = vmul.f32 %v6039_v47, %v7855_v4  ;;  %v5851_v4 = vpack.c.bf16 %v5207_v61, %v5206_v33  ;;  %v4181_v24 = vpop.permute.xlu1 %4180 }
 0xbf5   :  { %v6041_v52 = vpop.eup %6040 }
 0xbf6   :  { %5684 = vmatprep.mubr.msk.f32.mxu1 %vm1469_vm6, %v3827_v30  ;;  %v3830_v8 = vmul.f32 %v6041_v52, %v7860_v59  ;;  %5852 = vmatprep.subr.bf16.mxu0 %v5851_v4  ;;  %v5209_v59 = vld [vmem:[%s8080_s10 + $0x38] sm:$0xff] }
 0xbf7   :  { %5685 = vmatmul.mubr.msk.f32.gmra.mrb[52].mxu1 %vm1469_vm6, %v3828_v15  ;;  %5854 = vmatpush3.bf16.msra.mxu0 %v5851_v4  ;;  %v5855_v50 = vpack.c.bf16 %v5209_v59, %v5208_v23 }
 0xbf8   :  { %v4183_v39 = vpop.permute.xlu1 %4182 }
 0xbf9   :  { %5856 = vmatprep.subr.bf16.mxu0 %v5855_v50 }
 0xbfa   :  { %v6043_v53 = vpop.eup %6042 }
 0xbfb   :  { %v3829_v31 = vmul.f32 %v6043_v53, %v6025_v43  ;;  %5858 = vmatpush3.bf16.msra.mxu0 %v5855_v50 }
 0xbfd   :  { %5687 = vmatprep.mubr.msk.f32.mxu1 %vm1469_vm6, %v3829_v31 }
 0xbfe   :  { %5688 = vmatmul.mubr.msk.f32.gmra.mrb[54].mxu1 %vm1469_vm6, %v3830_v8  ;;  %vm8323_vm6 = vcmask 1047559  }
 0xcac   :  { %v5668_v38 = vpop.f32.mrb[40].mxu1 }
 0xcad   :  { %v4217_v35 = vmul.f32 %v5668_v38, %v4171_v9  ;;  %v3945_v43 = vpop.f32.mrb[41].mxu1 }
 0xcae   :  { %v4216_v32 = vmul.f32 %v4169_v1, %v3945_v43 }
 0xcaf   :  { %v4239_v37 = vsel %vm62_vm0, %v4217_v35, 0.0 }
 0xcb0   :  { %v4240_v58 = vrot.slane %v4239_v37, 4  ;;  %v4232_v40 = vsel %vm62_vm0, %v4216_v32, 0.0 }
 0xcb1   :  { %v4233_v46 = vrot.slane %v4232_v40, 4 }
 0xcb2   :  { %v5671_v14 = vpop.f32.mrb[42].mxu1  ;;  %v4241_v29 = vadd.f32 %v4240_v58, %v4239_v37 }
 0xcb3   :  { %v4219_v26 = vmul.f32 %v5671_v14, %v4175_v25  ;;  %v3955_v20 = vpop.f32.mrb[43].mxu1  ;;  %v4234_v11 = vadd.f32 %v4233_v46, %v4232_v40 }
 0xcb4   :  { %v4218_v54 = vmul.f32 %v4173_v57, %v3955_v20  ;;  %v4242_v18 = vrot.slane %v4241_v29, 2 }
 0xcb5   :  { %v4253_v48 = vsel %vm62_vm0, %v4219_v26, 0.0  ;;  %v4235_v44 = vrot.slane %v4234_v11, 2 }
 0xcb6   :  { %v4254_v60 = vrot.slane %v4253_v48, 4  ;;  %v4246_v2 = vsel %vm62_vm0, %v4218_v54, 0.0  ;;  %v5674_v13 = vpop.f32.mrb[44].mxu1  ;;  %v4243_v34 = vadd.f32 %v4242_v18, %v4241_v29 }
 0xcb7   :  { %v4247_v10 = vrot.slane %v4246_v2, 4  ;;  %v4221_v51 = vmul.f32 %v5674_v13, %v4179_v6  ;;  %v3965_v27 = vpop.f32.mrb[45].mxu1  ;;  %v4236_v16 = vadd.f32 %v4235_v44, %v4234_v11 }
 0xcb8   :  { %v4255_v63 = vadd.f32 %v4254_v60, %v4253_v48  ;;  %v4220_v55 = vmul.f32 %v4177_v42, %v3965_v27  ;;  %v4244_v7 = vrot.slane %v4243_v34, 1 }
 0xcb9   :  { %v4248_v49 = vadd.f32 %v4247_v10, %v4246_v2  ;;  %v4267_v41 = vsel %vm62_vm0, %v4221_v51, 0.0  ;;  %v4237_v47 = vrot.slane %v4236_v16, 1 }
 0xcba   :  { %v4256_v30 = vrot.slane %v4255_v63, 2  ;;  %v4268_v15 = vrot.slane %v4267_v41, 4  ;;  %v4260_v52 = vsel %vm62_vm0, %v4220_v55, 0.0  ;;  %v5677_v53 = vpop.f32.mrb[46].mxu1  ;;  %v4245_v31 = vadd.f32 %v4244_v7, %v4243_v34 }
 0xcbb   :  { %v4249_v8 = vrot.slane %v4248_v49, 2  ;;  %v4261_v33 = vrot.slane %v4260_v52, 4  ;;  %v4223_v61 = vmul.f32 %v5677_v53, %v4183_v39  ;;  %v3975_v4 = vpop.f32.mrb[47].mxu1  ;;  %v4238_v23 = vadd.f32 %v4237_v47, %v4236_v16 }
 0xcbc   :  { %v4257_v59 = vadd.f32 %v4256_v30, %v4255_v63  ;;  %v4269_v50 = vadd.f32 %v4268_v15, %v4267_v41  ;;  %v4222_v9 = vmul.f32 %v4181_v24, %v3975_v4 }
 0xcbd   :  { %v4250_v25 = vadd.f32 %v4249_v8, %v4248_v49  ;;  %v4262_v42 = vadd.f32 %v4261_v33, %v4260_v52  ;;  %v4281_v1 = vsel %vm62_vm0, %v4223_v61, 0.0  ;;  %v4365_v38 = vsel %vm2343_vm12, %v4245_v31, %v4238_v23 }
 0xcbe   :  { %v4258_v6 = vrot.slane %v4257_v59, 1  ;;  %v4270_v35 = vrot.slane %v4269_v50, 2  ;;  %v4282_v43 = vrot.slane %v4281_v1, 4  ;;  %v5680_v32 = vpop.f32.mrb[48].mxu1  ;;  %v4274_v40 = vsel %vm62_vm0, %v4222_v9, 0.0 }
 0xcbf   :  { %v4251_v37 = vrot.slane %v4250_v25, 1  ;;  %v4263_v58 = vrot.slane %v4262_v42, 2  ;;  %v4225_v46 = vmul.f32 %v5680_v32, %v7903_v5  ;;  %v3985_v14 = vpop.f32.mrb[49].mxu1  ;;  %v4275_v26 = vrot.slane %v4274_v40, 4 }
 0xcc0   :  { %v4271_v57 = vadd.f32 %v4270_v35, %v4269_v50  ;;  %v4283_v29 = vadd.f32 %v4282_v43, %v4281_v1  ;;  %v4224_v54 = vmul.f32 %v7905_v0, %v3985_v14  ;;  %v4259_v18 = vadd.f32 %v4258_v6, %v4257_v59  ;;  %v4195_v50 = vpop.permute.xlu0 %4194 }
 0xcc1   :  { %v4252_v20 = vadd.f32 %v4251_v37, %v4250_v25  ;;  %v4264_v24 = vadd.f32 %v4263_v58, %v4262_v42  ;;  %v4295_v11 = vsel %vm62_vm0, %v4225_v46, 0.0  ;;  %v4276_v44 = vadd.f32 %v4275_v26, %v4274_v40 }
 0xcc2   :  { %v4284_v48 = vrot.slane %v4283_v29, 2  ;;  %v4296_v60 = vrot.slane %v4295_v11, 4  ;;  %v5683_v2 = vpop.f32.mrb[50].mxu1  ;;  %v4288_v5 = vsel %vm62_vm0, %v4224_v54, 0.0  ;;  %v4272_v27 = vrot.slane %v4271_v57, 1 }
 0xcc3   :  { %v4366_v13 = vsel %vm2345_vm14, %v4252_v20, %v4365_v38  ;;  %v4265_v34 = vrot.slane %v4264_v24, 1  ;;  %v4227_v10 = vmul.f32 %v5683_v2, %v7909_v19  ;;  %v3995_v51 = vpop.f32.mrb[51].mxu1  ;;  %v4277_v63 = vrot.slane %v4276_v44, 2 }
 0xcc4   :  { %v4285_v16 = vadd.f32 %v4284_v48, %v4283_v29  ;;  %v4297_v55 = vadd.f32 %v4296_v60, %v4295_v11  ;;  %v4289_v49 = vrot.slane %v4288_v5, 4  ;;  %v4226_v41 = vmul.f32 %v7907_v3, %v3995_v51  ;;  %v4199_v48 = vpop.permute.xlu1 %4198  ;;  %v4197_v2 = vpop.permute.xlu0 %4196 }
 0xcc5   :  { %v4266_v7 = vadd.f32 %v4265_v34, %v4264_v24  ;;  %v4309_v0 = vsel %vm62_vm0, %v4227_v10, 0.0  ;;  %v4278_v39 = vadd.f32 %v4277_v63, %v4276_v44  ;;  %v4367_v19 = vsel %vm2347_vm13, %v4259_v18, %v4366_v13 }
 0xcc6   :  { %v4298_v47 = vrot.slane %v4297_v55, 2  ;;  %v4310_v30 = vrot.slane %v4309_v0, 4  ;;  %v4286_v15 = vrot.slane %v4285_v16, 1  ;;  %v4290_v52 = vadd.f32 %v4289_v49, %v4288_v5 }
 0xcc7   :  { %v4302_v53 = vsel %vm62_vm0, %v4226_v41, 0.0  ;;  %v4273_v31 = vadd.f32 %v4272_v27, %v4271_v57  ;;  %v4279_v8 = vrot.slane %v4278_v39, 1  ;;  %v4368_v59 = vsel %vm2349_vm15, %v4266_v7, %v4367_v19 }
 0xcc8   :  { %v4299_v33 = vadd.f32 %v4298_v47, %v4297_v55  ;;  %v4311_v61 = vadd.f32 %v4310_v30, %v4309_v0  ;;  %v4291_v4 = vrot.slane %v4290_v52, 2  ;;  %v4303_v23 = vrot.slane %v4302_v53, 4 }
 0xcc9   :  { %v4280_v9 = vadd.f32 %v4279_v8, %v4278_v39  ;;  %v4369_v1 = vsel %vm2351_vm11, %v4273_v31, %v4368_v59  ;;  %v4287_v38 = vadd.f32 %v4286_v15, %v4285_v16 }
 0xcca   :  { %v4300_v3 = vrot.slane %v4299_v33, 1  ;;  %v4312_v25 = vrot.slane %v4311_v61, 2  ;;  %v5686_v42 = vpop.f32.mrb[52].mxu1  ;;  %v4292_v6 = vadd.f32 %v4291_v4, %v4290_v52  ;;  %v4304_v35 = vadd.f32 %v4303_v23, %v4302_v53 }
 0xccb   :  { %v4229_v43 = vmul.f32 %v5686_v42, %v4195_v50  ;;  %v4005_v32 = vpop.f32.mrb[53].mxu1  ;;  %v4370_v46 = vsel %vm2353_vm10, %v4280_v9, %v4369_v1 }
 0xccc   :  { %v4301_v37 = vadd.f32 %v4300_v3, %v4299_v33  ;;  %v4313_v58 = vadd.f32 %v4312_v25, %v4311_v61  ;;  %v4228_v40 = vmul.f32 %v7911_v62, %v4005_v32  ;;  %v4293_v14 = vrot.slane %v4292_v6, 1 }
 0xccd   :  { %v4305_v57 = vrot.slane %v4304_v35, 2  ;;  %v4323_v29 = vsel %vm62_vm0, %v4229_v43, 0.0  ;;  %v4371_v26 = vsel %vm8323_vm6, %v4287_v38, %v4370_v46 }
 0xcce   :  { %v4324_v20 = vrot.slane %v4323_v29, 4  ;;  %v4316_v24 = vsel %vm62_vm0, %v4228_v40, 0.0  ;;  %5698 = vmatprep.mubr.msk.f32.mxu0 %vm62_vm0, %v4371_v26  ;;  %v4294_v11 = vadd.f32 %v4293_v14, %v4292_v6  ;;  %v4314_v44 = vrot.slane %v4313_v58, 1 }
 0xccf   :  { %v4306_v54 = vadd.f32 %v4305_v57, %v4304_v35  ;;  %v4317_v18 = vrot.slane %v4316_v24, 4 }
 0xcd0   :  { %v4325_v60 = vadd.f32 %v4324_v20, %v4323_v29  ;;  %v4372_v13 = vsel %vm2343_vm12, %v4301_v37, %v4294_v11  ;;  %v4315_v49 = vadd.f32 %v4314_v44, %v4313_v58  ;;  %vm8324_vm12 = vmmov %vm8323_vm6 }
 0xcd1   :  { %v5689_v62 = vpop.f32.mrb[54].mxu1  ;;  %v4307_v34 = vrot.slane %v4306_v54, 1  ;;  %v4318_v5 = vadd.f32 %v4317_v18, %v4316_v24 }
 0xcd2   :  { %v4231_v10 = vmul.f32 %v5689_v62, %v4199_v48  ;;  %v4015_v51 = vpop.f32.mrb[55].mxu1  ;;  %v4326_v27 = vrot.slane %v4325_v60, 2  ;;  %v5214_v48 = vld [vmem:[%s8081_s11 + $0x28] sm:$0xff]  ;;  %v5216_v62 = vld [vmem:[%s8081_s11 + $0x38] sm:$0xff] }
 0xcd3   :  { %v4230_v16 = vmul.f32 %v4197_v2, %v4015_v51  ;;  %v4308_v63 = vadd.f32 %v4307_v34, %v4306_v54  ;;  %v4319_v55 = vrot.slane %v4318_v5, 2  ;;  %v5220_v34 = vld [vmem:[%s8082_s12 + $0x48] sm:$0xff] }
 0xcd4   :  { %v4337_v7 = vsel %vm62_vm0, %v4231_v10, 0.0  ;;  %v4327_v0 = vadd.f32 %v4326_v27, %v4325_v60  ;;  %v5215_v60 = vld [vmem:[%s8081_s11 + $0x30] sm:$0xff] }
 0xcd5   :  { %v4338_v41 = vrot.slane %v4337_v7, 4  ;;  %v4330_v39 = vsel %vm62_vm0, %v4230_v16, 0.0  ;;  %v4373_v47 = vsel %vm2345_vm14, %v4308_v63, %v4372_v13  ;;  %v4320_v30 = vadd.f32 %v4319_v55, %v4318_v5  ;;  %v5219_v13 = vld [vmem:[%s8082_s12 + $0x40] sm:$0xff] }
 0xcd6   :  { %v4331_v15 = vrot.slane %v4330_v39, 4  ;;  %v4328_v52 = vrot.slane %v4327_v0, 1  ;;  %v4374_v53 = vsel %vm2347_vm13, %v4315_v49, %v4373_v47  ;;  %v5863_v2 = vpack.c.bf16 %v5216_v62, %v5215_v60  ;;  %v4729_v60 = vld [vmem:[%s8084_s14 + $0x18] sm:$0xff] }
 0xcd7   :  { %v4339_v19 = vadd.f32 %v4338_v41, %v4337_v7  ;;  %v4321_v31 = vrot.slane %v4320_v30, 1  ;;  %v5867_v5 = vpack.c.bf16 %v5220_v34, %v5219_v13  ;;  %v7977_v7 = vld [vmem:[%s8083_s13 + $0x8] sm:$0x3f] }
 0xcd8   :  { %v4332_v8 = vadd.f32 %v4331_v15, %v4330_v39  ;;  %v4329_v23 = vadd.f32 %v4328_v52, %v4327_v0  ;;  %v4491_v49 = vrot.slane %v7977_v7, %v6452_v17  ;;  %v4497_v39 = vrot.slane %v7977_v7, %v6444_v12  ;;  %v5223_v12 = vld [vmem:[%s8082_s12 + $0x60] sm:$0xff]  ;;  %v5233_v13 = vld [vmem:[%s8084_s14 + $0x28] sm:$0xff] }
 0xcd9   :  { %v4340_v33 = vrot.slane %v4339_v19, 2  ;;  %v4322_v61 = vadd.f32 %v4321_v31, %v4320_v30 }
 0xcda   :  { %v4333_v4 = vrot.slane %v4332_v8, 2 }
 0xcdb   :  { %v4341_v59 = vadd.f32 %v4340_v33, %v4339_v19  ;;  %v4375_v50 = vsel %vm2349_vm15, %v4322_v61, %v4374_v53  ;;  %v5221_v53 = vld [vmem:[%s8082_s12 + $0x50] sm:$0xff]  ;;  %v5222_v19 = vld [vmem:[%s8082_s12 + $0x58] sm:$0xff]  ;;  %v5224_v33 = vld [vmem:[%s8082_s12 + $0x68] sm:$0xff] }
 0xcdc   :  { %v4334_v9 = vadd.f32 %v4333_v4, %v4332_v8  ;;  %v4376_v25 = vsel %vm2351_vm11, %v4329_v23, %v4375_v50  ;;  %v5871_v8 = vpack.c.bf16 %v5222_v19, %v5221_v53  ;;  %v5875_v61 = vpack.c.bf16 %v5224_v33, %v5223_v12  ;;  %v5225_v4 = vld [vmem:[%s8082_s12 + $0x70] sm:$0xff]  ;;  %v5226_v23 = vld [vmem:[%s8082_s12 + $0x78] sm:$0xff] }
 0xcdd   :  { %v4342_v3 = vrot.slane %v4341_v59, 1  ;;  %v4508_v50 = vrot.slane %v7977_v7, %v6462_v22  ;;  %v5234_v19 = vld [vmem:[%s8084_s14 + $0x30] sm:$0xff] }
 0xcde   :  { %v4335_v42 = vrot.slane %v4334_v9, 1 }
 0xcdf   :  { %v4343_v38 = vadd.f32 %v4342_v3, %v4341_v59  ;;  %v5879_v59 = vpack.c.bf16 %v5226_v23, %v5225_v4 }
 0xce0   :  { %v4336_v1 = vadd.f32 %v4335_v42, %v4334_v9 }
 0xce2   :  { %v4377_v6 = vsel %vm2353_vm10, %v4336_v1, %v4376_v25  ;;  %vm5057_vm10 = vcmask 64512  }
 0xce3   :  { %v4378_v35 = vsel %vm8324_vm12, %v4343_v38, %v4377_v6  ;;  %v4604_v6 = vrot.slane %v7977_v7, %v6459_v21  ;;  %v4727_v21 = vld [vmem:[%s8084_s14 + $0x8] sm:$0xff] }
 0xce4   :  { %5699 = vmatmul.mubr.msk.f32.vlgmr.msra.gmra.mrb[52].mxu0 %vm62_vm0, %v4378_v35 }
 0xdb7   :  { %v5700_v43 = vpop.f32.mrb[52].mxu0 }
 0xdb8   :  { %v4461_v32 = vadd.f32 %v5700_v43, %v7431_v36  ;;  %v4449_v37 = vpop.f32.mrb[53].mxu0 }
 0xdb9   :  { %v4460_v58 = vadd.f32 %v4449_v37, %v7429_v56  ;;  %v5213_v56 = vld [vmem:[%s8081_s11 + $0x20] sm:$0xff] }
 0xdba   :  { %v4465_v40 = vsel %vm62_vm0, %v4461_v32, 0.0  ;;  %v5859_v44 = vpack.c.bf16 %v5214_v48, %v5213_v56 }
 0xdbb   :  { %4466 = vadd.xlane.f32.xlu1 %v4465_v40  ;;  %v4462_v46 = vsel %vm62_vm0, %v4460_v58, 0.0 }
 0xdbc   :  { %4463 = vadd.xlane.f32.xlu0 %v4462_v46  ;;  %5860 = vmatprep.subr.bf16.mxu0 %v5859_v44 }
 0xdbd   :  { %5862 = vmatpush3.bf16.msra.mxu0 %v5859_v44  ;;  %v4728_v44 = vld [vmem:[%s8084_s14 + $0x10] sm:$0xff] }
 0xdbe   :  { %5864 = vmatprep.subr.bf16.mxu0 %v5863_v2  ;;  %v5887_v62 = vpack.c.bf16 %v4729_v60, %v4728_v44 }
 0xdc1   :  { %5866 = vmatpush3.bf16.msra.mxu0 %v5863_v2  ;;  %v5232_v2 = vld [vmem:[%s8084_s14 + $0x20] sm:$0xff] }
 0xdc2   :  { %5868 = vmatprep.subr.bf16.mxu0 %v5867_v5  ;;  %v5891_v34 = vpack.c.bf16 %v5233_v13, %v5232_v2 }
 0xe48   :  { %v4467_v14 = vpop.xlane.xlu1 %4466 }
 0xe49   :  { %v4469_v57 = vmul.f32 0.03125, %v4467_v14  ;;  %v4464_v29 = vpop.xlane.xlu0 %4463  ;;  %v4726_v14 = vld [vmem:[%s8084_s14] sm:$0xff] }
 0xe4a   :  { %v4468_v26 = vmul.f32 0.03125, %v4464_v29 }
 0xe4b   :  { %v4471_v20 = vsub.f32 %v4461_v32, %v4469_v57  ;;  %v5883_v57 = vpack.c.bf16 %v4727_v21, %v4726_v14 }
 0xe4c   :  { %v4470_v24 = vsub.f32 %v4460_v58, %v4468_v26 }
 0xe4d   :  { %v4473_v18 = vmul.f32 %v4471_v20, %v4471_v20  ;;  %5884 = vmatprep.subr.bf16.mxu1 %v5883_v57 }
 0xe4e   :  { %v4472_v11 = vmul.f32 %v4470_v24, %v4470_v24  ;;  %5886 = vmatpush3.bf16.msra.mxu1 %v5883_v57 }
 0xe4f   :  { %v4477_v36 = vsel %vm62_vm0, %v4473_v18, 0.0  ;;  %5888 = vmatprep.subr.bf16.mxu1 %v5887_v62 }
 0xe50   :  { %v4474_v54 = vsel %vm62_vm0, %v4472_v11, 0.0 }
 0xe51   :  { %4475 = vadd.xlane.f32.xlu0 %v4474_v54 }
 0xe52   :  { %5890 = vmatpush3.bf16.msra.mxu1 %v5887_v62 }
 0xe55   :  { %4478 = vadd.xlane.f32.xlu0 %v4477_v36 }
 0xede   :  { %v4476_v10 = vpop.xlane.xlu0 %4475 }
 0xedf   :  { %v4480_v51 = vmul.f32 0.03125, %v4476_v10 }
 0xee1   :  { %v4482_v27 = vadd.f32 1e-05, %v4480_v51 }
 0xee2   :  { %v4479_v16 = vpop.xlane.xlu0 %4478 }
 0xee3   :  { %6044 = vrsqrt.f32 %v4482_v27  ;;  %v4481_v63 = vmul.f32 0.03125, %v4479_v16 }
 0xee5   :  { %v4483_v55 = vadd.f32 1e-05, %v4481_v63 }
 0xee7   :  { %6046 = vrsqrt.f32 %v4483_v55  ;;  %v4717_v55 = vrot.slane %v7977_v7, %v8251_v45  ;;  %v5235_v45 = vld [vmem:[%s8084_s14 + $0x38] sm:$0xff] }
 0xeed   :  { %v6045_v0 = vpop.eup %6044 }
 0xeee   :  { %v4486_v41 = vmul.f32 %v6045_v0, %v4470_v24 }
 0xef0   :  { %v4492_v47 = vmul.f32 %v4491_v49, %v4486_v41 }
 0xef1   :  { %v6047_v30 = vpop.eup %6046 }
 0xef2   :  { %v4487_v15 = vmul.f32 %v6047_v30, %v4471_v20  ;;  %v4498_v52 = vadd.f32 %v4497_v39, %v4492_v47  ;;  %v4723_v47 = vrot.slane %v7977_v7, %v8252_v28  ;;  %v6097_v28 = vmov 0.0   ;;  %v5229_v7 = vld [vmem:[%s8085_s15] ss:$0 sm:$0xff] }
 0xef3   :  { %5753 = vmatprep.subr.mxu1 %v6097_v28 }
 0xef4   :  { %v4493_v31 = vmul.f32 %v4491_v49, %v4487_v15  ;;  %5709 = vmatprep.mubr.msk.f32.mxu0 %vm62_vm0, %v4498_v52 }
 0xef6   :  { %v4499_v17 = vadd.f32 %v4497_v39, %v4493_v31  ;;  %v5895_v31 = vpack.c.bf16 %v5235_v45, %v5234_v19 }
 0xef8   :  { %5710 = vmatmul.mubr.msk.f32.vlgmr.msra.gmra.mrb[54].mxu0 %vm62_vm0, %v4499_v17 }
 0xef9   :  { %5870 = vmatpush3.bf16.msra.mxu0 %v5867_v5 }
 0xefa   :  { %5872 = vmatprep.subr.bf16.mxu0 %v5871_v8 }
 0xefd   :  { %5874 = vmatpush3.bf16.msra.mxu0 %v5871_v8 }
 0xefe   :  { %5876 = vmatprep.subr.bf16.mxu0 %v5875_v61 }
 0xf01   :  { %5878 = vmatpush3.bf16.msra.mxu0 %v5875_v61 }
 0xf02   :  { %5880 = vmatprep.subr.bf16.mxu0 %v5879_v59 }
 0xf05   :  { %5882 = vmatpush3.bf16.msra.mxu0 %v5879_v59 }
 0xf06   :  { %5892 = vmatprep.subr.bf16.mxu0 %v5891_v34 }
 0xfcb   :  { %v5711_v9 = vpop.f32.mrb[54].mxu0 }
 0xfcc   :  { %v4587_v3 = vadd.f32 %v5711_v9, %v4508_v50  ;;  %v4581_v25 = vpop.f32.mrb[55].mxu0 }
 0xfcd   :  { %v4582_v42 = vadd.f32 %v4581_v25, %v4508_v50  ;;  %v5242_v50 = vld [vmem:[%s8075_s5 + $0x30] sm:$0xff] }
 0xfce   :  { %v4591_v38 = vmax.f32 %v4587_v3, 0.0 }
 0xfcf   :  { %v4590_v1 = vmax.f32 %v4582_v42, 0.0  ;;  %v5243_v42 = vld [vmem:[%s8075_s5 + $0x38] sm:$0xff] }
 0xfd1   :  { %5728 = vmatprep.mubr.msk.f32.mxu0 %vm2588_vm9, %v4590_v1 }
 0xfd2   :  { %5729 = vmatmul.mubr.msk.f32.vlgmr.msra.gmra.mrb[56].mxu0 %vm2588_vm9, %v4591_v38  ;;  %vm6098_vm9 = vmmov 0  }
 0xfd3   :  { %5894 = vmatpush3.bf16.msra.mxu0 %v5891_v34 }
 0xfd4   :  { %5896 = vmatprep.subr.bf16.mxu0 %v5895_v31 }
 0xfd7   :  { %5898 = vmatpush3.bf16.msra.mxu0 %v5895_v31 }
0x10a5   :  { %v5730_v35 = vpop.f32.mrb[56].mxu0 }
0x10a6   :  { %v4683_v43 = vadd.f32 %v5730_v35, %v4604_v6  ;;  %v4677_v32 = vpop.f32.mrb[57].mxu0 }
0x10a7   :  { %v4678_v37 = vadd.f32 %v4677_v32, %v4604_v6 }
0x10a8   :  { %v4687_v58 = vadd.f32 %v4683_v43, %v4499_v17 }
0x10a9   :  { %v4686_v40 = vadd.f32 %v4678_v37, %v4498_v52 }
0x10aa   :  { %v4691_v22 = vsel %vm62_vm0, %v4687_v58, 0.0 }
0x10ab   :  { %4692 = vadd.xlane.f32.xlu0 %v4691_v22  ;;  %v4688_v46 = vsel %vm62_vm0, %v4686_v40, 0.0 }
0x10ac   :  { %4689 = vadd.xlane.f32.xlu1 %v4688_v46 }
0x1138   :  { %v4693_v29 = vpop.xlane.xlu0 %4692 }
0x1139   :  { %v4695_v26 = vmul.f32 0.03125, %v4693_v29  ;;  %v4690_v20 = vpop.xlane.xlu1 %4689 }
0x113a   :  { %v4694_v24 = vmul.f32 0.03125, %v4690_v20 }
0x113b   :  { %v4697_v11 = vsub.f32 %v4687_v58, %v4695_v26 }
0x113c   :  { %v4696_v54 = vsub.f32 %v4686_v40, %v4694_v24 }
0x113d   :  { %v4699_v18 = vmul.f32 %v4697_v11, %v4697_v11 }
0x113e   :  { %v4698_v36 = vmul.f32 %v4696_v54, %v4696_v54 }
0x113f   :  { %v4703_v56 = vsel %vm62_vm0, %v4699_v18, 0.0 }
0x1140   :  { %4704 = vadd.xlane.f32.xlu0 %v4703_v56  ;;  %v4700_v48 = vsel %vm62_vm0, %v4698_v36, 0.0 }
0x1141   :  { %4701 = vadd.xlane.f32.xlu1 %v4700_v48 }
0x11cd   :  { %v4705_v5 = vpop.xlane.xlu0 %4704 }
0x11ce   :  { %v4707_v10 = vmul.f32 0.03125, %v4705_v5  ;;  %v4702_v51 = vpop.xlane.xlu1 %4701 }
0x11cf   :  { %v4706_v27 = vmul.f32 0.03125, %v4702_v51 }
0x11d0   :  { %v4709_v16 = vadd.f32 1e-05, %v4707_v10 }
0x11d1   :  { %v4708_v63 = vadd.f32 1e-05, %v4706_v27 }
0x11d2   :  { %6048 = vrsqrt.f32 %v4709_v16 }
0x11d3   :  { %6050 = vrsqrt.f32 %v4708_v63 }
0x11dc   :  { %v6049_v49 = vpop.eup %6048 }
0x11dd   :  { %v6051_v0 = vpop.eup %6050  ;;  %v4713_v41 = vmul.f32 %v6049_v49, %v4697_v11 }
0x11de   :  { %v4712_v39 = vmul.f32 %v6051_v0, %v4696_v54 }
0x11df   :  { %v4719_v30 = vmul.f32 %v4717_v55, %v4713_v41 }
0x11e0   :  { %v4718_v15 = vmul.f32 %v4717_v55, %v4712_v39 }
0x11e1   :  { %v4725_v53 = vadd.f32 %v4723_v47, %v4719_v30 }
0x11e2   :  { %v4724_v52 = vadd.f32 %v4723_v47, %v4718_v15 }
0x11e4   :  { %5739 = vmatprep.mubr.msk.f32.mxu1 %vm62_vm0, %v4724_v52 }
0x11e5   :  { %5740 = vmatmul.mubr.msk.f32.vlgmr.msra.gmra.mrb[56].mxu1 %vm62_vm0, %v4725_v53 }
0x11e6   :  { %5755 = vmatprep.mubr.msk.f32.mxu1 %vm6098_vm9, %v6097_v28 }
0x12b8   :  { %v5741_v17 = vpop.f32.mrb[56].mxu1 }
0x12b9   :  { %v4815_v8 = vadd.f32 %v5741_v17, %v5229_v7  ;;  %v4809_v12 = vpop.f32.mrb[57].mxu1 }
0x12ba   :  { %v4810_v33 = vadd.f32 %v5229_v7, %v4809_v12 }
0x12bb   :  { %v4819_v4 = vmax.f32 %v4815_v8, 0.0 }
0x12bc   :  { %v4818_v61 = vmax.f32 %v4810_v33, 0.0 }
0x12be   :  { %5750 = vmatprep.mubr.msk.f32.mxu0 %vm62_vm0, %v4818_v61  ;;  %5754 = vmatpush3.xpose.msk.msra.mxu1 %vm62_vm0, %v4818_v61 }
0x12bf   :  { %5751 = vmatmul.mubr.msk.f32.vlgmr.msra.gmra.mrb[58].mxu0 %vm62_vm0, %v4819_v4  ;;  %5758 = vmatprep.subr.mxu1 %v6097_v28 }
0x1392   :  { %v5752_v23 = vpop.f32.mrb[58].mxu0 }
0x1393   :  { %v4897_v59 = vpop.f32.mrb[59].mxu0 }
0x1394   :  { %5756 = vmatmul.mubr.msk.f32.vlgmr.msra.gmra.mrb[58].mxu1 %vm62_vm0, %v4897_v59 }
0x1395   :  { %5759 = vmatpush3.xpose.msk.msra.mxu1 %vm62_vm0, %v4819_v4  ;;  %5760 = vmatprep.mubr.msk.f32.mxu1 %vm6098_vm9, %v6097_v28 }
0x1398   :  { %5761 = vmatmul.mubr.msk.f32.vlgmr.msra.gmra.mrb[60].mxu1 %vm62_vm0, %v5752_v23 }
0x1467   :  { %v4975_v9 = vpop.f32.mrb[58].mxu1 }
0x1468   :  { %v5055_v3 = vmul.f32 %v5242_v50, %v4975_v9  ;;  %v5757_v25 = vpop.f32.mrb[59].mxu1 }
0x146a   :  { %5058 = vst.msk [vmem:[#allocation2] sm:$0xff] %vm5057_vm10, %v5055_v3 }
0x146b   :  { %v5048_v1 = vpop.f32.mrb[60].mxu1 }
0x146c   :  { %v5056_v38 = vmul.f32 %v5243_v42, %v5048_v1  ;;  %v5762_v6 = vpop.f32.mrb[61].mxu1 }
0x146e   :  { %5059 = vst.msk [vmem:[#allocation2 + $0x8] sm:$0xff] %vm5057_vm10, %v5056_v38 }
0x146f   :  { %6080 = shalt.err (!%p6077_p4)
}
0x1470   :  { %s6081_s17 = scalar_lea.hbm %s8086_s16, 256 }
0x1471   :  { %p6082_p5 = scmp.ne.s32.totalorder %s8086_s16, %s6081_s17  ;;  %p6085_p6 = scmp.lt.u32.totalorder %s6081_s17, %s8086_s16 }
0x1473   :  { %p6087_p7 = pnand %p6085_p6, %p6082_p5 }
0x1475   :  { %6090 = shalt.err (!%p6087_p7)
}
0x1476   :  { %s6100_s0 = smov 128   ;;  %s6101_s18 = smov 8  }
0x1477   :  { %5071 = dma.vmem_to_hbm [thread:$0]  %s5066_s6, 256, %s8086_s16, [#allocation3], %s6100_s0, %s6100_s0, %s6101_s18  }
0x1478   :  { %6091 = dma.done.wait [#allocation3], 256  }
0x1479   :  { %6092 = vsyncadd [#allocation3], 4294967040 }
0x147a   :  { %5075 = vsyncpa [#allocation3], 1 }

</bundles_post_ra>
